<compile_context>
chip_gen: v7x
topology: tpu7x:2x2x1
jax: 0.10.0
libtpu: 0.0.40
codegen_flags: <defaults>
</compile_context>

<pallas_src>
import jax
import jax.numpy as jnp
from jax.experimental import pallas as pl
from jax.experimental.pallas import tpu as pltpu

LANE = 128
SUBLANE_BF16 = 16


def _round_up(n, m):
    return pl.cdiv(n, m) * m


def mlp_kernel(x_ref, w1_ref, b1_ref, w2_ref, b2_ref,
               w3_ref, b3_ref, w4_ref, b4_ref, o_ref):
    # x streams in as f32 (no wrapper-side cast -> no extra HBM round trip);
    # the bf16 cast happens here on the VPU, which has plenty of slack.
    x = x_ref[...].astype(jnp.bfloat16)
    # Layer 1: bf16 MXU matmul, f32 accumulate; bias + ReLU in f32.
    h = jnp.dot(x, w1_ref[...], preferred_element_type=jnp.float32)
    h = jnp.maximum(h + b1_ref[...], 0.0).astype(jnp.bfloat16)
    # Layer 2 (padded to 128 lanes).
    h = jnp.dot(h, w2_ref[...], preferred_element_type=jnp.float32)
    h = jnp.maximum(h + b2_ref[...], 0.0).astype(jnp.bfloat16)
    # Layer 3 (padded to 128 lanes).
    h = jnp.dot(h, w3_ref[...], preferred_element_type=jnp.float32)
    h = jnp.maximum(h + b3_ref[...], 0.0).astype(jnp.bfloat16)
    # Layer 4 (padded to 128 output lanes) + exact sigmoid in f32.
    z = jnp.dot(h, w4_ref[...], preferred_element_type=jnp.float32) + b4_ref[...]
    o_ref[...] = (1.0 / (1.0 + jnp.exp(-z))).astype(o_ref.dtype)


def prepare_params(params):
    """One-time weight prep: bf16 cast + zero-pad every feature dim to 128 lanes.

    Call once at model-load time; do NOT rebuild per forward call.
    Padded bias lanes are zero, so padded hidden lanes are relu(0) = 0 and
    contribute nothing downstream; padded output lanes are sliced off.
    """
    w1, b1 = params["w1"], params["b1"]
    w2, b2 = params["w2"], params["b2"]
    w3, b3 = params["w3"], params["b3"]
    w4, b4 = params["w4"], params["b4"]

    ind, h1d = w1.shape
    h2d, h3d, outd = w2.shape[1], w3.shape[1], w4.shape[1]
    h1p, h2p, h3p, outp = (_round_up(d, LANE) for d in (h1d, h2d, h3d, outd))

    def pad_w(w, rows, cols):
        out = jnp.zeros((rows, cols), jnp.bfloat16)
        return out.at[: w.shape[0], : w.shape[1]].set(w.astype(jnp.bfloat16))

    def pad_b(b, cols):
        b = b.reshape(1, -1).astype(jnp.float32)
        return jnp.zeros((1, cols), jnp.float32).at[:, : b.shape[1]].set(b)

    return dict(
        w1=pad_w(w1, ind, h1p), b1=pad_b(b1, h1p),
        w2=pad_w(w2, h1p, h2p), b2=pad_b(b2, h2p),
        w3=pad_w(w3, h2p, h3p), b3=pad_b(b3, h3p),
        w4=pad_w(w4, h3p, outp), b4=pad_b(b4, outp),
    )


def model_full_forward(x, prep, outd, *, batch_tile=256):
    """Fused MLP forward. x: (B, ind) f32; prep: output of prepare_params."""
    w1, b1 = prep["w1"], prep["b1"]
    w2, b2 = prep["w2"], prep["b2"]
    w3, b3 = prep["w3"], prep["b3"]
    w4, b4 = prep["w4"], prep["b4"]

    B, ind = x.shape
    assert ind == w1.shape[0]
    h1p, h2p, h3p, outp = w1.shape[1], w2.shape[1], w3.shape[1], w4.shape[1]

    # Batch tile: multiple of 16 (bf16 sublane packing); default 256 fills the
    # 256-wide MXU on v6e/v7x and amortizes ~0.35us/grid-step overhead.
    # v5e: pass batch_tile=128 (matches its 128x128 MXU).  The cap keeps
    # double-buffered f32 x tiles (~2 * tb * ind * 4B) far inside v7x VMEM.
    tb = min(int(batch_tile), 1024)
    tb = max(SUBLANE_BF16, _round_up(min(tb, B), SUBLANE_BF16))
    bp = _round_up(B, tb)
    # Pad batch only when needed (no-op copy avoided for aligned B).
    xk = x if bp == B else jnp.pad(x, ((0, bp - B), (0, 0)))

    # Advisory cost estimate (kernel is DMA/latency bound at these sizes).
    flops = 2 * bp * (ind * h1p + h1p * h2p + h2p * h3p + h3p * outp)
    bytes_accessed = (
        bp * ind * 4                                          # x in f32
        + (w1.size + w2.size + w3.size + w4.size) * 2         # bf16 weights
        + (b1.size + b2.size + b3.size + b4.size) * 4         # f32 biases
        + bp * outp * 2)                                      # bf16 output
    cost = pl.CostEstimate(flops=flops,
                           transcendentals=bp * outp,
                           bytes_accessed=bytes_accessed)

    # Weights/biases: constant block index -> fetched once, VMEM-resident
    # across all batch grid steps.  Activations stream tile-by-tile.
    # (pl.Buffered(1) single-buffering skipped: total weight footprint < 1 MiB.)
    const = lambda arr: pl.BlockSpec(arr.shape, lambda i: (0, 0))

    out = pl.pallas_call(
        mlp_kernel,
        out_shape=jax.ShapeDtypeStruct((bp, outp), jnp.bfloat16),
        grid_spec=pltpu.PrefetchScalarGridSpec(
            num_scalar_prefetch=0,
            grid=(bp // tb,),
            in_specs=[pl.BlockSpec((tb, ind), lambda i: (i, 0)),
                      const(w1), const(b1),
                      const(w2), const(b2),
                      const(w3), const(b3),
                      const(w4), const(b4)],
            out_specs=pl.BlockSpec((tb, outp), lambda i: (i, 0)),
        ),
        compiler_params=pltpu.CompilerParams(
            dimension_semantics=("parallel",)),
        cost_estimate=cost,
    )(xk, w1, b1, w2, b2, w3, b3, w4, b4)

    # Drop padded batch rows / padded output lanes; upcast bf16 -> f32.
    return out[:B, :outd].astype(jnp.float32)


def init_params(key, ind, h1d, h2d, h3d, outd):
    """Deterministic synthetic parameters (PyTorch-Linear-like uniform init)."""
    def linear(key, fan_in, fan_out):
        kw, kb = jax.random.split(key)
        bound = 1.0 / jnp.sqrt(float(fan_in))
        w = jax.random.uniform(kw, (fan_in, fan_out), jnp.float32, -bound, bound)
        b = jax.random.uniform(kb, (1, fan_out), jnp.float32, -bound, bound)
        return w, b

    k1, k2, k3, k4 = jax.random.split(key, 4)
    w1, b1 = linear(k1, ind, h1d)
    w2, b2 = linear(k2, h1d, h2d)
    w3, b3 = linear(k3, h2d, h3d)
    w4, b4 = linear(k4, h3d, outd)
    return dict(w1=w1, b1=b1, w2=w2, b2=b2, w3=w3, b3=b3, w4=w4, b4=b4)


def reference_forward(x, p):
    h = jnp.maximum(x @ p["w1"] + p["b1"], 0.0)
    h = jnp.maximum(h @ p["w2"] + p["b2"], 0.0)
    h = jnp.maximum(h @ p["w3"] + p["b3"], 0.0)
    return jax.nn.sigmoid(h @ p["w4"] + p["b4"])


if __name__ == "__main__":
    # ind = 2*28*28 = 1568 flattened digit pair, small hidden dims, outd = 1.
    # B = 512 with tile 256 -> grid of 2 "parallel" steps (one per v7x core).
    B, IND, H1, H2, H3, OUTD = 512, 2 * 28 * 28, 128, 64, 32, 1

    key = jax.random.PRNGKey(0)
    kx, kp = jax.random.split(key)
    x = jax.random.uniform(kx, (B, IND), jnp.float32)
    params = init_params(kp, IND, H1, H2, H3, OUTD)

    prep = prepare_params(params)   # one-time bf16 cast + lane padding
    fwd = jax.jit(model_full_forward, static_argnames=("outd", "batch_tile"))
    out = jax.block_until_ready(fwd(x, prep, outd=OUTD, batch_tile=256))
    assert out.shape == (B, OUTD)
    assert out.dtype == jnp.float32

    # Compare against the plain-f32 reference of the original module; the
    # deliberate bf16 matmul operands keep errors well under this tolerance
    # for sigmoid outputs in [0, 1].
    ref = jax.block_until_ready(reference_forward(x, params))
    max_err = float(jnp.max(jnp.abs(out - ref)))
    assert max_err < 1e-2, f"mismatch vs reference: max_err={max_err}"

    print("KERNEL_OK")
</pallas_src>

<mosaic_0001>
module attributes {stable_mosaic.version = 11 : i64} {
  func.func @mlp_kernel(%arg0: i32, %arg1: memref<256x1568xf32, #tpu.memory_space<vmem>>, %arg2: memref<1568x128xbf16, #tpu.memory_space<vmem>>, %arg3: memref<1x128xf32, #tpu.memory_space<vmem>>, %arg4: memref<128x128xbf16, #tpu.memory_space<vmem>>, %arg5: memref<1x128xf32, #tpu.memory_space<vmem>>, %arg6: memref<128x128xbf16, #tpu.memory_space<vmem>>, %arg7: memref<1x128xf32, #tpu.memory_space<vmem>>, %arg8: memref<128x128xbf16, #tpu.memory_space<vmem>>, %arg9: memref<1x128xf32, #tpu.memory_space<vmem>>, %arg10: memref<256x128xbf16, #tpu.memory_space<vmem>>) attributes {dimension_semantics = [#tpu.dimension_semantics<parallel>], iteration_bounds = array<i64: 2>, scalar_prefetch = 0 : i64, scratch_operands = 0 : i64, tpu.core_type = #tpu.core_type<tc>, window_params = [{transform_indices = @transform_0, window_bounds = array<i64: 256, 1568>}, {pipeline_mode = #tpu.pipeline_mode<synchronous>, transform_indices = @transform_1, window_bounds = array<i64: 1568, 128>}, {pipeline_mode = #tpu.pipeline_mode<synchronous>, transform_indices = @transform_2, window_bounds = array<i64: 1, 128>}, {pipeline_mode = #tpu.pipeline_mode<synchronous>, transform_indices = @transform_3, window_bounds = array<i64: 128, 128>}, {pipeline_mode = #tpu.pipeline_mode<synchronous>, transform_indices = @transform_4, window_bounds = array<i64: 1, 128>}, {pipeline_mode = #tpu.pipeline_mode<synchronous>, transform_indices = @transform_5, window_bounds = array<i64: 128, 128>}, {pipeline_mode = #tpu.pipeline_mode<synchronous>, transform_indices = @transform_6, window_bounds = array<i64: 1, 128>}, {pipeline_mode = #tpu.pipeline_mode<synchronous>, transform_indices = @transform_7, window_bounds = array<i64: 128, 128>}, {pipeline_mode = #tpu.pipeline_mode<synchronous>, transform_indices = @transform_8, window_bounds = array<i64: 1, 128>}, {transform_indices = @transform_9, window_bounds = array<i64: 256, 128>}]} {
    %c0 = arith.constant 0 : index
    %c0_0 = arith.constant 0 : index
    %0 = vector.load %arg1[%c0, %c0_0] : memref<256x1568xf32, #tpu.memory_space<vmem>>, vector<256x1568xf32>
    %1 = arith.truncf %0 : vector<256x1568xf32> to vector<256x1568xbf16>
    %c0_1 = arith.constant 0 : index
    %c0_2 = arith.constant 0 : index
    %2 = vector.load %arg2[%c0_1, %c0_2] : memref<1568x128xbf16, #tpu.memory_space<vmem>>, vector<1568x128xbf16>
    %cst = arith.constant dense<0.000000e+00> : vector<256x128xf32>
    %3 = tpu.matmul %1, %2, %cst {dimension_numbers = #tpu.dot_dimension_numbers<[1], [0], [0], [1], [0, 0, 1, 1], [], []>} : vector<256x1568xbf16>, vector<1568x128xbf16>, vector<256x128xf32> -> vector<256x128xf32>
    %c0_3 = arith.constant 0 : index
    %c0_4 = arith.constant 0 : index
    %4 = vector.load %arg3[%c0_3, %c0_4] : memref<1x128xf32, #tpu.memory_space<vmem>>, vector<1x128xf32>
    %5 = vector.broadcast %4 : vector<1x128xf32> to vector<256x128xf32>
    %6 = arith.addf %3, %5 : vector<256x128xf32>
    %cst_5 = arith.constant 0.000000e+00 : f32
    %7 = vector.broadcast %cst_5 : f32 to vector<256x128xf32>
    %8 = arith.maximumf %6, %7 : vector<256x128xf32>
    %9 = arith.truncf %8 : vector<256x128xf32> to vector<256x128xbf16>
    %c0_6 = arith.constant 0 : index
    %c0_7 = arith.constant 0 : index
    %10 = vector.load %arg4[%c0_6, %c0_7] : memref<128x128xbf16, #tpu.memory_space<vmem>>, vector<128x128xbf16>
    %cst_8 = arith.constant dense<0.000000e+00> : vector<256x128xf32>
    %11 = tpu.matmul %9, %10, %cst_8 {dimension_numbers = #tpu.dot_dimension_numbers<[1], [0], [0], [1], [0, 0, 1, 1], [], []>} : vector<256x128xbf16>, vector<128x128xbf16>, vector<256x128xf32> -> vector<256x128xf32>
    %c0_9 = arith.constant 0 : index
    %c0_10 = arith.constant 0 : index
    %12 = vector.load %arg5[%c0_9, %c0_10] : memref<1x128xf32, #tpu.memory_space<vmem>>, vector<1x128xf32>
    %13 = vector.broadcast %12 : vector<1x128xf32> to vector<256x128xf32>
    %14 = arith.addf %11, %13 : vector<256x128xf32>
    %cst_11 = arith.constant 0.000000e+00 : f32
    %15 = vector.broadcast %cst_11 : f32 to vector<256x128xf32>
    %16 = arith.maximumf %14, %15 : vector<256x128xf32>
    %17 = arith.truncf %16 : vector<256x128xf32> to vector<256x128xbf16>
    %c0_12 = arith.constant 0 : index
    %c0_13 = arith.constant 0 : index
    %18 = vector.load %arg6[%c0_12, %c0_13] : memref<128x128xbf16, #tpu.memory_space<vmem>>, vector<128x128xbf16>
    %cst_14 = arith.constant dense<0.000000e+00> : vector<256x128xf32>
    %19 = tpu.matmul %17, %18, %cst_14 {dimension_numbers = #tpu.dot_dimension_numbers<[1], [0], [0], [1], [0, 0, 1, 1], [], []>} : vector<256x128xbf16>, vector<128x128xbf16>, vector<256x128xf32> -> vector<256x128xf32>
    %c0_15 = arith.constant 0 : index
    %c0_16 = arith.constant 0 : index
    %20 = vector.load %arg7[%c0_15, %c0_16] : memref<1x128xf32, #tpu.memory_space<vmem>>, vector<1x128xf32>
    %21 = vector.broadcast %20 : vector<1x128xf32> to vector<256x128xf32>
    %22 = arith.addf %19, %21 : vector<256x128xf32>
    %cst_17 = arith.constant 0.000000e+00 : f32
    %23 = vector.broadcast %cst_17 : f32 to vector<256x128xf32>
    %24 = arith.maximumf %22, %23 : vector<256x128xf32>
    %25 = arith.truncf %24 : vector<256x128xf32> to vector<256x128xbf16>
    %c0_18 = arith.constant 0 : index
    %c0_19 = arith.constant 0 : index
    %26 = vector.load %arg8[%c0_18, %c0_19] : memref<128x128xbf16, #tpu.memory_space<vmem>>, vector<128x128xbf16>
    %cst_20 = arith.constant dense<0.000000e+00> : vector<256x128xf32>
    %27 = tpu.matmul %25, %26, %cst_20 {dimension_numbers = #tpu.dot_dimension_numbers<[1], [0], [0], [1], [0, 0, 1, 1], [], []>} : vector<256x128xbf16>, vector<128x128xbf16>, vector<256x128xf32> -> vector<256x128xf32>
    %c0_21 = arith.constant 0 : index
    %c0_22 = arith.constant 0 : index
    %28 = vector.load %arg9[%c0_21, %c0_22] : memref<1x128xf32, #tpu.memory_space<vmem>>, vector<1x128xf32>
    %29 = vector.broadcast %28 : vector<1x128xf32> to vector<256x128xf32>
    %30 = arith.addf %27, %29 : vector<256x128xf32>
    %cst_23 = arith.constant 0.000000e+00 : f32
    %31 = vector.broadcast %cst_23 : f32 to vector<256x128xf32>
    %32 = arith.subf %31, %30 : vector<256x128xf32>
    %33 = math.exp %32 : vector<256x128xf32>
    %cst_24 = arith.constant 1.000000e+00 : f32
    %34 = vector.broadcast %cst_24 : f32 to vector<256x128xf32>
    %35 = arith.addf %34, %33 : vector<256x128xf32>
    %cst_25 = arith.constant 1.000000e+00 : f32
    %36 = vector.broadcast %cst_25 : f32 to vector<256x128xf32>
    %37 = arith.divf %36, %35 : vector<256x128xf32>
    %38 = arith.truncf %37 : vector<256x128xf32> to vector<256x128xbf16>
    %c0_26 = arith.constant 0 : index
    %c0_27 = arith.constant 0 : index
    %39 = vector.load %arg10[%c0_26, %c0_27] : memref<256x128xbf16, #tpu.memory_space<vmem>>, vector<256x128xbf16>
    tpu.vector_store %arg10[%c0_26, %c0_27], %38 {strides = array<i32>} : memref<256x128xbf16, #tpu.memory_space<vmem>>, vector<256x128xbf16>,
    return
  }
  func.func @transform_0(%arg0: i32) -> (i32, i32) {
    %c0_i32 = arith.constant 0 : i32
    %c0_i32_0 = arith.constant 0 : i32
    return %arg0, %c0_i32 : i32, i32
  }
  func.func @transform_1(%arg0: i32) -> (i32, i32) {
    %c0_i32 = arith.constant 0 : i32
    %c0_i32_0 = arith.constant 0 : i32
    %c0_i32_1 = arith.constant 0 : i32
    return %c0_i32, %c0_i32_0 : i32, i32
  }
  func.func @transform_2(%arg0: i32) -> (i32, i32) {
    %c0_i32 = arith.constant 0 : i32
    %c0_i32_0 = arith.constant 0 : i32
    %c0_i32_1 = arith.constant 0 : i32
    return %c0_i32, %c0_i32_0 : i32, i32
  }
  func.func @transform_3(%arg0: i32) -> (i32, i32) {
    %c0_i32 = arith.constant 0 : i32
    %c0_i32_0 = arith.constant 0 : i32
    %c0_i32_1 = arith.constant 0 : i32
    return %c0_i32, %c0_i32_0 : i32, i32
  }
  func.func @transform_4(%arg0: i32) -> (i32, i32) {
    %c0_i32 = arith.constant 0 : i32
    %c0_i32_0 = arith.constant 0 : i32
    %c0_i32_1 = arith.constant 0 : i32
    return %c0_i32, %c0_i32_0 : i32, i32
  }
  func.func @transform_5(%arg0: i32) -> (i32, i32) {
    %c0_i32 = arith.constant 0 : i32
    %c0_i32_0 = arith.constant 0 : i32
    %c0_i32_1 = arith.constant 0 : i32
    return %c0_i32, %c0_i32_0 : i32, i32
  }
  func.func @transform_6(%arg0: i32) -> (i32, i32) {
    %c0_i32 = arith.constant 0 : i32
    %c0_i32_0 = arith.constant 0 : i32
    %c0_i32_1 = arith.constant 0 : i32
    return %c0_i32, %c0_i32_0 : i32, i32
  }
  func.func @transform_7(%arg0: i32) -> (i32, i32) {
    %c0_i32 = arith.constant 0 : i32
    %c0_i32_0 = arith.constant 0 : i32
    %c0_i32_1 = arith.constant 0 : i32
    return %c0_i32, %c0_i32_0 : i32, i32
  }
  func.func @transform_8(%arg0: i32) -> (i32, i32) {
    %c0_i32 = arith.constant 0 : i32
    %c0_i32_0 = arith.constant 0 : i32
    %c0_i32_1 = arith.constant 0 : i32
    return %c0_i32, %c0_i32_0 : i32, i32
  }
  func.func @transform_9(%arg0: i32) -> (i32, i32) {
    %c0_i32 = arith.constant 0 : i32
    %c0_i32_0 = arith.constant 0 : i32
    return %arg0, %c0_i32 : i32, i32
  }
}

</mosaic_0001>

<bundles_post_ra>
// kernel: model_full_forward.1
= control target key start
LH: loop header
LB: loop body
LE: loop exit
PB: predicated region body
PF: predicated region fallthrough
CT: control target
= control target key end

     0   :  { %s5750_s30 = smov 0   ;;  %s7031_s0 = inlined_call_operand.vmem [shape: f32[512,1568], index: 0, kind: input, shape index: {}]   ;;  %s7032_s1 = inlined_call_operand.vmem [shape: bf16[1568,128], index: 1, kind: input, shape index: {}]   ;;  %s7033_s2 = inlined_call_operand.vmem [shape: f32[1,128], index: 2, kind: input, shape index: {}]   ;;  %s7034_s3 = inlined_call_operand.vmem [shape: bf16[128,128], index: 3, kind: input, shape index: {}]   ;;  %s7035_s4 = inlined_call_operand.vmem [shape: f32[1,128], index: 4, kind: input, shape index: {}]   ;;  %s7036_s5 = inlined_call_operand.vmem [shape: bf16[128,128], index: 5, kind: input, shape index: {}]   ;;  %s7037_s6 = inlined_call_operand.vmem [shape: f32[1,128], index: 6, kind: input, shape index: {}]   ;;  %s7038_s7 = inlined_call_operand.vmem [shape: bf16[128,128], index: 7, kind: input, shape index: {}]   ;;  %s7039_s8 = inlined_call_operand.vmem [shape: f32[1,128], index: 8, kind: input, shape index: {}]   ;;  %s7040_s9 = inlined_call_operand.vmem [shape: bf16[512,128], index: 9, kind: output, shape index: {}]  }
   0x1 LB: > { %s4179_s10 = sadd.s32 4294967295, %s5698_s30   ;;  %p4183_p0 = scmp.ge.s32.totalorder %s5698_s30, 1  ;;  %s5698_s30 = sphi %s5750_s30, %s19_s30  }
   0x2   : > { %p289_p1 = scmp.lt.s32.totalorder %s5698_s30, 3 }
   0x4   : > { %p290_p2 = pnand %p4183_p0, %p289_p1 }
   0x5   : > { %v5442_v0 = vld [vmem:[%s7032_s1 + $0x40] sm:$0xff] (!%p290_p2)   ;;  %v5446_v4 = vld [vmem:[%s7032_s1 + $0x48] sm:$0xff] (!%p290_p2)   ;;  %v5450_v8 = vld [vmem:[%s7032_s1 + $0x50] sm:$0xff] (!%p290_p2)   ;;  %s4184_s20 = sshll.u32 (!%p290_p2), %s4179_s10, 5  ;;  %vm1755_vm0 = vcmask (!%p290_p2), 261120  }
   0x6   : > { %293 = sbr.rel (%p290_p2) target bundleno = 1395 (0x573), region = 56  ;;  %v5443_v1 = vld [vmem:[%s7032_s1] sm:$0xff] (!%p290_p2)   ;;  %4491 = vmatprep.subr.bf16.mxu0 (!%p290_p2), %v5442_v0  ;;  %v5447_v5 = vld [vmem:[%s7032_s1 + $0x8] sm:$0xff] (!%p290_p2)   ;;  %v5451_v9 = vld [vmem:[%s7032_s1 + $0x10] sm:$0xff] (!%p290_p2)   ;;  %p327_p3 = scmp.lt.s32.totalorder (!%p290_p2), %s4184_s20, 63 }
   0x7   : > { %v5444_v2 = vld [vmem:[%s7032_s1 + $0xc0] sm:$0xff] (!%p290_p2)   ;;  %4492 = vmatpush3.bf16.msra.mxu0 (!%p290_p2), %v5443_v1  ;;  %v5448_v6 = vld [vmem:[%s7032_s1 + $0xc8] sm:$0xff] (!%p290_p2)   ;;  %v5452_v10 = vld [vmem:[%s7032_s1 + $0xd0] sm:$0xff] (!%p290_p2)  }
   0x8   : > { %v5445_v3 = vld [vmem:[%s7032_s1 + $0x80] sm:$0xff] (!%p290_p2)   ;;  %4603 = vmatprep.subr.bf16.mxu1 (!%p290_p2), %v5444_v2  ;;  %4493 = vmatprep.subr.bf16.mxu0 (!%p290_p2), %v5446_v4  ;;  %v5449_v7 = vld [vmem:[%s7032_s1 + $0x88] sm:$0xff] (!%p290_p2)   ;;  %v5453_v11 = vld [vmem:[%s7032_s1 + $0x90] sm:$0xff] (!%p290_p2)  }
   0x9   : > { %4604 = vmatpush3.bf16.msra.mxu1 (!%p290_p2), %v5445_v3  ;;  %v5454_v12 = vld [vmem:[%s7032_s1 + $0x58] sm:$0xff] (!%p290_p2)   ;;  %v5458_v16 = vld [vmem:[%s7032_s1 + $0x60] sm:$0xff] (!%p290_p2)   ;;  %v5462_v20 = vld [vmem:[%s7032_s1 + $0x68] sm:$0xff] (!%p290_p2)  }
   0xa   : > { %4605 = vmatprep.subr.bf16.mxu1 (!%p290_p2), %v5448_v6  ;;  %v5455_v13 = vld [vmem:[%s7032_s1 + $0x18] sm:$0xff] (!%p290_p2)   ;;  %v5459_v17 = vld [vmem:[%s7032_s1 + $0x20] sm:$0xff] (!%p290_p2)   ;;  %v5463_v21 = vld [vmem:[%s7032_s1 + $0x28] sm:$0xff] (!%p290_p2)  }
   0xb   : > { %4494 = vmatpush3.bf16.msra.mxu0 (!%p290_p2), %v5447_v5  ;;  %v5456_v14 = vld [vmem:[%s7032_s1 + $0xd8] sm:$0xff] (!%p290_p2)   ;;  %v5460_v18 = vld [vmem:[%s7032_s1 + $0xe0] sm:$0xff] (!%p290_p2)   ;;  %v5464_v22 = vld [vmem:[%s7032_s1 + $0xe8] sm:$0xff] (!%p290_p2)  }
   0xc   : > { %4495 = vmatprep.subr.bf16.mxu0 (!%p290_p2), %v5450_v8  ;;  %v5457_v15 = vld [vmem:[%s7032_s1 + $0x98] sm:$0xff] (!%p290_p2)   ;;  %v5461_v19 = vld [vmem:[%s7032_s1 + $0xa0] sm:$0xff] (!%p290_p2)   ;;  %v5465_v23 = vld [vmem:[%s7032_s1 + $0xa8] sm:$0xff] (!%p290_p2)  }
   0xd   : > { %4606 = vmatpush3.bf16.msra.mxu1 %v5449_v7  ;;  %s7042_s20 = smov (!%p327_p3, %s4184_s20), 63  ;;  %v5466_v24 = vld [vmem:[%s7032_s1 + $0x70] sm:$0xff]   ;;  %v5470_v28 = vld [vmem:[%s7032_s1 + $0x78] sm:$0xff]   ;;  %v5474_v38 = vld [vmem:[%s7032_s1 + $0x140] sm:$0xff]  }
   0xe   : > { %4607 = vmatprep.subr.bf16.mxu1 %v5452_v10  ;;  %s5433_s24 = smul.u32 104, %s7042_s20  ;;  %v5467_v25 = vld [vmem:[%s7032_s1 + $0x30] sm:$0xff]   ;;  %v5471_v29 = vld [vmem:[%s7032_s1 + $0x38] sm:$0xff]   ;;  %v5475_v42 = vld [vmem:[%s7032_s1 + $0x100] sm:$0xff]   ;;  %s4187_s28 = sshll.u32 %s7042_s20, 2 }
   0xf   : > { %4496 = vmatpush3.bf16.msra.mxu0 %v5451_v9  ;;  %v5468_v26 = vld [vmem:[%s7032_s1 + $0xf0] sm:$0xff]   ;;  %v5472_v30 = vld [vmem:[%s7032_s1 + $0xf8] sm:$0xff]   ;;  %v5476_v60 = vld [vmem:[%s7032_s1 + $0x148] sm:$0xff]   ;;  %s6994_s11 = scalar_lea.vmem %s7040_s9, %s4187_s28 }
  0x10   : > { %4497 = vmatprep.subr.bf16.mxu0 %v5454_v12  ;;  %v5469_v27 = vld [vmem:[%s7032_s1 + $0xb0] sm:$0xff]   ;;  %s5853_s15 = scalar_lea.vmem %s7031_s0, %s5433_s24  ;;  %v5473_v34 = vld [vmem:[%s7032_s1 + $0xb8] sm:$0xff]   ;;  %v5477_v0 = vld [vmem:[%s7032_s1 + $0x108] sm:$0xff]  }
  0x11   : > { %4608 = vmatpush3.bf16.msra.mxu1 %v5453_v11  ;;  %v341_v31 = vld [vmem:[%s5853_s15 + $0x8] sm:$0xff]  ;;  %v354_v32 = vld [vmem:[%s5853_s15 + $0x70] sm:$0xff]  ;;  %v340_v35 = vld [vmem:[%s5853_s15] sm:$0xff] }
  0x12   : > { %4609 = vmatprep.subr.bf16.mxu1 %v5456_v14  ;;  %v757_v33 = vpack.c.bf16 %v354_v32, %v341_v31  ;;  %v353_v36 = vld [vmem:[%s5853_s15 + $0x68] sm:$0xff]  ;;  %v343_v39 = vld [vmem:[%s5853_s15 + $0x18] sm:$0xff]  ;;  %v356_v40 = vld [vmem:[%s5853_s15 + $0x80] sm:$0xff] }
  0x13   : > { %4498 = vmatpush3.bf16.msra.mxu0 %v5455_v13  ;;  %v756_v37 = vpack.c.bf16 %v353_v36, %v340_v35  ;;  %v759_v41 = vpack.c.bf16 %v356_v40, %v343_v39  ;;  %v342_v43 = vld [vmem:[%s5853_s15 + $0x10] sm:$0xff]  ;;  %v355_v44 = vld [vmem:[%s5853_s15 + $0x78] sm:$0xff]  ;;  %v380_v47 = vld [vmem:[%s5853_s15 + $0x140] sm:$0xff] }
  0x14   : > { %4499 = vmatprep.subr.bf16.mxu0 %v5458_v16  ;;  %1836 = vmatprep.mubr.bf16.mxu0 %v757_v33  ;;  %v367_v45 = vld [vmem:[%s5853_s15 + $0xd8] sm:$0xff]  ;;  %v758_v46 = vpack.c.bf16 %v355_v44, %v342_v43  ;;  %v366_v48 = vld [vmem:[%s5853_s15 + $0xd0] sm:$0xff]  ;;  %v369_v51 = vld [vmem:[%s5853_s15 + $0xe8] sm:$0xff] }
  0x15   : > { %4610 = vmatpush3.bf16.msra.mxu1 %v5457_v15  ;;  %1997 = vmatprep.mubr.bf16.mxu1 %v759_v41  ;;  %v379_v49 = vld [vmem:[%s5853_s15 + $0x138] sm:$0xff]  ;;  %v770_v50 = vpack.c.bf16 %v380_v47, %v367_v45  ;;  %v382_v52 = vld [vmem:[%s5853_s15 + $0x150] sm:$0xff]  ;;  %v393_v54 = vld [vmem:[%s5853_s15 + $0x1a8] sm:$0xff] }
  0x16   : > { %4611 = vmatprep.subr.bf16.mxu1 %v5460_v18  ;;  %v772_v53 = vpack.c.bf16 %v382_v52, %v369_v51  ;;  %v406_v55 = vld [vmem:[%s5853_s15 + $0x210] sm:$0xff]  ;;  %v769_v56 = vpack.c.bf16 %v379_v49, %v366_v48  ;;  %v368_v57 = vld [vmem:[%s5853_s15 + $0xe0] sm:$0xff]  ;;  %v381_v58 = vld [vmem:[%s5853_s15 + $0x148] sm:$0xff] }
  0x17   : > { %4500 = vmatpush3.bf16.msra.mxu0 %v5459_v17  ;;  %v783_v59 = vpack.c.bf16 %v406_v55, %v393_v54  ;;  %v395_v61 = vld [vmem:[%s5853_s15 + $0x1b8] sm:$0xff]  ;;  %v408_v62 = vld [vmem:[%s5853_s15 + $0x220] sm:$0xff]  ;;  %v771_v63 = vpack.c.bf16 %v381_v58, %v368_v57  ;;  %v405_v3 = vld [vmem:[%s5853_s15 + $0x208] sm:$0xff] }
  0x18   : > { %4501 = vmatprep.subr.bf16.mxu0 %v5462_v20  ;;  %v785_v1 = vpack.c.bf16 %v408_v62, %v395_v61  ;;  %v392_v2 = vld [vmem:[%s5853_s15 + $0x1a0] sm:$0xff]  ;;  %v419_v4 = vld [vmem:[%s5853_s15 + $0x278] sm:$0xff]  ;;  %v394_v6 = vld [vmem:[%s5853_s15 + $0x1b0] sm:$0xff] }
  0x19   : > { %4612 = vmatpush3.bf16.msra.mxu1 %v5461_v19  ;;  %v432_v5 = vld [vmem:[%s5853_s15 + $0x2e0] sm:$0xff]  ;;  %v407_v7 = vld [vmem:[%s5853_s15 + $0x218] sm:$0xff]  ;;  %v782_v8 = vpack.c.bf16 %v405_v3, %v392_v2  ;;  %v5478_v9 = vld [vmem:[%s7032_s1 + $0x150] sm:$0xff]  }
  0x1a   : > { %4613 = vmatprep.subr.bf16.mxu1 %v5464_v22  ;;  %v796_v10 = vpack.c.bf16 %v432_v5, %v419_v4  ;;  %v421_v11 = vld [vmem:[%s5853_s15 + $0x288] sm:$0xff]  ;;  %v434_v12 = vld [vmem:[%s5853_s15 + $0x2f0] sm:$0xff]  ;;  %v784_v14 = vpack.c.bf16 %v407_v7, %v394_v6  ;;  %v431_v17 = vld [vmem:[%s5853_s15 + $0x2d8] sm:$0xff] }
  0x1b   : > { %4502 = vmatpush3.bf16.msra.mxu0 %v5463_v21  ;;  %v5479_v13 = vld [vmem:[%s7032_s1 + $0x110] sm:$0xff]   ;;  %v798_v15 = vpack.c.bf16 %v434_v12, %v421_v11  ;;  %v420_v18 = vld [vmem:[%s5853_s15 + $0x280] sm:$0xff]  ;;  %v445_v19 = vld [vmem:[%s5853_s15 + $0x348] sm:$0xff] }
  0x1c   : > { %4503 = vmatprep.subr.bf16.mxu0 %v5466_v24  ;;  %v418_v16 = vld [vmem:[%s5853_s15 + $0x270] sm:$0xff]  ;;  %v433_v21 = vld [vmem:[%s5853_s15 + $0x2e8] sm:$0xff]  ;;  %v460_v24 = vld [vmem:[%s5853_s15 + $0x3c0] sm:$0xff] }
  0x1d   : > { %4614 = vmatpush3.bf16.msra.mxu1 %v5465_v23  ;;  %v458_v20 = vld [vmem:[%s5853_s15 + $0x3b0] sm:$0xff]  ;;  %v795_v22 = vpack.c.bf16 %v431_v17, %v418_v16  ;;  %v447_v23 = vld [vmem:[%s5853_s15 + $0x358] sm:$0xff]  ;;  %v484_v33 = vld [vmem:[%s5853_s15 + $0x480] sm:$0xff] }
  0x1e   : > { %4615 = vmatprep.subr.bf16.mxu1 %v5468_v26  ;;  %v809_v26 = vpack.c.bf16 %v458_v20, %v445_v19  ;;  %v811_v31 = vpack.c.bf16 %v460_v24, %v447_v23  ;;  %v471_v32 = vld [vmem:[%s5853_s15 + $0x418] sm:$0xff]  ;;  %v446_v35 = vld [vmem:[%s5853_s15 + $0x350] sm:$0xff]  ;;  %v5483_v36 = vld [vmem:[%s7032_s1 + $0x180] sm:$0xff]  }
  0x1f   : > { %4504 = vmatpush3.bf16.msra.mxu0 %v5467_v25  ;;  %v5480_v25 = vld [vmem:[%s7032_s1 + $0x158] sm:$0xff]   ;;  %v473_v39 = vld [vmem:[%s5853_s15 + $0x428] sm:$0xff]  ;;  %v822_v40 = vpack.c.bf16 %v484_v33, %v471_v32  ;;  %v486_v41 = vld [vmem:[%s5853_s15 + $0x490] sm:$0xff] }
  0x20   : > { %4505 = vmatprep.subr.bf16.mxu0 %v5470_v28  ;;  %v797_v28 = vpack.c.bf16 %v433_v21, %v420_v18  ;;  %v5485_v44 = vld [vmem:[%s7032_s1 + $0x120] sm:$0xff]   ;;  %v824_v45 = vpack.c.bf16 %v486_v41, %v473_v39  ;;  %v483_v47 = vld [vmem:[%s5853_s15 + $0x478] sm:$0xff]  ;;  %v497_v49 = vld [vmem:[%s5853_s15 + $0x4e8] sm:$0xff] }
  0x21   : > { %4616 = vmatpush3.bf16.msra.mxu1 %v5469_v27  ;;  %v5481_v27 = vld [vmem:[%s7032_s1 + $0x118] sm:$0xff]   ;;  %v472_v48 = vld [vmem:[%s5853_s15 + $0x420] sm:$0xff]  ;;  %v5486_v51 = vld [vmem:[%s7032_s1 + $0x1c8] sm:$0xff]  }
  0x22   : > { %4617 = vmatprep.subr.bf16.mxu1 %v5472_v30  ;;  %v457_v30 = vld [vmem:[%s5853_s15 + $0x3a8] sm:$0xff]  ;;  %v512_v57 = vld [vmem:[%s5853_s15 + $0x560] sm:$0xff]  ;;  %v511_v3 = vld [vmem:[%s5853_s15 + $0x558] sm:$0xff] }
  0x23   : > { %4506 = vmatpush3.bf16.msra.mxu0 %v5471_v29  ;;  %v444_v29 = vld [vmem:[%s5853_s15 + $0x340] sm:$0xff]  ;;  %v5487_v54 = vld [vmem:[%s7032_s1 + $0x188] sm:$0xff]   ;;  %v538_v5 = vld [vmem:[%s5853_s15 + $0x630] sm:$0xff] }
  0x24   : > { %4715 = vmatprep.subr.bf16.mxu0 %v5474_v38  ;;  %v459_v38 = vld [vmem:[%s5853_s15 + $0x3b8] sm:$0xff]  ;;  %v5488_v58 = vld [vmem:[%s7032_s1 + $0x168] sm:$0xff]   ;;  %v496_v62 = vld [vmem:[%s5853_s15 + $0x4e0] sm:$0xff] }
  0x25   : > { %4618 = vmatpush3.bf16.msra.mxu1 %v5473_v34  ;;  %v5482_v34 = vld [vmem:[%s7032_s1 + $0x1c0] sm:$0xff]   ;;  %v810_v43 = vpack.c.bf16 %v459_v38, %v446_v35  ;;  %v5489_v61 = vld [vmem:[%s7032_s1 + $0x128] sm:$0xff]   ;;  %v5490_v7 = vld [vmem:[%s7032_s1 + $0x1d0] sm:$0xff]  }
  0x26   : > { %1837 = vmatmul.mubr.bf16.vlgmr.msra.gmra.mrb[0].mxu0 %v756_v37  ;;  %v808_v37 = vpack.c.bf16 %v457_v30, %v444_v29  ;;  %4827 = vmatprep.subr.bf16.mxu1 %v5482_v34  ;;  %v536_v2 = vld [vmem:[%s5853_s15 + $0x620] sm:$0xff]  ;;  %v525_v4 = vld [vmem:[%s5853_s15 + $0x5c8] sm:$0xff]  ;;  %v522_v11 = vld [vmem:[%s5853_s15 + $0x5b0] sm:$0xff] }
  0x27   : > { %4716 = vmatpush3.bf16.msra.mxu0 %v5475_v42  ;;  %1844 = vmatprep.mubr.bf16.mxu0 %v770_v50  ;;  %v5484_v42 = vld [vmem:[%s7032_s1 + $0x160] sm:$0xff]   ;;  %v510_v50 = vld [vmem:[%s5853_s15 + $0x550] sm:$0xff]  ;;  %v535_v12 = vld [vmem:[%s5853_s15 + $0x618] sm:$0xff] }
  0x28   : > { %1998 = vmatmul.mubr.bf16.vlgmr.msra.gmra.mrb[0].mxu1 %v758_v46  ;;  %4717 = vmatprep.subr.bf16.mxu0 %v5476_v60  ;;  %v470_v46 = vld [vmem:[%s5853_s15 + $0x410] sm:$0xff]  ;;  %v835_v55 = vpack.c.bf16 %v510_v50, %v497_v49  ;;  %v549_v16 = vld [vmem:[%s5853_s15 + $0x688] sm:$0xff]  ;;  %v847_v18 = vpack.c.bf16 %v535_v12, %v522_v11  ;;  %v524_v19 = vld [vmem:[%s5853_s15 + $0x5c0] sm:$0xff] }
  0x29   : > { %2005 = vmatprep.mubr.bf16.mxu1 %v772_v53  ;;  %4828 = vmatpush3.bf16.msra.mxu1 %v5483_v36  ;;  %v821_v52 = vpack.c.bf16 %v483_v47, %v470_v46  ;;  %v485_v53 = vld [vmem:[%s5853_s15 + $0x488] sm:$0xff]  ;;  %v562_v17 = vld [vmem:[%s5853_s15 + $0x6f0] sm:$0xff]  ;;  %v551_v21 = vld [vmem:[%s5853_s15 + $0x698] sm:$0xff] }
  0x2a   : > { %4829 = vmatprep.subr.bf16.mxu1 %v5486_v51  ;;  %v537_v20 = vld [vmem:[%s5853_s15 + $0x628] sm:$0xff]  ;;  %v564_v23 = vld [vmem:[%s5853_s15 + $0x700] sm:$0xff]  ;;  %v5494_v24 = vld [vmem:[%s7032_s1 + $0x1d8] sm:$0xff]  }
  0x2b   : > { %4718 = vmatpush3.bf16.msra.mxu0 %v5477_v0  ;;  %v498_v0 = vld [vmem:[%s5853_s15 + $0x4f0] sm:$0xff]  ;;  %v863_v29 = vpack.c.bf16 %v564_v23, %v551_v21  ;;  %v575_v30 = vld [vmem:[%s5853_s15 + $0x758] sm:$0xff]  ;;  %v588_v34 = vld [vmem:[%s5853_s15 + $0x7c0] sm:$0xff] }
  0x2c   : > { %4719 = vmatprep.subr.bf16.mxu0 %v5478_v9  ;;  %v5491_v9 = vld [vmem:[%s7032_s1 + $0x190] sm:$0xff]   ;;  %v563_v33 = vld [vmem:[%s5853_s15 + $0x6f8] sm:$0xff]  ;;  %v577_v35 = vld [vmem:[%s5853_s15 + $0x768] sm:$0xff] }
  0x2d   : > { %4830 = vmatpush3.bf16.msra.mxu1 %v5487_v54  ;;  %v550_v32 = vld [vmem:[%s5853_s15 + $0x690] sm:$0xff]  ;;  %v5498_v39 = vld [vmem:[%s7032_s1 + $0x1e0] sm:$0xff]   ;;  %v587_v47 = vld [vmem:[%s5853_s15 + $0x7b8] sm:$0xff] }
  0x2e   : > { %1845 = vmatmul.mubr.bf16.gmra.mrb[4].mxu0 %v769_v56  ;;  %v499_v56 = vld [vmem:[%s5853_s15 + $0x4f8] sm:$0xff]  ;;  %4831 = vmatprep.subr.bf16.mxu1 %v5490_v7  ;;  %v590_v36 = vld [vmem:[%s5853_s15 + $0x7d0] sm:$0xff]  ;;  %v5499_v41 = vld [vmem:[%s7032_s1 + $0x1a0] sm:$0xff]  }
  0x2f   : > { %1852 = vmatprep.mubr.bf16.mxu0 %v783_v59  ;;  %4720 = vmatpush3.bf16.msra.mxu0 %v5479_v13  ;;  %v823_v59 = vpack.c.bf16 %v485_v53, %v472_v48  ;;  %v837_v60 = vpack.c.bf16 %v512_v57, %v499_v56  ;;  %v850_v13 = vpack.c.bf16 %v538_v5, %v525_v4  ;;  %v574_v46 = vld [vmem:[%s5853_s15 + $0x750] sm:$0xff]  ;;  %v576_v48 = vld [vmem:[%s5853_s15 + $0x760] sm:$0xff]  ;;  %v589_v49 = vld [vmem:[%s5853_s15 + $0x7c8] sm:$0xff] }
  0x30   : > { %2006 = vmatmul.mubr.bf16.gmra.mrb[4].mxu1 %v771_v63  ;;  %4721 = vmatprep.subr.bf16.mxu0 %v5480_v25  ;;  %v509_v63 = vld [vmem:[%s5853_s15 + $0x548] sm:$0xff]  ;;  %v849_v25 = vpack.c.bf16 %v537_v20, %v524_v19  ;;  %v614_v51 = vld [vmem:[%s5853_s15 + $0x890] sm:$0xff]  ;;  %v873_v54 = vpack.c.bf16 %v587_v47, %v574_v46  ;;  %v616_v57 = vld [vmem:[%s5853_s15 + $0x8a0] sm:$0xff] }
  0x31   : > { %2013 = vmatprep.mubr.bf16.mxu1 %v785_v1  ;;  %v523_v1 = vld [vmem:[%s5853_s15 + $0x5b8] sm:$0xff]  ;;  %v834_v6 = vpack.c.bf16 %v509_v63, %v496_v62  ;;  %4832 = vmatpush3.bf16.msra.mxu1 %v5491_v9  ;;  %v601_v50 = vld [vmem:[%s5853_s15 + $0x828] sm:$0xff]  ;;  %v5502_v53 = vld [vmem:[%s7032_s1 + $0x1f0] sm:$0xff]  }
  0x32   : > { %4833 = vmatprep.subr.bf16.mxu1 %v5494_v24  ;;  %v887_v56 = vpack.c.bf16 %v614_v51, %v601_v50  ;;  %v5506_v62 = vld [vmem:[%s7032_s1 + $0x240] sm:$0xff]   ;;  %v602_v4 = vld [vmem:[%s5853_s15 + $0x830] sm:$0xff]  ;;  %v615_v5 = vld [vmem:[%s5853_s15 + $0x898] sm:$0xff] }
  0x33   : > { %4722 = vmatpush3.bf16.msra.mxu0 %v5481_v27  ;;  %v548_v27 = vld [vmem:[%s5853_s15 + $0x680] sm:$0xff]  ;;  %v629_v7 = vld [vmem:[%s5853_s15 + $0x908] sm:$0xff]  ;;  %v888_v9 = vpack.c.bf16 %v615_v5, %v602_v4  ;;  %v639_v12 = vld [vmem:[%s5853_s15 + $0x958] sm:$0xff] }
  0x34   : > { %4723 = vmatprep.subr.bf16.mxu0 %v5484_v42  ;;  %v5500_v42 = vld [vmem:[%s7032_s1 + $0x1e8] sm:$0xff]   ;;  %v600_v63 = vld [vmem:[%s5853_s15 + $0x820] sm:$0xff]  ;;  %v655_v19 = vld [vmem:[%s5853_s15 + $0x9d8] sm:$0xff] }
  0x35   : > { %v668_v20 = vld [vmem:[%s5853_s15 + $0xa40] sm:$0xff]  ;;  %v665_v24 = vld [vmem:[%s5853_s15 + $0xa28] sm:$0xff]  ;;  %v731_v50 = vld [vmem:[%s5853_s15 + $0xc38] sm:$0xff] }
  0x36   : > { %1853 = vmatmul.mubr.bf16.gmra.mrb[8].mxu0 %v782_v8  ;;  %v848_v8 = vpack.c.bf16 %v536_v2, %v523_v1  ;;  %v627_v1 = vld [vmem:[%s5853_s15 + $0x8f8] sm:$0xff]  ;;  %v640_v2 = vld [vmem:[%s5853_s15 + $0x960] sm:$0xff] }
  0x37   : > { %1860 = vmatprep.mubr.bf16.mxu0 %v796_v10  ;;  %4724 = vmatpush3.bf16.msra.mxu0 %v5485_v44  ;;  %v836_v10 = vpack.c.bf16 %v511_v3, %v498_v0  ;;  %v876_v44 = vpack.c.bf16 %v590_v36, %v577_v35  ;;  %v613_v0 = vld [vmem:[%s5853_s15 + $0x888] sm:$0xff]  ;;  %v652_v23 = vld [vmem:[%s5853_s15 + $0x9c0] sm:$0xff]  ;;  %v678_v35 = vld [vmem:[%s5853_s15 + $0xa90] sm:$0xff] }
  0x38   : > { %2014 = vmatmul.mubr.bf16.gmra.mrb[8].mxu1 %v784_v14  ;;  %4725 = vmatprep.subr.bf16.mxu0 %v5488_v58  ;;  %v5492_v14 = vld [vmem:[%s7032_s1 + $0x170] sm:$0xff]   ;;  %v5504_v58 = vld [vmem:[%s7032_s1 + $0x1f8] sm:$0xff]   ;;  %v886_v3 = vpack.c.bf16 %v613_v0, %v600_v63  ;;  %v704_v47 = vld [vmem:[%s5853_s15 + $0xb60] sm:$0xff] }
  0x39   : > { %2021 = vmatprep.mubr.bf16.mxu1 %v798_v15  ;;  %v5493_v15 = vld [vmem:[%s7032_s1 + $0x130] sm:$0xff]   ;;  %v691_v36 = vld [vmem:[%s5853_s15 + $0xaf8] sm:$0xff]  ;;  %v744_v51 = vld [vmem:[%s5853_s15 + $0xca0] sm:$0xff] }
  0x3a   : > { %v358_v63 = vld [vmem:[%s5853_s15 + $0x90] sm:$0xff]  ;;  %v347_v4 = vld [vmem:[%s5853_s15 + $0x38] sm:$0xff]  ;;  %v360_v5 = vld [vmem:[%s5853_s15 + $0xa0] sm:$0xff] }
  0x3b   : > { %4726 = vmatpush3.bf16.msra.mxu0 %v5489_v61 }
  0x3c   : > { %4727 = vmatprep.subr.bf16.mxu0 %v5492_v14  ;;  %v666_v14 = vld [vmem:[%s5853_s15 + $0xa30] sm:$0xff] }
  0x3e   : > { %1861 = vmatmul.mubr.bf16.gmra.mrb[12].mxu0 %v795_v22  ;;  %v861_v22 = vpack.c.bf16 %v562_v17, %v549_v16  ;;  %v628_v16 = vld [vmem:[%s5853_s15 + $0x900] sm:$0xff]  ;;  %v641_v17 = vld [vmem:[%s5853_s15 + $0x968] sm:$0xff] }
  0x3f   : > { %1868 = vmatprep.mubr.bf16.mxu0 %v809_v26  ;;  %4728 = vmatpush3.bf16.msra.mxu0 %v5493_v15  ;;  %v5495_v26 = vld [vmem:[%s7032_s1 + $0x198] sm:$0xff]   ;;  %v901_v21 = vpack.c.bf16 %v641_v17, %v628_v16  ;;  %v373_v17 = vld [vmem:[%s5853_s15 + $0x108] sm:$0xff] }
  0x40   : > { %2022 = vmatmul.mubr.bf16.gmra.mrb[12].mxu1 %v797_v28  ;;  %v561_v28 = vld [vmem:[%s5853_s15 + $0x6e8] sm:$0xff] }
  0x41   : > { %2029 = vmatprep.mubr.bf16.mxu1 %v811_v31  ;;  %4834 = vmatpush3.bf16.msra.mxu1 %v5495_v26  ;;  %v5496_v31 = vld [vmem:[%s7032_s1 + $0x178] sm:$0xff]   ;;  %v860_v38 = vpack.c.bf16 %v561_v28, %v548_v27  ;;  %v692_v26 = vld [vmem:[%s5853_s15 + $0xb00] sm:$0xff]  ;;  %v912_v27 = vpack.c.bf16 %v665_v24, %v652_v23  ;;  %v654_v28 = vld [vmem:[%s5853_s15 + $0x9d0] sm:$0xff] }
  0x42   : > { %4729 = vmatprep.subr.bf16.mxu0 %v5496_v31  ;;  %4835 = vmatprep.subr.bf16.mxu1 %v5498_v39  ;;  %v681_v31 = vld [vmem:[%s5853_s15 + $0xaa8] sm:$0xff]  ;;  %v680_v39 = vld [vmem:[%s5853_s15 + $0xaa0] sm:$0xff] }
  0x43   : > { %v5509_v23 = vld [vmem:[%s7032_s1 + $0x208] sm:$0xff]  }
  0x45   : > { %4836 = vmatpush3.bf16.msra.mxu1 %v5499_v41  ;;  %v707_v41 = vld [vmem:[%s5853_s15 + $0xb78] sm:$0xff] }
  0x46   : > { %1869 = vmatmul.mubr.bf16.gmra.mrb[16].mxu0 %v808_v37  ;;  %v5497_v37 = vld [vmem:[%s7032_s1 + $0x138] sm:$0xff]   ;;  %4837 = vmatprep.subr.bf16.mxu1 %v5500_v42  ;;  %v925_v42 = vpack.c.bf16 %v691_v36, %v678_v35  ;;  %v5519_v35 = vld [vmem:[%s7032_s1 + $0x288] sm:$0xff]  }
  0x47   : > { %1876 = vmatprep.mubr.bf16.mxu0 %v822_v40  ;;  %v874_v40 = vpack.c.bf16 %v588_v34, %v575_v30  ;;  %4730 = vmatpush3.bf16.msra.mxu0 %v5497_v37  ;;  %v705_v37 = vld [vmem:[%s5853_s15 + $0xb68] sm:$0xff] }
  0x48   : > { %2030 = vmatmul.mubr.bf16.gmra.mrb[16].mxu1 %v810_v43  ;;  %v862_v43 = vpack.c.bf16 %v563_v33, %v550_v32  ;;  %4939 = vmatprep.subr.bf16.mxu0 %v5506_v62  ;;  %v694_v32 = vld [vmem:[%s5853_s15 + $0xb10] sm:$0xff]  ;;  %v345_v62 = vld [vmem:[%s5853_s15 + $0x28] sm:$0xff] }
  0x49   : > { %2037 = vmatprep.mubr.bf16.mxu1 %v824_v45  ;;  %v5501_v45 = vld [vmem:[%s7032_s1 + $0x1a8] sm:$0xff]   ;;  %v928_v34 = vpack.c.bf16 %v694_v32, %v681_v31  ;;  %v399_v32 = vld [vmem:[%s5853_s15 + $0x1d8] sm:$0xff] }
  0x4a   : > { %4838 = vmatpush3.bf16.msra.mxu1 %v5501_v45  ;;  %v720_v45 = vld [vmem:[%s5853_s15 + $0xbe0] sm:$0xff]  ;;  %v385_v31 = vld [vmem:[%s5853_s15 + $0x168] sm:$0xff] }
  0x4b   : > { %4839 = vmatprep.subr.bf16.mxu1 %v5502_v53  ;;  %v706_v53 = vld [vmem:[%s5853_s15 + $0xb70] sm:$0xff] }
  0x4e   : > { %1877 = vmatmul.mubr.bf16.gmra.mrb[20].mxu0 %v821_v52  ;;  %v603_v52 = vld [vmem:[%s5853_s15 + $0x838] sm:$0xff] }
  0x4f   : > { %1884 = vmatprep.mubr.bf16.mxu0 %v835_v55  ;;  %v5503_v55 = vld [vmem:[%s7032_s1 + $0x1b0] sm:$0xff]   ;;  %v889_v61 = vpack.c.bf16 %v616_v57, %v603_v52 }
  0x50   : > { %2038 = vmatmul.mubr.bf16.gmra.mrb[20].mxu1 %v823_v59  ;;  %v875_v59 = vpack.c.bf16 %v589_v49, %v576_v48  ;;  %v941_v48 = vpack.c.bf16 %v720_v45, %v707_v41  ;;  %v717_v49 = vld [vmem:[%s5853_s15 + $0xbc8] sm:$0xff]  ;;  %v746_v57 = vld [vmem:[%s5853_s15 + $0xcb0] sm:$0xff]  ;;  %v396_v41 = vld [vmem:[%s5853_s15 + $0x1c0] sm:$0xff] }
  0x51   : > { %2045 = vmatprep.mubr.bf16.mxu1 %v837_v60  ;;  %v5505_v60 = vld [vmem:[%s7032_s1 + $0x1b8] sm:$0xff]   ;;  %4840 = vmatpush3.bf16.msra.mxu1 %v5503_v55  ;;  %v938_v52 = vpack.c.bf16 %v717_v49, %v704_v47  ;;  %v733_v55 = vld [vmem:[%s5853_s15 + $0xc48] sm:$0xff]  ;;  %v5516_v49 = vld [vmem:[%s7032_s1 + $0x260] sm:$0xff]  }
  0x52   : > { %4841 = vmatprep.subr.bf16.mxu1 %v5504_v58  ;;  %v423_v45 = vld [vmem:[%s5853_s15 + $0x298] sm:$0xff] }
  0x53   : > { %v5526_v47 = vld [vmem:[%s7032_s1 + $0x2d8] sm:$0xff]  }
  0x55   : > { %4842 = vmatpush3.bf16.msra.mxu1 %v5505_v60  ;;  %v954_v60 = vpack.c.bf16 %v746_v57, %v733_v55  ;;  %v5527_v55 = vld [vmem:[%s7032_s1 + $0x298] sm:$0xff]   ;;  %v5517_v57 = vld [vmem:[%s7032_s1 + $0x220] sm:$0xff]  }
  0x56   : > { %1885 = vmatmul.mubr.bf16.gmra.mrb[24].mxu0 %v834_v6  ;;  %v900_v6 = vpack.c.bf16 %v640_v2, %v627_v1  ;;  %v732_v1 = vld [vmem:[%s5853_s15 + $0xc40] sm:$0xff]  ;;  %v745_v2 = vld [vmem:[%s5853_s15 + $0xca8] sm:$0xff] }
  0x57   : > { %1892 = vmatprep.mubr.bf16.mxu0 %v848_v8  ;;  %v642_v8 = vld [vmem:[%s5853_s15 + $0x970] sm:$0xff] }
  0x58   : > { %2046 = vmatmul.mubr.bf16.gmra.mrb[24].mxu1 %v836_v10  ;;  %v626_v10 = vld [vmem:[%s5853_s15 + $0x8f0] sm:$0xff]  ;;  %v902_v11 = vpack.c.bf16 %v642_v8, %v629_v7  ;;  %v763_v7 = vpack.c.bf16 %v360_v5, %v347_v4  ;;  %v344_v8 = vld [vmem:[%s5853_s15 + $0x20] sm:$0xff] }
  0x59   : > { %2053 = vmatprep.mubr.bf16.mxu1 %v850_v13  ;;  %v653_v13 = vld [vmem:[%s5853_s15 + $0x9c8] sm:$0xff]  ;;  %v899_v15 = vpack.c.bf16 %v639_v12, %v626_v10  ;;  %v371_v10 = vld [vmem:[%s5853_s15 + $0xf8] sm:$0xff]  ;;  %v346_v12 = vld [vmem:[%s5853_s15 + $0x30] sm:$0xff] }
  0x5a   : > { %v462_v4 = vld [vmem:[%s5853_s15 + $0x3d0] sm:$0xff] }
  0x5b   : > { %v5524_v5 = vld [vmem:[%s7032_s1 + $0x270] sm:$0xff]  }
  0x5e   : > { %1893 = vmatmul.mubr.bf16.gmra.mrb[28].mxu0 %v847_v18  ;;  %v913_v18 = vpack.c.bf16 %v666_v14, %v653_v13  ;;  %v359_v14 = vld [vmem:[%s5853_s15 + $0x98] sm:$0xff] }
  0x5f   : > { %1900 = vmatprep.mubr.bf16.mxu0 %v861_v22  ;;  %v915_v22 = vpack.c.bf16 %v668_v20, %v655_v19  ;;  %v5508_v19 = vld [vmem:[%s7032_s1 + $0x248] sm:$0xff]   ;;  %v762_v20 = vpack.c.bf16 %v359_v14, %v346_v12  ;;  %v464_v12 = vld [vmem:[%s5853_s15 + $0x3e0] sm:$0xff]  ;;  %v5528_v14 = vld [vmem:[%s7032_s1 + $0x278] sm:$0xff]  }
  0x60   : > { %2054 = vmatmul.mubr.bf16.gmra.mrb[28].mxu1 %v849_v25  ;;  %v679_v25 = vld [vmem:[%s5853_s15 + $0xa98] sm:$0xff] }
  0x61   : > { %2061 = vmatprep.mubr.bf16.mxu1 %v863_v29  ;;  %v667_v29 = vld [vmem:[%s5853_s15 + $0xa38] sm:$0xff]  ;;  %v926_v30 = vpack.c.bf16 %v692_v26, %v679_v25  ;;  %v5515_v25 = vld [vmem:[%s7032_s1 + $0x280] sm:$0xff]   ;;  %v5518_v26 = vld [vmem:[%s7032_s1 + $0x2c8] sm:$0xff]  }
  0x62   : > { %v914_v33 = vpack.c.bf16 %v667_v29, %v654_v28  ;;  %v397_v28 = vld [vmem:[%s5853_s15 + $0x1c8] sm:$0xff]  ;;  %v410_v29 = vld [vmem:[%s5853_s15 + $0x230] sm:$0xff] }
  0x63   : > { %v787_v36 = vpack.c.bf16 %v410_v29, %v397_v28  ;;  %v463_v28 = vld [vmem:[%s5853_s15 + $0x3d8] sm:$0xff] }
  0x64   : > { %v5537_v29 = vld [vmem:[%s7032_s1 + $0x2b8] sm:$0xff]  }
  0x66   : > { %1901 = vmatmul.mubr.bf16.gmra.mrb[32].mxu0 %v860_v38  ;;  %v718_v38 = vld [vmem:[%s5853_s15 + $0xbd0] sm:$0xff] }
  0x67   : > { %1908 = vmatprep.mubr.bf16.mxu0 %v874_v40  ;;  %v693_v40 = vld [vmem:[%s5853_s15 + $0xb08] sm:$0xff] }
  0x68   : > { %2062 = vmatmul.mubr.bf16.gmra.mrb[32].mxu1 %v862_v43  ;;  %v5514_v43 = vld [vmem:[%s7032_s1 + $0x2c0] sm:$0xff]   ;;  %v927_v46 = vpack.c.bf16 %v693_v40, %v680_v39  ;;  %v5522_v39 = vld [vmem:[%s7032_s1 + $0x2d0] sm:$0xff]  }
  0x69   : > { %2069 = vmatprep.mubr.bf16.mxu1 %v876_v44  ;;  %v939_v44 = vpack.c.bf16 %v718_v38, %v705_v37  ;;  %5051 = vmatprep.subr.bf16.mxu1 %v5514_v43  ;;  %v5511_v37 = vld [vmem:[%s7032_s1 + $0x210] sm:$0xff]   ;;  %v5512_v38 = vld [vmem:[%s7032_s1 + $0x258] sm:$0xff]  }
  0x6a   : > { %v5513_v43 = vld [vmem:[%s7032_s1 + $0x218] sm:$0xff]  }
  0x6e   : > { %1909 = vmatmul.mubr.bf16.gmra.mrb[36].mxu0 %v873_v54  ;;  %v719_v54 = vld [vmem:[%s5853_s15 + $0xbd8] sm:$0xff] }
  0x6f   : > { %1916 = vmatprep.mubr.bf16.mxu0 %v887_v56  ;;  %v952_v56 = vpack.c.bf16 %v744_v51, %v731_v50  ;;  %v940_v58 = vpack.c.bf16 %v719_v54, %v706_v53  ;;  %v398_v50 = vld [vmem:[%s5853_s15 + $0x1d0] sm:$0xff]  ;;  %v411_v51 = vld [vmem:[%s5853_s15 + $0x238] sm:$0xff]  ;;  %v425_v53 = vld [vmem:[%s5853_s15 + $0x2a8] sm:$0xff] }
  0x70   : > { %2070 = vmatmul.mubr.bf16.gmra.mrb[36].mxu1 %v875_v59  ;;  %v730_v59 = vld [vmem:[%s5853_s15 + $0xc30] sm:$0xff] }
  0x71   : > { %2077 = vmatprep.mubr.bf16.mxu1 %v889_v61  ;;  %v743_v61 = vld [vmem:[%s5853_s15 + $0xc98] sm:$0xff]  ;;  %v438_v54 = vld [vmem:[%s5853_s15 + $0x310] sm:$0xff] }
  0x72   : > { %v951_v0 = vpack.c.bf16 %v743_v61, %v730_v59  ;;  %v5530_v59 = vld [vmem:[%s7032_s1 + $0x2e0] sm:$0xff]   ;;  %v422_v61 = vld [vmem:[%s5853_s15 + $0x290] sm:$0xff] }
  0x76   : > { %1917 = vmatmul.mubr.bf16.gmra.mrb[40].mxu0 %v886_v3  ;;  %v761_v3 = vpack.c.bf16 %v358_v63, %v345_v62  ;;  %v435_v62 = vld [vmem:[%s5853_s15 + $0x2f8] sm:$0xff]  ;;  %v802_v63 = vpack.c.bf16 %v438_v54, %v425_v53 }
  0x77   : > { %1924 = vmatprep.mubr.bf16.mxu0 %v900_v6  ;;  %v953_v6 = vpack.c.bf16 %v745_v2, %v732_v1  ;;  %v5531_v1 = vld [vmem:[%s7032_s1 + $0x2a0] sm:$0xff]   ;;  %v5532_v2 = vld [vmem:[%s7032_s1 + $0x2e8] sm:$0xff]  }
  0x78   : > { %2078 = vmatmul.mubr.bf16.gmra.mrb[40].mxu1 %v888_v9  ;;  %v357_v9 = vld [vmem:[%s5853_s15 + $0x88] sm:$0xff] }
  0x79   : > { %2085 = vmatprep.mubr.bf16.mxu1 %v902_v11  ;;  %v384_v11 = vld [vmem:[%s5853_s15 + $0x160] sm:$0xff]  ;;  %v760_v13 = vpack.c.bf16 %v357_v9, %v344_v8  ;;  %v437_v8 = vld [vmem:[%s5853_s15 + $0x308] sm:$0xff] }
  0x7a   : > { %v774_v16 = vpack.c.bf16 %v384_v11, %v371_v10  ;;  %v5533_v9 = vld [vmem:[%s7032_s1 + $0x2a8] sm:$0xff]   ;;  %v451_v11 = vld [vmem:[%s5853_s15 + $0x378] sm:$0xff] }
  0x7e   : > { %1925 = vmatmul.mubr.bf16.gmra.mrb[44].mxu0 %v899_v15  ;;  %v5507_v15 = vld [vmem:[%s7032_s1 + $0x200] sm:$0xff]  }
  0x7f   : > { %1932 = vmatprep.mubr.bf16.mxu0 %v913_v18  ;;  %v386_v18 = vld [vmem:[%s5853_s15 + $0x170] sm:$0xff] }
  0x80   : > { %2086 = vmatmul.mubr.bf16.gmra.mrb[44].mxu1 %v901_v21  ;;  %v370_v21 = vld [vmem:[%s5853_s15 + $0xf0] sm:$0xff]  ;;  %v776_v24 = vpack.c.bf16 %v386_v18, %v373_v17  ;;  %v448_v17 = vld [vmem:[%s5853_s15 + $0x360] sm:$0xff]  ;;  %v815_v18 = vpack.c.bf16 %v464_v12, %v451_v11 }
  0x81   : > { %2093 = vmatprep.mubr.bf16.mxu1 %v915_v22  ;;  %v383_v22 = vld [vmem:[%s5853_s15 + $0x158] sm:$0xff]  ;;  %v554_v12 = vld [vmem:[%s5853_s15 + $0x6b0] sm:$0xff] }
  0x86   : > { %1933 = vmatmul.mubr.bf16.gmra.mrb[48].mxu0 %v912_v27  ;;  %v372_v27 = vld [vmem:[%s5853_s15 + $0x100] sm:$0xff] }
  0x87   : > { %1940 = vmatprep.mubr.bf16.mxu0 %v926_v30  ;;  %v5510_v30 = vld [vmem:[%s7032_s1 + $0x250] sm:$0xff]   ;;  %v775_v40 = vpack.c.bf16 %v385_v31, %v372_v27  ;;  %v477_v31 = vld [vmem:[%s5853_s15 + $0x448] sm:$0xff] }
  0x88   : > { %2094 = vmatmul.mubr.bf16.gmra.mrb[48].mxu1 %v914_v33  ;;  %v773_v33 = vpack.c.bf16 %v383_v22, %v370_v21  ;;  %v5529_v21 = vld [vmem:[%s7032_s1 + $0x238] sm:$0xff]   ;;  %v450_v27 = vld [vmem:[%s5853_s15 + $0x370] sm:$0xff] }
  0x89   : > { %2101 = vmatprep.mubr.bf16.mxu1 %v928_v34  ;;  %v412_v34 = vld [vmem:[%s5853_s15 + $0x240] sm:$0xff]  ;;  %v5536_v22 = vld [vmem:[%s7032_s1 + $0x2f8] sm:$0xff]  }
  0x8e   : > { %1941 = vmatmul.mubr.bf16.gmra.mrb[52].mxu0 %v925_v42  ;;  %v409_v42 = vld [vmem:[%s5853_s15 + $0x228] sm:$0xff] }
  0x8f   : > { %1948 = vmatprep.mubr.bf16.mxu0 %v939_v44  ;;  %v789_v44 = vpack.c.bf16 %v412_v34, %v399_v32  ;;  %v490_v32 = vld [vmem:[%s5853_s15 + $0x4b0] sm:$0xff] }
  0x90   : > { %2102 = vmatmul.mubr.bf16.gmra.mrb[52].mxu1 %v927_v46  ;;  %v5523_v46 = vld [vmem:[%s7032_s1 + $0x290] sm:$0xff]  }
  0x91   : > { %2109 = vmatprep.mubr.bf16.mxu1 %v941_v48  ;;  %v436_v48 = vld [vmem:[%s5853_s15 + $0x300] sm:$0xff]  ;;  %v474_v34 = vld [vmem:[%s5853_s15 + $0x430] sm:$0xff] }
  0x96   : > { %1949 = vmatmul.mubr.bf16.gmra.mrb[56].mxu0 %v938_v52  ;;  %v786_v52 = vpack.c.bf16 %v409_v42, %v396_v41 }
  0x97   : > { %1956 = vmatprep.mubr.bf16.mxu0 %v952_v56  ;;  %v800_v56 = vpack.c.bf16 %v436_v48, %v423_v45 }
  0x98   : > { %2110 = vmatmul.mubr.bf16.gmra.mrb[56].mxu1 %v940_v58  ;;  %v5520_v58 = vld [vmem:[%s7032_s1 + $0x268] sm:$0xff]  }
  0x99   : > { %2117 = vmatprep.mubr.bf16.mxu1 %v954_v60  ;;  %v788_v60 = vpack.c.bf16 %v411_v51, %v398_v50  ;;  %v540_v50 = vld [vmem:[%s5853_s15 + $0x640] sm:$0xff]  ;;  %v502_v51 = vld [vmem:[%s5853_s15 + $0x510] sm:$0xff] }
  0x9e   : > { %1957 = vmatmul.mubr.bf16.gmra.mrb[60].mxu0 %v951_v0  ;;  %v5521_v0 = vld [vmem:[%s7032_s1 + $0x228] sm:$0xff]  }
  0x9f   : > { %2158 = vmatprep.mubr.bf16.mxu0 %v761_v3  ;;  %v449_v3 = vld [vmem:[%s5853_s15 + $0x368] sm:$0xff] }
  0xa0   : > { %2118 = vmatmul.mubr.bf16.gmra.mrb[60].mxu1 %v953_v6  ;;  %v799_v6 = vpack.c.bf16 %v435_v62, %v422_v61  ;;  %v813_v10 = vpack.c.bf16 %v462_v4, %v449_v3  ;;  %v553_v61 = vld [vmem:[%s5853_s15 + $0x6a8] sm:$0xff]  ;;  %v566_v62 = vld [vmem:[%s5853_s15 + $0x710] sm:$0xff]  ;;  %v555_v3 = vld [vmem:[%s5853_s15 + $0x6b8] sm:$0xff] }
  0xa1   : > { %2319 = vmatprep.mubr.bf16.mxu1 %v763_v7  ;;  %v424_v7 = vld [vmem:[%s5853_s15 + $0x2a0] sm:$0xff] }
  0xa2   : > { %v568_v4 = vld [vmem:[%s5853_s15 + $0x720] sm:$0xff] }
  0xa6   : > { %2159 = vmatmul.mubr.bf16.vlgmr.msra.gmra.mrb[64].mxu0 %v760_v13  ;;  %v5525_v13 = vld [vmem:[%s7032_s1 + $0x230] sm:$0xff]  }
  0xa7   : > { %4940 = vmatpush3.bf16.msra.mxu0 %v5507_v15  ;;  %2166 = vmatprep.mubr.bf16.mxu0 %v774_v16  ;;  %v5534_v15 = vld [vmem:[%s7032_s1 + $0x2f0] sm:$0xff]   ;;  %v801_v16 = vpack.c.bf16 %v437_v8, %v424_v7  ;;  %v552_v7 = vld [vmem:[%s5853_s15 + $0x6a0] sm:$0xff]  ;;  %v565_v8 = vld [vmem:[%s5853_s15 + $0x708] sm:$0xff] }
  0xa8   : > { %4941 = vmatprep.subr.bf16.mxu0 %v5508_v19  ;;  %2320 = vmatmul.mubr.bf16.vlgmr.msra.gmra.mrb[64].mxu1 %v762_v20  ;;  %v5535_v19 = vld [vmem:[%s7032_s1 + $0x2b0] sm:$0xff]   ;;  %v461_v20 = vld [vmem:[%s5853_s15 + $0x3c8] sm:$0xff]  ;;  %v864_v11 = vpack.c.bf16 %v565_v8, %v552_v7 }
  0xa9   : > { %2327 = vmatprep.mubr.bf16.mxu1 %v776_v24  ;;  %5052 = vmatpush3.bf16.msra.mxu1 %v5515_v25  ;;  %v488_v24 = vld [vmem:[%s5853_s15 + $0x4a0] sm:$0xff]  ;;  %v669_v7 = vld [vmem:[%s5853_s15 + $0xa48] sm:$0xff] }
  0xaa   : > { %5053 = vmatprep.subr.bf16.mxu1 %v5518_v26  ;;  %v6224_v25 = vld [vmem:[%s7032_s1 + $0x300] sm:$0xff]   ;;  %v812_v26 = vpack.c.bf16 %v461_v20, %v448_v17  ;;  %v591_v20 = vld [vmem:[%s5853_s15 + $0x7d8] sm:$0xff] }
  0xab   : > { %4942 = vmatpush3.bf16.msra.mxu0 %v5509_v23  ;;  %v475_v23 = vld [vmem:[%s5853_s15 + $0x438] sm:$0xff] }
  0xac   : > { %4943 = vmatprep.subr.bf16.mxu0 %v5510_v30  ;;  %v826_v30 = vpack.c.bf16 %v488_v24, %v475_v23  ;;  %v580_v24 = vld [vmem:[%s5853_s15 + $0x780] sm:$0xff] }
  0xad   : > { %5054 = vmatpush3.bf16.msra.mxu1 %v5519_v35  ;;  %v487_v35 = vld [vmem:[%s5853_s15 + $0x498] sm:$0xff] }
  0xae   : > { %2167 = vmatmul.mubr.bf16.gmra.mrb[68].mxu0 %v773_v33  ;;  %5055 = vmatprep.subr.bf16.mxu1 %v5522_v39  ;;  %v814_v33 = vpack.c.bf16 %v463_v28, %v450_v27  ;;  %v476_v39 = vld [vmem:[%s5853_s15 + $0x440] sm:$0xff]  ;;  %v825_v41 = vpack.c.bf16 %v487_v35, %v474_v34  ;;  %v607_v28 = vld [vmem:[%s5853_s15 + $0x858] sm:$0xff] }
  0xaf   : > { %2174 = vmatprep.mubr.bf16.mxu0 %v787_v36  ;;  %4944 = vmatpush3.bf16.msra.mxu0 %v5511_v37  ;;  %v828_v36 = vpack.c.bf16 %v490_v32, %v477_v31  ;;  %v501_v37 = vld [vmem:[%s5853_s15 + $0x508] sm:$0xff]  ;;  %v604_v32 = vld [vmem:[%s5853_s15 + $0x840] sm:$0xff]  ;;  %v631_v34 = vld [vmem:[%s5853_s15 + $0x918] sm:$0xff] }
  0xb0   : > { %4945 = vmatprep.subr.bf16.mxu0 %v5512_v38  ;;  %2328 = vmatmul.mubr.bf16.gmra.mrb[68].mxu1 %v775_v40  ;;  %v514_v38 = vld [vmem:[%s5853_s15 + $0x570] sm:$0xff]  ;;  %v489_v40 = vld [vmem:[%s5853_s15 + $0x4a8] sm:$0xff]  ;;  %v644_v35 = vld [vmem:[%s5853_s15 + $0x980] sm:$0xff] }
  0xb1   : > { %2335 = vmatprep.mubr.bf16.mxu1 %v789_v44  ;;  %5056 = vmatpush3.bf16.msra.mxu1 %v5523_v46  ;;  %v839_v42 = vpack.c.bf16 %v514_v38, %v501_v37  ;;  %v516_v44 = vld [vmem:[%s5853_s15 + $0x580] sm:$0xff]  ;;  %v827_v45 = vpack.c.bf16 %v489_v40, %v476_v39  ;;  %v606_v37 = vld [vmem:[%s5853_s15 + $0x850] sm:$0xff]  ;;  %v619_v38 = vld [vmem:[%s5853_s15 + $0x8b8] sm:$0xff]  ;;  %v904_v39 = vpack.c.bf16 %v644_v35, %v631_v34 }
  0xb2   : > { %5057 = vmatprep.subr.bf16.mxu1 %v5526_v47  ;;  %v500_v46 = vld [vmem:[%s5853_s15 + $0x500] sm:$0xff]  ;;  %v513_v47 = vld [vmem:[%s5853_s15 + $0x568] sm:$0xff]  ;;  %v682_v35 = vld [vmem:[%s5853_s15 + $0xab0] sm:$0xff] }
  0xb3   : > { %4946 = vmatpush3.bf16.msra.mxu0 %v5513_v43  ;;  %v503_v43 = vld [vmem:[%s5853_s15 + $0x518] sm:$0xff]  ;;  %v838_v53 = vpack.c.bf16 %v513_v47, %v500_v46  ;;  %v633_v40 = vld [vmem:[%s5853_s15 + $0x928] sm:$0xff]  ;;  %v670_v47 = vld [vmem:[%s5853_s15 + $0xa50] sm:$0xff] }
  0xb4   : > { %4947 = vmatprep.subr.bf16.mxu0 %v5516_v49  ;;  %v841_v48 = vpack.c.bf16 %v516_v44, %v503_v43  ;;  %v527_v49 = vld [vmem:[%s5853_s15 + $0x5d8] sm:$0xff]  ;;  %v630_v44 = vld [vmem:[%s5853_s15 + $0x910] sm:$0xff]  ;;  %v657_v46 = vld [vmem:[%s5853_s15 + $0x9e8] sm:$0xff] }
  0xb5   : > { %5058 = vmatpush3.bf16.msra.mxu1 %v5527_v55  ;;  %v852_v54 = vpack.c.bf16 %v540_v50, %v527_v49  ;;  %v529_v55 = vld [vmem:[%s5853_s15 + $0x5e8] sm:$0xff]  ;;  %v6289_v49 = vld [vmem:[%s7033_s2] ss:$0 sm:$0xff] }
  0xb6   : > { %2175 = vmatmul.mubr.bf16.gmra.mrb[72].mxu0 %v786_v52  ;;  %5059 = vmatprep.subr.bf16.mxu1 %v5530_v59  ;;  %v515_v52 = vld [vmem:[%s5853_s15 + $0x578] sm:$0xff] }
  0xb7   : > { %2182 = vmatprep.mubr.bf16.mxu0 %v800_v56  ;;  %4948 = vmatpush3.bf16.msra.mxu0 %v5517_v57  ;;  %v542_v56 = vld [vmem:[%s5853_s15 + $0x650] sm:$0xff]  ;;  %v840_v57 = vpack.c.bf16 %v515_v52, %v502_v51  ;;  %v539_v59 = vld [vmem:[%s5853_s15 + $0x638] sm:$0xff]  ;;  %v632_v52 = vld [vmem:[%s5853_s15 + $0x920] sm:$0xff] }
  0xb8   : > { %4949 = vmatprep.subr.bf16.mxu0 %v5520_v58  ;;  %2336 = vmatmul.mubr.bf16.gmra.mrb[72].mxu1 %v788_v60  ;;  %v526_v58 = vld [vmem:[%s5853_s15 + $0x5d0] sm:$0xff]  ;;  %v854_v60 = vpack.c.bf16 %v542_v56, %v529_v55  ;;  %v917_v56 = vpack.c.bf16 %v670_v47, %v657_v46  ;;  %v697_v46 = vld [vmem:[%s5853_s15 + $0xb28] sm:$0xff] }
  0xb9   : > { %2343 = vmatprep.mubr.bf16.mxu1 %v802_v63  ;;  %5060 = vmatpush3.bf16.msra.mxu1 %v5531_v1  ;;  %v528_v63 = vld [vmem:[%s5853_s15 + $0x5e0] sm:$0xff]  ;;  %v851_v1 = vpack.c.bf16 %v539_v59, %v526_v58 }
  0xba   : > { %5061 = vmatprep.subr.bf16.mxu1 %v5532_v2  ;;  %v865_v2 = vpack.c.bf16 %v566_v62, %v553_v61  ;;  %v672_v58 = vld [vmem:[%s5853_s15 + $0xa60] sm:$0xff] }
  0xbb   : > { %4950 = vmatpush3.bf16.msra.mxu0 %v5521_v0  ;;  %v541_v0 = vld [vmem:[%s5853_s15 + $0x648] sm:$0xff] }
  0xbc   : > { %4951 = vmatprep.subr.bf16.mxu0 %v5524_v5  ;;  %v853_v5 = vpack.c.bf16 %v541_v0, %v528_v63 }
  0xbd   : > { %5062 = vmatpush3.bf16.msra.mxu1 %v5533_v9  ;;  %v579_v9 = vld [vmem:[%s5853_s15 + $0x778] sm:$0xff] }
  0xbe   : > { %2183 = vmatmul.mubr.bf16.gmra.mrb[76].mxu0 %v799_v6  ;;  %5063 = vmatprep.subr.bf16.mxu1 %v5534_v15  ;;  %v867_v6 = vpack.c.bf16 %v568_v4, %v555_v3  ;;  %v581_v15 = vld [vmem:[%s5853_s15 + $0x788] sm:$0xff] }
  0xbf   : > { %2190 = vmatprep.mubr.bf16.mxu0 %v813_v10  ;;  %4952 = vmatpush3.bf16.msra.mxu0 %v5525_v13  ;;  %v592_v10 = vld [vmem:[%s5853_s15 + $0x7e0] sm:$0xff]  ;;  %v567_v13 = vld [vmem:[%s5853_s15 + $0x718] sm:$0xff] }
  0xc0   : > { %4953 = vmatprep.subr.bf16.mxu0 %v5528_v14  ;;  %2344 = vmatmul.mubr.bf16.gmra.mrb[76].mxu1 %v801_v16  ;;  %v878_v14 = vpack.c.bf16 %v592_v10, %v579_v9  ;;  %v594_v16 = vld [vmem:[%s5853_s15 + $0x7f0] sm:$0xff]  ;;  %v866_v17 = vpack.c.bf16 %v567_v13, %v554_v12  ;;  %v683_v10 = vld [vmem:[%s5853_s15 + $0xab8] sm:$0xff] }
  0xc1   : > { %2351 = vmatprep.mubr.bf16.mxu1 %v815_v18  ;;  %5064 = vmatpush3.bf16.msra.mxu1 %v5535_v19  ;;  %v880_v18 = vpack.c.bf16 %v594_v16, %v581_v15  ;;  %v578_v19 = vld [vmem:[%s5853_s15 + $0x770] sm:$0xff] }
  0xc2   : > { %5065 = vmatprep.subr.bf16.mxu1 %v5536_v22  ;;  %v618_v22 = vld [vmem:[%s5853_s15 + $0x8b0] sm:$0xff]  ;;  %v877_v23 = vpack.c.bf16 %v591_v20, %v578_v19 }
  0xc3   : > { %4954 = vmatpush3.bf16.msra.mxu0 %v5529_v21  ;;  %v605_v21 = vld [vmem:[%s5853_s15 + $0x848] sm:$0xff]  ;;  %v658_v16 = vld [vmem:[%s5853_s15 + $0x9f0] sm:$0xff] }
  0xc4   : > { %5253 = vmatprep.subr.bf16.mxu0 %v6224_v25  ;;  %v891_v27 = vpack.c.bf16 %v618_v22, %v605_v21  ;;  %v685_v21 = vld [vmem:[%s5853_s15 + $0xac8] sm:$0xff]  ;;  %v698_v22 = vld [vmem:[%s5853_s15 + $0xb30] sm:$0xff] }
  0xc5   : > { %5066 = vmatpush3.bf16.msra.mxu1 %v5537_v29  ;;  %v620_v29 = vld [vmem:[%s5853_s15 + $0x8c0] sm:$0xff] }
  0xc6   : > { %2191 = vmatmul.mubr.bf16.gmra.mrb[80].mxu0 %v812_v26  ;;  %v593_v26 = vld [vmem:[%s5853_s15 + $0x7e8] sm:$0xff]  ;;  %v893_v31 = vpack.c.bf16 %v620_v29, %v607_v28 }
  0xc7   : > { %2198 = vmatprep.mubr.bf16.mxu0 %v826_v30  ;;  %v879_v30 = vpack.c.bf16 %v593_v26, %v580_v24 }
  0xc8   : > { %2352 = vmatmul.mubr.bf16.gmra.mrb[80].mxu1 %v814_v33  ;;  %v617_v33 = vld [vmem:[%s5853_s15 + $0x8a8] sm:$0xff] }
  0xc9   : > { %2359 = vmatprep.mubr.bf16.mxu1 %v828_v36  ;;  %v890_v36 = vpack.c.bf16 %v617_v33, %v604_v32  ;;  %v932_v32 = vpack.c.bf16 %v698_v22, %v685_v21 }
  0xce   : > { %2199 = vmatmul.mubr.bf16.gmra.mrb[84].mxu0 %v825_v41  ;;  %v646_v41 = vld [vmem:[%s5853_s15 + $0x990] sm:$0xff] }
  0xcf   : > { %2206 = vmatprep.mubr.bf16.mxu0 %v839_v42  ;;  %v892_v42 = vpack.c.bf16 %v619_v38, %v606_v37  ;;  %v906_v43 = vpack.c.bf16 %v646_v41, %v633_v40  ;;  %v722_v40 = vld [vmem:[%s5853_s15 + $0xbf0] sm:$0xff] }
  0xd0   : > { %2360 = vmatmul.mubr.bf16.gmra.mrb[84].mxu1 %v827_v45  ;;  %v643_v45 = vld [vmem:[%s5853_s15 + $0x978] sm:$0xff] }
  0xd1   : > { %2367 = vmatprep.mubr.bf16.mxu1 %v841_v48  ;;  %v903_v51 = vpack.c.bf16 %v643_v45, %v630_v44  ;;  %v684_v45 = vld [vmem:[%s5853_s15 + $0xac0] sm:$0xff] }
  0xd6   : > { %2207 = vmatmul.mubr.bf16.gmra.mrb[88].mxu0 %v838_v53  ;;  %v645_v53 = vld [vmem:[%s5853_s15 + $0x988] sm:$0xff] }
  0xd7   : > { %2214 = vmatprep.mubr.bf16.mxu0 %v852_v54  ;;  %v905_v0 = vpack.c.bf16 %v645_v53, %v632_v52  ;;  %v724_v52 = vld [vmem:[%s5853_s15 + $0xc00] sm:$0xff] }
  0xd8   : > { %2368 = vmatmul.mubr.bf16.gmra.mrb[88].mxu1 %v840_v57  ;;  %v659_v57 = vld [vmem:[%s5853_s15 + $0x9f8] sm:$0xff] }
  0xd9   : > { %2375 = vmatprep.mubr.bf16.mxu1 %v854_v60  ;;  %v919_v3 = vpack.c.bf16 %v672_v58, %v659_v57  ;;  %v931_v58 = vpack.c.bf16 %v697_v46, %v684_v45 }
  0xde   : > { %2215 = vmatmul.mubr.bf16.gmra.mrb[92].mxu0 %v851_v1 }
  0xdf   : > { %2222 = vmatprep.mubr.bf16.mxu0 %v865_v2 }
  0xe0   : > { %2376 = vmatmul.mubr.bf16.gmra.mrb[92].mxu1 %v853_v5 }
  0xe1   : > { %2383 = vmatprep.mubr.bf16.mxu1 %v867_v6  ;;  %v656_v6 = vld [vmem:[%s5853_s15 + $0x9e0] sm:$0xff] }
  0xe2   : > { %v916_v15 = vpack.c.bf16 %v669_v7, %v656_v6 }
  0xe6   : > { %2223 = vmatmul.mubr.bf16.gmra.mrb[96].mxu0 %v864_v11  ;;  %v696_v11 = vld [vmem:[%s5853_s15 + $0xb20] sm:$0xff] }
  0xe7   : > { %2230 = vmatprep.mubr.bf16.mxu0 %v878_v14  ;;  %v930_v20 = vpack.c.bf16 %v696_v11, %v683_v10  ;;  %v710_v11 = vld [vmem:[%s5853_s15 + $0xb90] sm:$0xff] }
  0xe8   : > { %2384 = vmatmul.mubr.bf16.gmra.mrb[96].mxu1 %v866_v17  ;;  %v671_v17 = vld [vmem:[%s5853_s15 + $0xa58] sm:$0xff] }
  0xe9   : > { %2391 = vmatprep.mubr.bf16.mxu1 %v880_v18  ;;  %v918_v29 = vpack.c.bf16 %v671_v17, %v658_v16  ;;  %v737_v17 = vld [vmem:[%s5853_s15 + $0xc68] sm:$0xff] }
  0xee   : > { %2231 = vmatmul.mubr.bf16.gmra.mrb[100].mxu0 %v877_v23 }
  0xef   : > { %2238 = vmatprep.mubr.bf16.mxu0 %v891_v27 }
  0xf0   : > { %2392 = vmatmul.mubr.bf16.gmra.mrb[100].mxu1 %v879_v30 }
  0xf1   : > { %2399 = vmatprep.mubr.bf16.mxu1 %v893_v31 }
  0xf6   : > { %2239 = vmatmul.mubr.bf16.gmra.mrb[104].mxu0 %v890_v36  ;;  %v695_v36 = vld [vmem:[%s5853_s15 + $0xb18] sm:$0xff] }
  0xf7   : > { %2246 = vmatprep.mubr.bf16.mxu0 %v904_v39  ;;  %v709_v39 = vld [vmem:[%s5853_s15 + $0xb88] sm:$0xff]  ;;  %v929_v44 = vpack.c.bf16 %v695_v36, %v682_v35  ;;  %v362_v36 = vld [vmem:[%s5853_s15 + $0xb0] sm:$0xff] }
  0xf8   : > { %2400 = vmatmul.mubr.bf16.gmra.mrb[104].mxu1 %v892_v42  ;;  %v349_v35 = vld [vmem:[%s5853_s15 + $0x48] sm:$0xff] }
  0xf9   : > { %v4507_v48 = vpop.f32.mrb[0].mxu0  ;;  %2407 = vmatprep.mubr.bf16.mxu1 %v906_v43 }
  0xfa   : > { %v4508_v50 = vpop.f32.mrb[1].mxu0 }
  0xfb   : > { %v4509_v54 = vadd.f32 %v4508_v50, %v4507_v48  ;;  %v4510_v55 = vpop.f32.mrb[2].mxu0  ;;  %v4619_v59 = vpop.f32.mrb[0].mxu1  ;;  %v943_v50 = vpack.c.bf16 %v722_v40, %v709_v39 }
  0xfc   : > { %v4511_v60 = vpop.f32.mrb[3].mxu0  ;;  %v4620_v63 = vpop.f32.mrb[1].mxu1 }
  0xfd   : > { %v1839_v61 = vadd.f32 %v4509_v54, %v6289_v49  ;;  %v4512_v62 = vadd.f32 %v4511_v60, %v4510_v55  ;;  %v4621_v1 = vadd.f32 %v4620_v63, %v4619_v59  ;;  %v4622_v2 = vpop.f32.mrb[2].mxu1 }
  0xfe   : > { %2247 = vmatmul.mubr.bf16.gmra.mrb[108].mxu0 %v903_v51  ;;  %v4623_v5 = vpop.f32.mrb[3].mxu1  ;;  %v711_v51 = vld [vmem:[%s5853_s15 + $0xb98] sm:$0xff] }
  0xff   : > { %v1842_v4 = vadd.f32 %v4512_v62, %v6289_v49  ;;  %2254 = vmatprep.mubr.bf16.mxu0 %v917_v56  ;;  %v6299_v8 = vadd.f32 %v4621_v1, %v1839_v61  ;;  %v4624_v9 = vadd.f32 %v4623_v5, %v4622_v2  ;;  %v945_v61 = vpack.c.bf16 %v724_v52, %v711_v51  ;;  %v721_v1 = vld [vmem:[%s5853_s15 + $0xbe8] sm:$0xff]  ;;  %v748_v5 = vld [vmem:[%s5853_s15 + $0xcc0] sm:$0xff] }
 0x100   : > { %2408 = vmatmul.mubr.bf16.gmra.mrb[108].mxu1 %v905_v0  ;;  %v708_v0 = vld [vmem:[%s5853_s15 + $0xb80] sm:$0xff] }
 0x101   : > { %v4513_v12 = vpop.f32.mrb[4].mxu0  ;;  %v6303_v13 = vadd.f32 %v4624_v9, %v1842_v4  ;;  %2415 = vmatprep.mubr.bf16.mxu1 %v919_v3  ;;  %v735_v4 = vld [vmem:[%s5853_s15 + $0xc58] sm:$0xff]  ;;  %v942_v10 = vpack.c.bf16 %v721_v1, %v708_v0 }
 0x102   : > { %v4514_v14 = vpop.f32.mrb[5].mxu0  ;;  %v956_v16 = vpack.c.bf16 %v748_v5, %v735_v4  ;;  %v388_v4 = vld [vmem:[%s5853_s15 + $0x180] sm:$0xff] }
 0x103   : > { %v4515_v18 = vadd.f32 %v4514_v14, %v4513_v12  ;;  %v4516_v19 = vpop.f32.mrb[6].mxu0  ;;  %v4625_v23 = vpop.f32.mrb[4].mxu1  ;;  %v723_v12 = vld [vmem:[%s5853_s15 + $0xbf8] sm:$0xff] }
 0x104   : > { %v4517_v24 = vpop.f32.mrb[7].mxu0  ;;  %v4626_v28 = vpop.f32.mrb[5].mxu1 }
 0x105   : > { %v1847_v26 = vadd.f32 %v4515_v18, %v6289_v49  ;;  %v4518_v27 = vadd.f32 %v4517_v24, %v4516_v19  ;;  %v4627_v30 = vadd.f32 %v4626_v28, %v4625_v23  ;;  %v4628_v31 = vpop.f32.mrb[6].mxu1  ;;  %v750_v18 = vld [vmem:[%s5853_s15 + $0xcd0] sm:$0xff]  ;;  %v944_v24 = vpack.c.bf16 %v723_v12, %v710_v11  ;;  %v363_v12 = vld [vmem:[%s5853_s15 + $0xb8] sm:$0xff] }
 0x106   : > { %2255 = vmatmul.mubr.bf16.gmra.mrb[112].mxu0 %v916_v15  ;;  %v4629_v34 = vpop.f32.mrb[7].mxu1  ;;  %v958_v28 = vpack.c.bf16 %v750_v18, %v737_v17  ;;  %v350_v11 = vld [vmem:[%s5853_s15 + $0x50] sm:$0xff]  ;;  %v377_v17 = vld [vmem:[%s5853_s15 + $0x128] sm:$0xff] }
 0x107   : > { %v1850_v33 = vadd.f32 %v4518_v27, %v6289_v49  ;;  %2262 = vmatprep.mubr.bf16.mxu0 %v930_v20  ;;  %v6313_v37 = vadd.f32 %v4627_v30, %v1847_v26  ;;  %v4630_v38 = vadd.f32 %v4629_v34, %v4628_v31  ;;  %v734_v31 = vld [vmem:[%s5853_s15 + $0xc50] sm:$0xff] }
 0x108   : > { %2416 = vmatmul.mubr.bf16.gmra.mrb[112].mxu1 %v918_v29  ;;  %v390_v18 = vld [vmem:[%s5853_s15 + $0x190] sm:$0xff] }
 0x109   : > { %v4519_v41 = vpop.f32.mrb[8].mxu0  ;;  %v6317_v42 = vadd.f32 %v4630_v38, %v1850_v33  ;;  %2423 = vmatprep.mubr.bf16.mxu1 %v932_v32  ;;  %v747_v32 = vld [vmem:[%s5853_s15 + $0xcb8] sm:$0xff] }
 0x10a   : > { %v4520_v43 = vpop.f32.mrb[9].mxu0 }
 0x10b   : > { %v4521_v47 = vadd.f32 %v4520_v43, %v4519_v41  ;;  %v4522_v48 = vpop.f32.mrb[10].mxu0  ;;  %v4631_v53 = vpop.f32.mrb[8].mxu1  ;;  %v955_v41 = vpack.c.bf16 %v747_v32, %v734_v31  ;;  %v736_v43 = vld [vmem:[%s5853_s15 + $0xc60] sm:$0xff]  ;;  %v374_v32 = vld [vmem:[%s5853_s15 + $0x110] sm:$0xff] }
 0x10c   : > { %v4523_v54 = vpop.f32.mrb[11].mxu0  ;;  %v4632_v57 = vpop.f32.mrb[9].mxu1 }
 0x10d   : > { %v1855_v55 = vadd.f32 %v4521_v47, %v6289_v49  ;;  %v4524_v56 = vadd.f32 %v4523_v54, %v4522_v48  ;;  %v4633_v59 = vadd.f32 %v4632_v57, %v4631_v53  ;;  %v4634_v60 = vpop.f32.mrb[10].mxu1  ;;  %v765_v47 = vpack.c.bf16 %v362_v36, %v349_v35  ;;  %v351_v48 = vld [vmem:[%s5853_s15 + $0x58] sm:$0xff] }
 0x10e   : > { %2263 = vmatmul.mubr.bf16.gmra.mrb[116].mxu0 %v929_v44  ;;  %v4635_v63 = vpop.f32.mrb[11].mxu1  ;;  %v749_v44 = vld [vmem:[%s5853_s15 + $0xcc8] sm:$0xff] }
 0x10f   : > { %v1858_v62 = vadd.f32 %v4524_v56, %v6289_v49  ;;  %2270 = vmatprep.mubr.bf16.mxu0 %v943_v50  ;;  %v6327_v2 = vadd.f32 %v4633_v59, %v1855_v55  ;;  %v4636_v3 = vadd.f32 %v4635_v63, %v4634_v60  ;;  %v364_v50 = vld [vmem:[%s5853_s15 + $0xc0] sm:$0xff]  ;;  %v957_v56 = vpack.c.bf16 %v749_v44, %v736_v43  ;;  %v361_v63 = vld [vmem:[%s5853_s15 + $0xa8] sm:$0xff] }
 0x110   : > { %2424 = vmatmul.mubr.bf16.gmra.mrb[116].mxu1 %v931_v58  ;;  %v767_v59 = vpack.c.bf16 %v364_v50, %v351_v48 }
 0x111   : > { %v4525_v6 = vpop.f32.mrb[12].mxu0  ;;  %v6331_v7 = vadd.f32 %v4636_v3, %v1858_v62  ;;  %2431 = vmatprep.mubr.bf16.mxu1 %v945_v61  ;;  %v348_v62 = vld [vmem:[%s5853_s15 + $0x40] sm:$0xff]  ;;  %v375_v3 = vld [vmem:[%s5853_s15 + $0x118] sm:$0xff] }
 0x112   : > { %v4526_v9 = vpop.f32.mrb[13].mxu0 }
 0x113   : > { %v4527_v14 = vadd.f32 %v4526_v9, %v4525_v6  ;;  %v4528_v15 = vpop.f32.mrb[14].mxu0  ;;  %v4637_v19 = vpop.f32.mrb[12].mxu1 }
 0x114   : > { %v4529_v20 = vpop.f32.mrb[15].mxu0  ;;  %v4638_v23 = vpop.f32.mrb[13].mxu1 }
 0x115   : > { %v1863_v21 = vadd.f32 %v4527_v14, %v6289_v49  ;;  %v4530_v22 = vadd.f32 %v4529_v20, %v4528_v15  ;;  %v4639_v26 = vadd.f32 %v4638_v23, %v4637_v19  ;;  %v4640_v27 = vpop.f32.mrb[14].mxu1 }
 0x116   : > { %2271 = vmatmul.mubr.bf16.gmra.mrb[120].mxu0 %v942_v10  ;;  %v4641_v30 = vpop.f32.mrb[15].mxu1  ;;  %v764_v10 = vpack.c.bf16 %v361_v63, %v348_v62 }
 0x117   : > { %v1866_v29 = vadd.f32 %v4530_v22, %v6289_v49  ;;  %2278 = vmatprep.mubr.bf16.mxu0 %v956_v16  ;;  %v6341_v33 = vadd.f32 %v4639_v26, %v1863_v21  ;;  %v4642_v34 = vadd.f32 %v4641_v30, %v4640_v27  ;;  %v778_v16 = vpack.c.bf16 %v388_v4, %v375_v3  ;;  %v5539_v21 = vld [vmem:[%s7032_s1 + $0x308] sm:$0xff]  }
 0x118   : > { %2432 = vmatmul.mubr.bf16.gmra.mrb[120].mxu1 %v944_v24  ;;  %v766_v26 = vpack.c.bf16 %v363_v12, %v350_v11  ;;  %v413_v3 = vld [vmem:[%s5853_s15 + $0x248] sm:$0xff] }
 0x119   : > { %v4531_v38 = vpop.f32.mrb[16].mxu0  ;;  %v6345_v39 = vadd.f32 %v4642_v34, %v1866_v29  ;;  %2439 = vmatprep.mubr.bf16.mxu1 %v958_v28  ;;  %v780_v29 = vpack.c.bf16 %v390_v18, %v377_v17  ;;  %v387_v34 = vld [vmem:[%s5853_s15 + $0x178] sm:$0xff] }
 0x11a   : > { %v4532_v40 = vpop.f32.mrb[17].mxu0  ;;  %v415_v17 = vld [vmem:[%s5853_s15 + $0x258] sm:$0xff] }
 0x11b   : > { %v4533_v45 = vadd.f32 %v4532_v40, %v4531_v38  ;;  %v4534_v46 = vpop.f32.mrb[18].mxu0  ;;  %v4643_v51 = vpop.f32.mrb[16].mxu1  ;;  %v401_v38 = vld [vmem:[%s5853_s15 + $0x1e8] sm:$0xff]  ;;  %v414_v40 = vld [vmem:[%s5853_s15 + $0x250] sm:$0xff] }
 0x11c   : > { %v4535_v52 = vpop.f32.mrb[19].mxu0  ;;  %v4644_v55 = vpop.f32.mrb[17].mxu1  ;;  %v791_v50 = vpack.c.bf16 %v414_v40, %v401_v38  ;;  %v426_v38 = vld [vmem:[%s5853_s15 + $0x2b0] sm:$0xff]  ;;  %v439_v40 = vld [vmem:[%s5853_s15 + $0x318] sm:$0xff] }
 0x11d   : > { %v1871_v53 = vadd.f32 %v4533_v45, %v6289_v49  ;;  %v4536_v54 = vadd.f32 %v4535_v52, %v4534_v46  ;;  %v4645_v57 = vadd.f32 %v4644_v55, %v4643_v51  ;;  %v4646_v58 = vpop.f32.mrb[18].mxu1  ;;  %v777_v45 = vpack.c.bf16 %v387_v34, %v374_v32  ;;  %v389_v46 = vld [vmem:[%s5853_s15 + $0x188] sm:$0xff]  ;;  %v403_v51 = vld [vmem:[%s5853_s15 + $0x1f8] sm:$0xff]  ;;  %v416_v52 = vld [vmem:[%s5853_s15 + $0x260] sm:$0xff] }
 0x11e   : > { %2279 = vmatmul.mubr.bf16.gmra.mrb[124].mxu0 %v955_v41  ;;  %v4647_v61 = vpop.f32.mrb[19].mxu1 }
 0x11f   : > { %v1874_v60 = vadd.f32 %v4536_v54, %v6289_v49  ;;  %2480 = vmatprep.mubr.bf16.mxu0 %v765_v47  ;;  %v6355_v0 = vadd.f32 %v4645_v57, %v1871_v53  ;;  %v4648_v1 = vadd.f32 %v4647_v61, %v4646_v58  ;;  %v793_v61 = vpack.c.bf16 %v416_v52, %v403_v51  ;;  %v428_v51 = vld [vmem:[%s5853_s15 + $0x2c0] sm:$0xff]  ;;  %v441_v52 = vld [vmem:[%s5853_s15 + $0x328] sm:$0xff] }
 0x120   : > { %2440 = vmatmul.mubr.bf16.gmra.mrb[124].mxu1 %v957_v56 }
 0x121   : > { %v4537_v5 = vpop.f32.mrb[20].mxu0  ;;  %v6359_v6 = vadd.f32 %v4648_v1, %v1874_v60  ;;  %2641 = vmatprep.mubr.bf16.mxu1 %v767_v59  ;;  %v400_v1 = vld [vmem:[%s5853_s15 + $0x1e0] sm:$0xff] }
 0x122   : > { %v4538_v9 = vpop.f32.mrb[21].mxu0 }
 0x123   : > { %v4539_v14 = vadd.f32 %v4538_v9, %v4537_v5  ;;  %v4540_v15 = vpop.f32.mrb[22].mxu0  ;;  %v4649_v19 = vpop.f32.mrb[20].mxu1  ;;  %v427_v9 = vld [vmem:[%s5853_s15 + $0x2b8] sm:$0xff] }
 0x124   : > { %v4541_v20 = vpop.f32.mrb[23].mxu0  ;;  %v4650_v24 = vpop.f32.mrb[21].mxu1 }
 0x125   : > { %v1879_v22 = vadd.f32 %v4539_v14, %v6289_v49  ;;  %v4542_v23 = vadd.f32 %v4541_v20, %v4540_v15  ;;  %v4651_v27 = vadd.f32 %v4650_v24, %v4649_v19  ;;  %v4652_v28 = vpop.f32.mrb[22].mxu1  ;;  %v790_v15 = vpack.c.bf16 %v413_v3, %v400_v1 }
 0x126   : > { %2481 = vmatmul.mubr.bf16.vlgmr.msra.gmra.mrb[128].mxu0 %v764_v10  ;;  %v4653_v31 = vpop.f32.mrb[23].mxu1  ;;  %v440_v10 = vld [vmem:[%s5853_s15 + $0x320] sm:$0xff] }
 0x127   : > { %v1882_v30 = vadd.f32 %v4542_v23, %v6289_v49  ;;  %5254 = vmatpush3.bf16.msra.mxu0 %v6224_v25  ;;  %2488 = vmatprep.mubr.bf16.mxu0 %v778_v16  ;;  %v6373_v35 = vadd.f32 %v4651_v27, %v1879_v22  ;;  %v4654_v36 = vadd.f32 %v4653_v31, %v4652_v28  ;;  %v376_v25 = vld [vmem:[%s5853_s15 + $0x120] sm:$0xff]  ;;  %v402_v16 = vld [vmem:[%s5853_s15 + $0x1f0] sm:$0xff] }
 0x128   : > { %5255 = vmatprep.subr.bf16.mxu0 %v5539_v21  ;;  %2642 = vmatmul.mubr.bf16.vlgmr.msra.gmra.mrb[128].mxu1 %v766_v26  ;;  %v779_v58 = vpack.c.bf16 %v389_v46, %v376_v25  ;;  %v804_v20 = vpack.c.bf16 %v440_v10, %v427_v9  ;;  %v442_v22 = vld [vmem:[%s5853_s15 + $0x330] sm:$0xff] }
 0x129   : > { %v4543_v41 = vpop.f32.mrb[24].mxu0  ;;  %v6377_v43 = vadd.f32 %v4654_v36, %v1882_v30  ;;  %2649 = vmatprep.mubr.bf16.mxu1 %v780_v29  ;;  %v792_v29 = vpack.c.bf16 %v415_v17, %v402_v16  ;;  %v466_v25 = vld [vmem:[%s5853_s15 + $0x3f0] sm:$0xff]  ;;  %v479_v17 = vld [vmem:[%s5853_s15 + $0x458] sm:$0xff] }
 0x12a   : > { %v4544_v44 = vpop.f32.mrb[25].mxu0 }
 0x12b   : > { %v4545_v47 = vadd.f32 %v4544_v44, %v4543_v41  ;;  %v4546_v48 = vpop.f32.mrb[26].mxu0  ;;  %5256 = vmatpush3.bf16.msra.mxu0 %v5539_v21  ;;  %v4655_v53 = vpop.f32.mrb[24].mxu1  ;;  %v429_v21 = vld [vmem:[%s5853_s15 + $0x2c8] sm:$0xff] }
 0x12c   : > { %v4547_v54 = vpop.f32.mrb[27].mxu0  ;;  %v4656_v57 = vpop.f32.mrb[25].mxu1  ;;  %v806_v32 = vpack.c.bf16 %v442_v22, %v429_v21 }
 0x12d   : > { %v1887_v55 = vadd.f32 %v4545_v47, %v6289_v49  ;;  %v4548_v56 = vadd.f32 %v4547_v54, %v4546_v48  ;;  %v4657_v59 = vadd.f32 %v4656_v57, %v4655_v53  ;;  %v4658_v60 = vpop.f32.mrb[26].mxu1  ;;  %v468_v57 = vld [vmem:[%s5853_s15 + $0x400] sm:$0xff] }
 0x12e   : > { %2489 = vmatmul.mubr.bf16.gmra.mrb[132].mxu0 %v777_v45  ;;  %v4659_v63 = vpop.f32.mrb[27].mxu1  ;;  %v453_v45 = vld [vmem:[%s5853_s15 + $0x388] sm:$0xff] }
 0x12f   : > { %v1890_v62 = vadd.f32 %v4548_v56, %v6289_v49  ;;  %2496 = vmatprep.mubr.bf16.mxu0 %v791_v50  ;;  %v6387_v4 = vadd.f32 %v4657_v59, %v1887_v55  ;;  %v4660_v5 = vadd.f32 %v4659_v63, %v4658_v60  ;;  %v803_v50 = vpack.c.bf16 %v439_v40, %v426_v38  ;;  %v455_v56 = vld [vmem:[%s5853_s15 + $0x398] sm:$0xff] }
 0x130   : > { %2650 = vmatmul.mubr.bf16.gmra.mrb[132].mxu1 %v779_v58  ;;  %v817_v55 = vpack.c.bf16 %v466_v25, %v453_v45  ;;  %v805_v63 = vpack.c.bf16 %v441_v52, %v428_v51  ;;  %v491_v51 = vld [vmem:[%s5853_s15 + $0x4b8] sm:$0xff] }
 0x131   : > { %v4549_v11 = vpop.f32.mrb[28].mxu0  ;;  %v6391_v12 = vadd.f32 %v4660_v5, %v1890_v62  ;;  %2657 = vmatprep.mubr.bf16.mxu1 %v793_v61  ;;  %v819_v5 = vpack.c.bf16 %v468_v57, %v455_v56 }
 0x132   : > { %v4550_v14 = vpop.f32.mrb[29].mxu0 }
 0x133   : > { %v4551_v18 = vadd.f32 %v4550_v14, %v4549_v11  ;;  %v4552_v19 = vpop.f32.mrb[30].mxu0  ;;  %v4661_v23 = vpop.f32.mrb[28].mxu1  ;;  %v452_v11 = vld [vmem:[%s5853_s15 + $0x380] sm:$0xff]  ;;  %v465_v14 = vld [vmem:[%s5853_s15 + $0x3e8] sm:$0xff] }
 0x134   : > { %v4553_v24 = vpop.f32.mrb[31].mxu0  ;;  %v4662_v28 = vpop.f32.mrb[29].mxu1  ;;  %v816_v22 = vpack.c.bf16 %v465_v14, %v452_v11 }
 0x135   : > { %v1895_v26 = vadd.f32 %v4551_v18, %v6289_v49  ;;  %v4554_v27 = vadd.f32 %v4553_v24, %v4552_v19  ;;  %v4663_v30 = vadd.f32 %v4662_v28, %v4661_v23  ;;  %v4664_v31 = vpop.f32.mrb[30].mxu1  ;;  %v492_v18 = vld [vmem:[%s5853_s15 + $0x4c0] sm:$0xff]  ;;  %v454_v23 = vld [vmem:[%s5853_s15 + $0x390] sm:$0xff]  ;;  %v467_v24 = vld [vmem:[%s5853_s15 + $0x3f8] sm:$0xff] }
 0x136   : > { %2497 = vmatmul.mubr.bf16.gmra.mrb[136].mxu0 %v790_v15  ;;  %v4665_v36 = vpop.f32.mrb[31].mxu1  ;;  %v830_v28 = vpack.c.bf16 %v492_v18, %v479_v17  ;;  %v818_v40 = vpack.c.bf16 %v467_v24, %v454_v23  ;;  %v504_v24 = vld [vmem:[%s5853_s15 + $0x520] sm:$0xff] }
 0x137   : > { %v1898_v34 = vadd.f32 %v4554_v27, %v6289_v49  ;;  %2504 = vmatprep.mubr.bf16.mxu0 %v804_v20  ;;  %v6401_v41 = vadd.f32 %v4663_v30, %v1895_v26  ;;  %v4666_v44 = vadd.f32 %v4665_v36, %v4664_v31  ;;  %v494_v30 = vld [vmem:[%s5853_s15 + $0x4d0] sm:$0xff] }
 0x138   : > { %2658 = vmatmul.mubr.bf16.gmra.mrb[136].mxu1 %v792_v29  ;;  %v481_v29 = vld [vmem:[%s5853_s15 + $0x468] sm:$0xff] }
 0x139   : > { %v4555_v46 = vpop.f32.mrb[32].mxu0  ;;  %v6405_v47 = vadd.f32 %v4666_v44, %v1898_v34  ;;  %2665 = vmatprep.mubr.bf16.mxu1 %v806_v32  ;;  %v832_v25 = vpack.c.bf16 %v494_v30, %v481_v29  ;;  %v531_v29 = vld [vmem:[%s5853_s15 + $0x5f8] sm:$0xff]  ;;  %v544_v30 = vld [vmem:[%s5853_s15 + $0x660] sm:$0xff] }
 0x13a   : > { %v4556_v48 = vpop.f32.mrb[33].mxu0 }
 0x13b   : > { %v4557_v53 = vadd.f32 %v4556_v48, %v4555_v46  ;;  %v4558_v54 = vpop.f32.mrb[34].mxu0  ;;  %v4667_v58 = vpop.f32.mrb[32].mxu1 }
 0x13c   : > { %v4559_v59 = vpop.f32.mrb[35].mxu0  ;;  %v4668_v62 = vpop.f32.mrb[33].mxu1 }
 0x13d   : > { %v1903_v60 = vadd.f32 %v4557_v53, %v6289_v49  ;;  %v4560_v61 = vadd.f32 %v4559_v59, %v4558_v54  ;;  %v4669_v1 = vadd.f32 %v4668_v62, %v4667_v58  ;;  %v4670_v3 = vpop.f32.mrb[34].mxu1  ;;  %v505_v54 = vld [vmem:[%s5853_s15 + $0x528] sm:$0xff] }
 0x13e   : > { %2505 = vmatmul.mubr.bf16.gmra.mrb[140].mxu0 %v803_v50  ;;  %v4671_v10 = vpop.f32.mrb[35].mxu1  ;;  %v478_v50 = vld [vmem:[%s5853_s15 + $0x450] sm:$0xff] }
 0x13f   : > { %v1906_v9 = vadd.f32 %v4560_v61, %v6289_v49  ;;  %2512 = vmatprep.mubr.bf16.mxu0 %v817_v55  ;;  %v6415_v15 = vadd.f32 %v4669_v1, %v1903_v60  ;;  %v4672_v16 = vadd.f32 %v4671_v10, %v4670_v3  ;;  %v518_v55 = vld [vmem:[%s5853_s15 + $0x590] sm:$0xff]  ;;  %v829_v59 = vpack.c.bf16 %v491_v51, %v478_v50  ;;  %v480_v60 = vld [vmem:[%s5853_s15 + $0x460] sm:$0xff]  ;;  %v493_v61 = vld [vmem:[%s5853_s15 + $0x4c8] sm:$0xff] }
 0x140   : > { %2666 = vmatmul.mubr.bf16.gmra.mrb[140].mxu1 %v805_v63  ;;  %v843_v1 = vpack.c.bf16 %v518_v55, %v505_v54  ;;  %v507_v3 = vld [vmem:[%s5853_s15 + $0x538] sm:$0xff]  ;;  %v831_v17 = vpack.c.bf16 %v493_v61, %v480_v60 }
 0x141   : > { %v4561_v19 = vpop.f32.mrb[36].mxu0  ;;  %v6419_v20 = vadd.f32 %v4672_v16, %v1906_v9  ;;  %2673 = vmatprep.mubr.bf16.mxu1 %v819_v5  ;;  %v520_v5 = vld [vmem:[%s5853_s15 + $0x5a0] sm:$0xff] }
 0x142   : > { %v4562_v21 = vpop.f32.mrb[37].mxu0 }
 0x143   : > { %v4563_v26 = vadd.f32 %v4562_v21, %v4561_v19  ;;  %v4564_v27 = vpop.f32.mrb[38].mxu0  ;;  %v4673_v31 = vpop.f32.mrb[36].mxu1  ;;  %v845_v21 = vpack.c.bf16 %v520_v5, %v507_v3 }
 0x144   : > { %v4565_v32 = vpop.f32.mrb[39].mxu0  ;;  %v4674_v38 = vpop.f32.mrb[37].mxu1 }
 0x145   : > { %v1911_v34 = vadd.f32 %v4563_v26, %v6289_v49  ;;  %v4566_v36 = vadd.f32 %v4565_v32, %v4564_v27  ;;  %v4675_v44 = vadd.f32 %v4674_v38, %v4673_v31  ;;  %v4676_v45 = vpop.f32.mrb[38].mxu1  ;;  %v517_v26 = vld [vmem:[%s5853_s15 + $0x588] sm:$0xff]  ;;  %v506_v38 = vld [vmem:[%s5853_s15 + $0x530] sm:$0xff] }
 0x146   : > { %2513 = vmatmul.mubr.bf16.gmra.mrb[144].mxu0 %v816_v22  ;;  %v4677_v48 = vpop.f32.mrb[39].mxu1 }
 0x147   : > { %v1914_v46 = vadd.f32 %v4566_v36, %v6289_v49  ;;  %2520 = vmatprep.mubr.bf16.mxu0 %v830_v28  ;;  %v6429_v52 = vadd.f32 %v4675_v44, %v1911_v34  ;;  %v4678_v53 = vadd.f32 %v4677_v48, %v4676_v45  ;;  %v842_v36 = vpack.c.bf16 %v517_v26, %v504_v24  ;;  %v546_v48 = vld [vmem:[%s5853_s15 + $0x670] sm:$0xff]  ;;  %v559_v24 = vld [vmem:[%s5853_s15 + $0x6d8] sm:$0xff]  ;;  %v572_v26 = vld [vmem:[%s5853_s15 + $0x740] sm:$0xff] }
 0x148   : > { %2674 = vmatmul.mubr.bf16.gmra.mrb[144].mxu1 %v818_v40  ;;  %v519_v40 = vld [vmem:[%s5853_s15 + $0x598] sm:$0xff] }
 0x149   : > { %v4567_v56 = vpop.f32.mrb[40].mxu0  ;;  %v6433_v57 = vadd.f32 %v4678_v53, %v1914_v46  ;;  %2681 = vmatprep.mubr.bf16.mxu1 %v832_v25  ;;  %v856_v25 = vpack.c.bf16 %v544_v30, %v531_v29  ;;  %v533_v46 = vld [vmem:[%s5853_s15 + $0x608] sm:$0xff] }
 0x14a   : > { %v4568_v58 = vpop.f32.mrb[41].mxu0  ;;  %v858_v60 = vpack.c.bf16 %v546_v48, %v533_v46  ;;  %v556_v46 = vld [vmem:[%s5853_s15 + $0x6c0] sm:$0xff]  ;;  %v569_v48 = vld [vmem:[%s5853_s15 + $0x728] sm:$0xff] }
 0x14b   : > { %v4569_v62 = vadd.f32 %v4568_v58, %v4567_v56  ;;  %v4570_v63 = vpop.f32.mrb[42].mxu0  ;;  %v4679_v9 = vpop.f32.mrb[40].mxu1  ;;  %v844_v56 = vpack.c.bf16 %v519_v40, %v506_v38 }
 0x14c   : > { %v4571_v10 = vpop.f32.mrb[43].mxu0  ;;  %v4680_v16 = vpop.f32.mrb[41].mxu1 }
 0x14d   : > { %v1919_v11 = vadd.f32 %v4569_v62, %v6289_v49  ;;  %v4572_v14 = vadd.f32 %v4571_v10, %v4570_v63  ;;  %v4681_v18 = vadd.f32 %v4680_v16, %v4679_v9  ;;  %v4682_v19 = vpop.f32.mrb[42].mxu1  ;;  %v530_v63 = vld [vmem:[%s5853_s15 + $0x5f0] sm:$0xff]  ;;  %v557_v9 = vld [vmem:[%s5853_s15 + $0x6c8] sm:$0xff] }
 0x14e   : > { %2521 = vmatmul.mubr.bf16.gmra.mrb[148].mxu0 %v829_v59  ;;  %v4683_v23 = vpop.f32.mrb[43].mxu1  ;;  %v570_v10 = vld [vmem:[%s5853_s15 + $0x730] sm:$0xff] }
 0x14f   : > { %v1922_v22 = vadd.f32 %v4572_v14, %v6289_v49  ;;  %2528 = vmatprep.mubr.bf16.mxu0 %v843_v1  ;;  %v6443_v27 = vadd.f32 %v4681_v18, %v1919_v11  ;;  %v4684_v28 = vadd.f32 %v4683_v23, %v4682_v19  ;;  %v543_v1 = vld [vmem:[%s5853_s15 + $0x658] sm:$0xff]  ;;  %v532_v18 = vld [vmem:[%s5853_s15 + $0x600] sm:$0xff]  ;;  %v545_v19 = vld [vmem:[%s5853_s15 + $0x668] sm:$0xff]  ;;  %v869_v23 = vpack.c.bf16 %v570_v10, %v557_v9 }
 0x150   : > { %2682 = vmatmul.mubr.bf16.gmra.mrb[148].mxu1 %v831_v17  ;;  %v855_v17 = vpack.c.bf16 %v543_v1, %v530_v63  ;;  %v598_v9 = vld [vmem:[%s5853_s15 + $0x810] sm:$0xff] }
 0x151   : > { %v4573_v31 = vpop.f32.mrb[44].mxu0  ;;  %v6447_v32 = vadd.f32 %v4684_v28, %v1922_v22  ;;  %2689 = vmatprep.mubr.bf16.mxu1 %v845_v21 }
 0x152   : > { %v4574_v34 = vpop.f32.mrb[45].mxu0 }
 0x153   : > { %v4575_v44 = vadd.f32 %v4574_v34, %v4573_v31  ;;  %v4576_v45 = vpop.f32.mrb[46].mxu0  ;;  %v4685_v50 = vpop.f32.mrb[44].mxu1 }
 0x154   : > { %v4577_v51 = vpop.f32.mrb[47].mxu0  ;;  %v4686_v55 = vpop.f32.mrb[45].mxu1 }
 0x155   : > { %v1927_v53 = vadd.f32 %v4575_v44, %v6289_v49  ;;  %v4578_v54 = vadd.f32 %v4577_v51, %v4576_v45  ;;  %v4687_v58 = vadd.f32 %v4686_v55, %v4685_v50  ;;  %v4688_v59 = vpop.f32.mrb[46].mxu1  ;;  %v871_v44 = vpack.c.bf16 %v572_v26, %v559_v24 }
 0x156   : > { %2529 = vmatmul.mubr.bf16.gmra.mrb[152].mxu0 %v842_v36  ;;  %v4689_v62 = vpop.f32.mrb[47].mxu1  ;;  %v857_v36 = vpack.c.bf16 %v545_v19, %v532_v18 }
 0x157   : > { %v1930_v61 = vadd.f32 %v4578_v54, %v6289_v49  ;;  %2536 = vmatprep.mubr.bf16.mxu0 %v856_v25  ;;  %v6457_v3 = vadd.f32 %v4687_v58, %v1927_v53  ;;  %v4690_v5 = vadd.f32 %v4689_v62, %v4688_v59  ;;  %v583_v53 = vld [vmem:[%s5853_s15 + $0x798] sm:$0xff]  ;;  %v596_v54 = vld [vmem:[%s5853_s15 + $0x800] sm:$0xff]  ;;  %v868_v59 = vpack.c.bf16 %v569_v48, %v556_v46  ;;  %v597_v46 = vld [vmem:[%s5853_s15 + $0x808] sm:$0xff] }
 0x158   : > { %2690 = vmatmul.mubr.bf16.gmra.mrb[152].mxu1 %v844_v56  ;;  %v882_v1 = vpack.c.bf16 %v596_v54, %v583_v53  ;;  %v611_v54 = vld [vmem:[%s5853_s15 + $0x878] sm:$0xff] }
 0x159   : > { %v4579_v11 = vpop.f32.mrb[48].mxu0  ;;  %v6461_v14 = vadd.f32 %v4690_v5, %v1930_v61  ;;  %2697 = vmatprep.mubr.bf16.mxu1 %v858_v60  ;;  %v558_v60 = vld [vmem:[%s5853_s15 + $0x6d0] sm:$0xff]  ;;  %v571_v61 = vld [vmem:[%s5853_s15 + $0x738] sm:$0xff]  ;;  %v585_v5 = vld [vmem:[%s5853_s15 + $0x7a8] sm:$0xff] }
 0x15a   : > { %v4580_v16 = vpop.f32.mrb[49].mxu0  ;;  %v870_v19 = vpack.c.bf16 %v571_v61, %v558_v60 }
 0x15b   : > { %v4581_v21 = vadd.f32 %v4580_v16, %v4579_v11  ;;  %v4582_v22 = vpop.f32.mrb[50].mxu0  ;;  %v4691_v28 = vpop.f32.mrb[48].mxu1 }
 0x15c   : > { %v4583_v29 = vpop.f32.mrb[51].mxu0  ;;  %v4692_v34 = vpop.f32.mrb[49].mxu1 }
 0x15d   : > { %v1935_v30 = vadd.f32 %v4581_v21, %v6289_v49  ;;  %v4584_v31 = vadd.f32 %v4583_v29, %v4582_v22  ;;  %v4693_v38 = vadd.f32 %v4692_v34, %v4691_v28  ;;  %v4694_v40 = vpop.f32.mrb[50].mxu1  ;;  %v582_v28 = vld [vmem:[%s5853_s15 + $0x790] sm:$0xff]  ;;  %v595_v29 = vld [vmem:[%s5853_s15 + $0x7f8] sm:$0xff]  ;;  %v609_v34 = vld [vmem:[%s5853_s15 + $0x868] sm:$0xff] }
 0x15e   : > { %2537 = vmatmul.mubr.bf16.gmra.mrb[156].mxu0 %v855_v17  ;;  %v4695_v25 = vpop.f32.mrb[51].mxu1 }
 0x15f   : > { %v1938_v45 = vadd.f32 %v4584_v31, %v6289_v49  ;;  %2544 = vmatprep.mubr.bf16.mxu0 %v869_v23  ;;  %v6471_v50 = vadd.f32 %v4693_v38, %v1935_v30  ;;  %v4696_v51 = vadd.f32 %v4695_v25, %v4694_v40  ;;  %v884_v23 = vpack.c.bf16 %v598_v9, %v585_v5  ;;  %v584_v25 = vld [vmem:[%s5853_s15 + $0x7a0] sm:$0xff] }
 0x160   : > { %2698 = vmatmul.mubr.bf16.gmra.mrb[156].mxu1 %v857_v36  ;;  %v622_v36 = vld [vmem:[%s5853_s15 + $0x8d0] sm:$0xff] }
 0x161   : > { %v4585_v55 = vpop.f32.mrb[52].mxu0  ;;  %v6475_v56 = vadd.f32 %v4696_v51, %v1938_v45  ;;  %2705 = vmatprep.mubr.bf16.mxu1 %v871_v44  ;;  %v881_v45 = vpack.c.bf16 %v595_v29, %v582_v28  ;;  %v895_v53 = vpack.c.bf16 %v622_v36, %v609_v34  ;;  %v610_v29 = vld [vmem:[%s5853_s15 + $0x870] sm:$0xff] }
 0x162   : > { %v4586_v58 = vpop.f32.mrb[53].mxu0 }
 0x163   : > { %v4587_v62 = vadd.f32 %v4586_v58, %v4585_v55  ;;  %v4588_v63 = vpop.f32.mrb[54].mxu0  ;;  %v4697_v10 = vpop.f32.mrb[52].mxu1  ;;  %v624_v55 = vld [vmem:[%s5853_s15 + $0x8e0] sm:$0xff] }
 0x164   : > { %v4589_v11 = vpop.f32.mrb[55].mxu0  ;;  %v4698_v18 = vpop.f32.mrb[53].mxu1  ;;  %v897_v9 = vpack.c.bf16 %v624_v55, %v611_v54 }
 0x165   : > { %v1943_v16 = vadd.f32 %v4587_v62, %v6289_v49  ;;  %v4590_v17 = vadd.f32 %v4589_v11, %v4588_v63  ;;  %v4699_v21 = vadd.f32 %v4698_v18, %v4697_v10  ;;  %v4700_v22 = vpop.f32.mrb[54].mxu1  ;;  %v883_v63 = vpack.c.bf16 %v597_v46, %v584_v25 }
 0x166   : > { %2545 = vmatmul.mubr.bf16.gmra.mrb[160].mxu0 %v868_v59  ;;  %v4701_v26 = vpop.f32.mrb[55].mxu1 }
 0x167   : > { %v1946_v24 = vadd.f32 %v4590_v17, %v6289_v49  ;;  %2552 = vmatprep.mubr.bf16.mxu0 %v882_v1  ;;  %v6485_v30 = vadd.f32 %v4699_v21, %v1943_v16  ;;  %v4702_v31 = vadd.f32 %v4701_v26, %v4700_v22  ;;  %v608_v16 = vld [vmem:[%s5853_s15 + $0x860] sm:$0xff]  ;;  %v621_v17 = vld [vmem:[%s5853_s15 + $0x8c8] sm:$0xff]  ;;  %v635_v21 = vld [vmem:[%s5853_s15 + $0x938] sm:$0xff] }
 0x168   : > { %2706 = vmatmul.mubr.bf16.gmra.mrb[160].mxu1 %v870_v19  ;;  %v648_v22 = vld [vmem:[%s5853_s15 + $0x9a0] sm:$0xff]  ;;  %v894_v28 = vpack.c.bf16 %v621_v17, %v608_v16 }
 0x169   : > { %v4591_v38 = vpop.f32.mrb[56].mxu0  ;;  %v6489_v40 = vadd.f32 %v4702_v31, %v1946_v24  ;;  %2713 = vmatprep.mubr.bf16.mxu1 %v884_v23  ;;  %v623_v31 = vld [vmem:[%s5853_s15 + $0x8d8] sm:$0xff] }
 0x16a   : > { %v4592_v44 = vpop.f32.mrb[57].mxu0  ;;  %v896_v54 = vpack.c.bf16 %v623_v31, %v610_v29  ;;  %v676_v29 = vld [vmem:[%s5853_s15 + $0xa80] sm:$0xff] }
 0x16b   : > { %v4593_v48 = vadd.f32 %v4592_v44, %v4591_v38  ;;  %v4594_v51 = vpop.f32.mrb[58].mxu0  ;;  %v4703_v58 = vpop.f32.mrb[56].mxu1  ;;  %v908_v38 = vpack.c.bf16 %v648_v22, %v635_v21  ;;  %v637_v44 = vld [vmem:[%s5853_s15 + $0x948] sm:$0xff] }
 0x16c   : > { %v4595_v59 = vpop.f32.mrb[59].mxu0  ;;  %v4704_v62 = vpop.f32.mrb[57].mxu1  ;;  %v649_v21 = vld [vmem:[%s5853_s15 + $0x9a8] sm:$0xff] }
 0x16d   : > { %v1951_v60 = vadd.f32 %v4593_v48, %v6289_v49  ;;  %v4596_v61 = vadd.f32 %v4595_v59, %v4594_v51  ;;  %v4705_v1 = vadd.f32 %v4704_v62, %v4703_v58  ;;  %v4706_v5 = vpop.f32.mrb[58].mxu1  ;;  %v634_v62 = vld [vmem:[%s5853_s15 + $0x930] sm:$0xff] }
 0x16e   : > { %2553 = vmatmul.mubr.bf16.gmra.mrb[164].mxu0 %v881_v45  ;;  %v4707_v11 = vpop.f32.mrb[59].mxu1  ;;  %v650_v45 = vld [vmem:[%s5853_s15 + $0x9b0] sm:$0xff] }
 0x16f   : > { %v1954_v10 = vadd.f32 %v4596_v61, %v6289_v49  ;;  %2560 = vmatprep.mubr.bf16.mxu0 %v895_v53  ;;  %v6499_v18 = vadd.f32 %v4705_v1, %v1951_v60  ;;  %v4708_v19 = vadd.f32 %v4707_v11, %v4706_v5  ;;  %v910_v59 = vpack.c.bf16 %v650_v45, %v637_v44 }
 0x170   : > { %2714 = vmatmul.mubr.bf16.gmra.mrb[164].mxu1 %v883_v63  ;;  %v647_v63 = vld [vmem:[%s5853_s15 + $0x998] sm:$0xff] }
 0x171   : > { %v4597_v23 = vpop.f32.mrb[60].mxu0  ;;  %v6503_v24 = vadd.f32 %v4708_v19, %v1954_v10  ;;  %2721 = vmatprep.mubr.bf16.mxu1 %v897_v9  ;;  %v661_v9 = vld [vmem:[%s5853_s15 + $0xa08] sm:$0xff]  ;;  %v674_v10 = vld [vmem:[%s5853_s15 + $0xa70] sm:$0xff]  ;;  %v907_v19 = vpack.c.bf16 %v647_v63, %v634_v62 }
 0x172   : > { %v4598_v26 = vpop.f32.mrb[61].mxu0 }
 0x173   : > { %v4599_v34 = vadd.f32 %v4598_v26, %v4597_v23  ;;  %v4600_v36 = vpop.f32.mrb[62].mxu0  ;;  %v4709_v25 = vpop.f32.mrb[60].mxu1  ;;  %v921_v26 = vpack.c.bf16 %v674_v10, %v661_v9  ;;  %v675_v9 = vld [vmem:[%s5853_s15 + $0xa78] sm:$0xff] }
 0x174   : > { %v4601_v46 = vpop.f32.mrb[63].mxu0  ;;  %v4710_v53 = vpop.f32.mrb[61].mxu1 }
 0x175   : > { %v1959_v48 = vadd.f32 %v4599_v34, %v6289_v49  ;;  %v4602_v51 = vadd.f32 %v4601_v46, %v4600_v36  ;;  %v4711_v55 = vadd.f32 %v4710_v53, %v4709_v25  ;;  %v4712_v58 = vpop.f32.mrb[62].mxu1 }
 0x176   : > { %2561 = vmatmul.mubr.bf16.gmra.mrb[168].mxu0 %v894_v28  ;;  %v4713_v61 = vpop.f32.mrb[63].mxu1  ;;  %v663_v28 = vld [vmem:[%s5853_s15 + $0xa18] sm:$0xff] }
 0x177   : > { %v1962_v60 = vadd.f32 %v4602_v51, %v6289_v49  ;;  %2568 = vmatprep.mubr.bf16.mxu0 %v908_v38  ;;  %v6513_v1 = vadd.f32 %v4711_v55, %v1959_v48  ;;  %v4714_v5 = vadd.f32 %v4713_v61, %v4712_v58  ;;  %v636_v49 = vld [vmem:[%s5853_s15 + $0x940] sm:$0xff]  ;;  %v923_v48 = vpack.c.bf16 %v676_v29, %v663_v28  ;;  %v673_v55 = vld [vmem:[%s5853_s15 + $0xa68] sm:$0xff] }
 0x178   : > { %2722 = vmatmul.mubr.bf16.gmra.mrb[168].mxu1 %v896_v54  ;;  %v909_v45 = vpack.c.bf16 %v649_v21, %v636_v49  ;;  %v660_v54 = vld [vmem:[%s5853_s15 + $0xa00] sm:$0xff]  ;;  %v702_v49 = vld [vmem:[%s5853_s15 + $0xb50] sm:$0xff] }
 0x179   : > { %v4731_v11 = vpop.f32.mrb[64].mxu0  ;;  %v6517_v16 = vadd.f32 %v4714_v5, %v1962_v60  ;;  %2729 = vmatprep.mubr.bf16.mxu1 %v910_v59  ;;  %v687_v59 = vld [vmem:[%s5853_s15 + $0xad8] sm:$0xff]  ;;  %v700_v60 = vld [vmem:[%s5853_s15 + $0xb40] sm:$0xff]  ;;  %v920_v5 = vpack.c.bf16 %v673_v55, %v660_v54 }
 0x17a   : > { %v4732_v17 = vpop.f32.mrb[65].mxu0 }
 0x17b   : > { %v4733_v22 = vadd.f32 %v4732_v17, %v4731_v11  ;;  %v4734_v23 = vpop.f32.mrb[66].mxu0  ;;  %v4843_v31 = vpop.f32.mrb[64].mxu1  ;;  %v934_v17 = vpack.c.bf16 %v700_v60, %v687_v59  ;;  %v688_v59 = vld [vmem:[%s5853_s15 + $0xae0] sm:$0xff]  ;;  %v701_v60 = vld [vmem:[%s5853_s15 + $0xb48] sm:$0xff] }
 0x17c   : > { %v4735_v34 = vpop.f32.mrb[67].mxu0  ;;  %v4844_v44 = vpop.f32.mrb[65].mxu1 }
 0x17d   : > { %v2161_v36 = vadd.f32 %v4733_v22, %v6299_v8  ;;  %v4736_v38 = vadd.f32 %v4735_v34, %v4734_v23  ;;  %v4845_v25 = vadd.f32 %v4844_v44, %v4843_v31  ;;  %v4846_v46 = vpop.f32.mrb[66].mxu1 }
 0x17e   : > { %2569 = vmatmul.mubr.bf16.gmra.mrb[172].mxu0 %v907_v19  ;;  %v4847_v53 = vpop.f32.mrb[67].mxu1  ;;  %v689_v19 = vld [vmem:[%s5853_s15 + $0xae8] sm:$0xff] }
 0x17f   : > { %v2164_v51 = vadd.f32 %v4736_v38, %v6303_v13  ;;  %2576 = vmatprep.mubr.bf16.mxu0 %v921_v26  ;;  %v6527_v58 = vadd.f32 %v4845_v25, %v2161_v36  ;;  %v4848_v8 = vadd.f32 %v4847_v53, %v4846_v46  ;;  %v662_v13 = vld [vmem:[%s5853_s15 + $0xa10] sm:$0xff]  ;;  %v936_v36 = vpack.c.bf16 %v702_v49, %v689_v19  ;;  %v699_v25 = vld [vmem:[%s5853_s15 + $0xb38] sm:$0xff] }
 0x180   : > { %2730 = vmatmul.mubr.bf16.gmra.mrb[172].mxu1 %v909_v45  ;;  %v922_v29 = vpack.c.bf16 %v675_v9, %v662_v13  ;;  %v686_v45 = vld [vmem:[%s5853_s15 + $0xad0] sm:$0xff]  ;;  %v715_v13 = vld [vmem:[%s5853_s15 + $0xbb8] sm:$0xff]  ;;  %v728_v9 = vld [vmem:[%s5853_s15 + $0xc20] sm:$0xff] }
 0x181   : > { %v4737_v61 = vpop.f32.mrb[68].mxu0  ;;  %v6531_v62 = vadd.f32 %v4848_v8, %v2164_v51  ;;  %2737 = vmatprep.mubr.bf16.mxu1 %v923_v48  ;;  %v713_v51 = vld [vmem:[%s5853_s15 + $0xba8] sm:$0xff]  ;;  %v726_v53 = vld [vmem:[%s5853_s15 + $0xc10] sm:$0xff]  ;;  %v933_v8 = vpack.c.bf16 %v699_v25, %v686_v45 }
 0x182   : > { %v4738_v63 = vpop.f32.mrb[69].mxu0 }
 0x183   : > { %v4739_v10 = vadd.f32 %v4738_v63, %v4737_v61  ;;  %v4740_v11 = vpop.f32.mrb[70].mxu0  ;;  %v4849_v21 = vpop.f32.mrb[68].mxu1 }
 0x184   : > { %v4741_v22 = vpop.f32.mrb[71].mxu0  ;;  %v4850_v28 = vpop.f32.mrb[69].mxu1 }
 0x185   : > { %v2169_v23 = vadd.f32 %v4739_v10, %v6313_v37  ;;  %v4742_v26 = vadd.f32 %v4741_v22, %v4740_v11  ;;  %v4851_v31 = vadd.f32 %v4850_v28, %v4849_v21  ;;  %v4852_v34 = vpop.f32.mrb[70].mxu1  ;;  %v5540_v37 = vld [vmem:[%s7034_s3] sm:$0xff]   ;;  %v935_v21 = vpack.c.bf16 %v701_v60, %v688_v59  ;;  %v754_v59 = vld [vmem:[%s5853_s15 + $0xcf0] sm:$0xff] }
 0x186   : > { %2577 = vmatmul.mubr.bf16.gmra.mrb[176].mxu0 %v920_v5  ;;  %v4853_v44 = vpop.f32.mrb[71].mxu1  ;;  %5289 = vmatprep.subr.bf16.mxu1 %v5540_v37  ;;  %v947_v5 = vpack.c.bf16 %v726_v53, %v713_v51  ;;  %v727_v51 = vld [vmem:[%s5853_s15 + $0xc18] sm:$0xff] }
 0x187   : > { %v2172_v38 = vadd.f32 %v4742_v26, %v6317_v42  ;;  %2584 = vmatprep.mubr.bf16.mxu0 %v934_v17  ;;  %v6544_v46 = vadd.f32 %v4851_v31, %v2169_v23  ;;  %v4854_v48 = vadd.f32 %v4853_v44, %v4852_v34  ;;  %5290 = vmatpush3.bf16.msra.mxu1 %v5540_v37  ;;  %v712_v31 = vld [vmem:[%s5853_s15 + $0xba0] sm:$0xff]  ;;  %v725_v34 = vld [vmem:[%s5853_s15 + $0xc08] sm:$0xff] }
 0x188   : > { %2738 = vmatmul.mubr.bf16.gmra.mrb[176].mxu1 %v922_v29  ;;  %v949_v26 = vpack.c.bf16 %v728_v9, %v715_v13  ;;  %v752_v44 = vld [vmem:[%s5853_s15 + $0xce0] sm:$0xff] }
 0x189   : > { %v4743_v54 = vpop.f32.mrb[72].mxu0  ;;  %v6548_v42 = vadd.f32 %v4854_v48, %v2172_v38  ;;  %2745 = vmatprep.mubr.bf16.mxu1 %v936_v36  ;;  %v739_v38 = vld [vmem:[%s5853_s15 + $0xc78] sm:$0xff]  ;;  %v946_v48 = vpack.c.bf16 %v725_v34, %v712_v31 }
 0x18a   : > { %v4744_v55 = vpop.f32.mrb[73].mxu0 }
 0x18b   : > { %v4745_v61 = vadd.f32 %v4744_v55, %v4743_v54  ;;  %v4746_v63 = vpop.f32.mrb[74].mxu0  ;;  %v4855_v10 = vpop.f32.mrb[72].mxu1  ;;  %v960_v55 = vpack.c.bf16 %v752_v44, %v739_v38  ;;  %v740_v38 = vld [vmem:[%s5853_s15 + $0xc80] sm:$0xff]  ;;  %v753_v44 = vld [vmem:[%s5853_s15 + $0xce8] sm:$0xff] }
 0x18c   : > { %v4747_v11 = vpop.f32.mrb[75].mxu0  ;;  %v4856_v49 = vpop.f32.mrb[73].mxu1 }
 0x18d   : > { %v2177_v17 = vadd.f32 %v4745_v61, %v6327_v2  ;;  %v4748_v19 = vadd.f32 %v4747_v11, %v4746_v63  ;;  %v4857_v22 = vadd.f32 %v4856_v49, %v4855_v10  ;;  %v4858_v23 = vpop.f32.mrb[74].mxu1 }
 0x18e   : > { %2585 = vmatmul.mubr.bf16.gmra.mrb[180].mxu0 %v933_v8  ;;  %v4859_v29 = vpop.f32.mrb[75].mxu1  ;;  %v741_v8 = vld [vmem:[%s5853_s15 + $0xc88] sm:$0xff] }
 0x18f   : > { %v2180_v28 = vadd.f32 %v4748_v19, %v6331_v7  ;;  %2592 = vmatprep.mubr.bf16.mxu0 %v947_v5  ;;  %v6558_v36 = vadd.f32 %v4857_v22, %v2177_v17  ;;  %v4860_v2 = vadd.f32 %v4859_v29, %v4858_v23  ;;  %v714_v7 = vld [vmem:[%s5853_s15 + $0xbb0] sm:$0xff]  ;;  %v962_v17 = vpack.c.bf16 %v754_v59, %v741_v8  ;;  %v751_v22 = vld [vmem:[%s5853_s15 + $0xcd8] sm:$0xff]  ;;  %v365_v29 = vld [vmem:[%s5853_s15 + $0xc8] sm:$0xff] }
 0x190   : > { %2746 = vmatmul.mubr.bf16.gmra.mrb[180].mxu1 %v935_v21  ;;  %v948_v9 = vpack.c.bf16 %v727_v51, %v714_v7  ;;  %v738_v21 = vld [vmem:[%s5853_s15 + $0xc70] sm:$0xff]  ;;  %v961_v8 = vpack.c.bf16 %v753_v44, %v740_v38 }
 0x191   : > { %v4749_v45 = vpop.f32.mrb[76].mxu0  ;;  %v6562_v25 = vadd.f32 %v4860_v2, %v2180_v28  ;;  %2753 = vmatprep.mubr.bf16.mxu1 %v949_v26  ;;  %v352_v28 = vld [vmem:[%s5853_s15 + $0x60] sm:$0xff]  ;;  %v959_v2 = vpack.c.bf16 %v751_v22, %v738_v21 }
 0x192   : > { %v4750_v37 = vpop.f32.mrb[77].mxu0 }
 0x193   : > { %v4751_v53 = vadd.f32 %v4750_v37, %v4749_v45  ;;  %v4752_v54 = vpop.f32.mrb[78].mxu0  ;;  %v4861_v60 = vpop.f32.mrb[76].mxu1 }
 0x194   : > { %v4753_v61 = vpop.f32.mrb[79].mxu0  ;;  %v4862_v13 = vpop.f32.mrb[77].mxu1 }
 0x195   : > { %v2185_v63 = vadd.f32 %v4751_v53, %v6341_v33  ;;  %v4754_v5 = vadd.f32 %v4753_v61, %v4752_v54  ;;  %v4863_v10 = vadd.f32 %v4862_v13, %v4861_v60  ;;  %v4864_v11 = vpop.f32.mrb[78].mxu1  ;;  %v5541_v33 = vld [vmem:[%s7034_s3 + $0x8] sm:$0xff]   ;;  %v391_v13 = vld [vmem:[%s5853_s15 + $0x198] sm:$0xff] }
 0x196   : > { %2593 = vmatmul.mubr.bf16.gmra.mrb[184].mxu0 %v946_v48  ;;  %v4865_v49 = vpop.f32.mrb[79].mxu1  ;;  %5291 = vmatprep.subr.bf16.mxu1 %v5541_v33  ;;  %v768_v48 = vpack.c.bf16 %v365_v29, %v352_v28 }
 0x197   : > { %v2188_v19 = vadd.f32 %v4754_v5, %v6345_v39  ;;  %2600 = vmatprep.mubr.bf16.mxu0 %v960_v55  ;;  %v6575_v23 = vadd.f32 %v4863_v10, %v2185_v63  ;;  %v4866_v26 = vadd.f32 %v4865_v49, %v4864_v11  ;;  %5292 = vmatpush3.bf16.msra.mxu1 %v5541_v33  ;;  %v378_v5 = vld [vmem:[%s5853_s15 + $0x130] sm:$0xff]  ;;  %v404_v11 = vld [vmem:[%s5853_s15 + $0x200] sm:$0xff] }
 0x198   : > { %2754 = vmatmul.mubr.bf16.gmra.mrb[184].mxu1 %v948_v9  ;;  %v781_v21 = vpack.c.bf16 %v391_v13, %v378_v5 }
 0x199   : > { %v4755_v31 = vpop.f32.mrb[80].mxu0  ;;  %v6579_v34 = vadd.f32 %v4866_v26, %v2188_v19  ;;  %2761 = vmatprep.mubr.bf16.mxu1 %v962_v17  ;;  %v417_v17 = vld [vmem:[%s5853_s15 + $0x268] sm:$0xff] }
 0x19a   : > { %v4756_v39 = vpop.f32.mrb[81].mxu0  ;;  %v794_v33 = vpack.c.bf16 %v417_v17, %v404_v11 }
 0x19b   : > { %v4757_v45 = vadd.f32 %v4756_v39, %v4755_v31  ;;  %v4758_v37 = vpop.f32.mrb[82].mxu0  ;;  %v4867_v7 = vpop.f32.mrb[80].mxu1 }
 0x19c   : > { %v4759_v51 = vpop.f32.mrb[83].mxu0  ;;  %v4868_v55 = vpop.f32.mrb[81].mxu1 }
 0x19d   : > { %v2193_v53 = vadd.f32 %v4757_v45, %v6355_v0  ;;  %v4760_v54 = vadd.f32 %v4759_v51, %v4758_v37  ;;  %v4869_v59 = vadd.f32 %v4868_v55, %v4867_v7  ;;  %v4870_v60 = vpop.f32.mrb[82].mxu1  ;;  %v430_v37 = vld [vmem:[%s5853_s15 + $0x2d0] sm:$0xff] }
 0x19e   : > { %2601 = vmatmul.mubr.bf16.gmra.mrb[188].mxu0 %v959_v2  ;;  %v4871_v63 = vpop.f32.mrb[83].mxu1  ;;  %v5542_v7 = vld [vmem:[%s7034_s3 + $0x10] sm:$0xff]  }
 0x19f   : > { %v2196_v61 = vadd.f32 %v4760_v54, %v6359_v6  ;;  %5257 = vmatprep.mubr.msk.bf16.mxu0 %vm1755_vm0, %v768_v48  ;;  %v6588_v9 = vadd.f32 %v4869_v59, %v2193_v53  ;;  %v4872_v10 = vadd.f32 %v4871_v63, %v4870_v60  ;;  %v443_v48 = vld [vmem:[%s5853_s15 + $0x338] sm:$0xff]  ;;  %v456_v53 = vld [vmem:[%s5853_s15 + $0x3a0] sm:$0xff]  ;;  %v469_v54 = vld [vmem:[%s5853_s15 + $0x408] sm:$0xff]  ;;  %5293 = vmatprep.subr.bf16.mxu1 %v5542_v7 }
 0x1a0   : > { %2762 = vmatmul.mubr.bf16.gmra.mrb[188].mxu1 %v961_v8  ;;  %v820_v63 = vpack.c.bf16 %v469_v54, %v456_v53 }
 0x1a1   : > { %v4761_v0 = vpop.f32.mrb[84].mxu0  ;;  %v6592_v19 = vadd.f32 %v4872_v10, %v2196_v61  ;;  %5294 = vmatpush3.bf16.msra.mxu1 %v5542_v7 }
 0x1a2   : > { %v4762_v49 = vpop.f32.mrb[85].mxu0 }
 0x1a3   : > { %v4763_v22 = vadd.f32 %v4762_v49, %v4761_v0  ;;  %v4764_v6 = vpop.f32.mrb[86].mxu0  ;;  %v4873_v26 = vpop.f32.mrb[84].mxu1 }
 0x1a4   : > { %v4765_v28 = vpop.f32.mrb[87].mxu0  ;;  %v4874_v39 = vpop.f32.mrb[85].mxu1 }
 0x1a5   : > { %v2201_v29 = vadd.f32 %v4763_v22, %v6373_v35  ;;  %v4766_v31 = vadd.f32 %v4765_v28, %v4764_v6  ;;  %v4875_v2 = vadd.f32 %v4874_v39, %v4873_v26  ;;  %v4876_v38 = vpop.f32.mrb[86].mxu1  ;;  %v482_v6 = vld [vmem:[%s5853_s15 + $0x470] sm:$0xff] }
 0x1a6   : > { %5258 = vmatmul.mubr.msk.bf16.vlgmr.msra.gmra.mrb[192].mxu0 %vm1755_vm0, %v781_v21  ;;  %v4877_v45 = vpop.f32.mrb[87].mxu1 }
 0x1a7   : > { %v2204_v44 = vadd.f32 %v4766_v31, %v6377_v43  ;;  %5261 = vmatprep.mubr.msk.bf16.mxu0 %vm1755_vm0, %v794_v33  ;;  %v6603_v51 = vadd.f32 %v4875_v2, %v2201_v29  ;;  %v4878_v35 = vadd.f32 %v4877_v45, %v4876_v38  ;;  %v807_v43 = vpack.c.bf16 %v443_v48, %v430_v37  ;;  %v495_v33 = vld [vmem:[%s5853_s15 + $0x4d8] sm:$0xff]  ;;  %v508_v29 = vld [vmem:[%s5853_s15 + $0x540] sm:$0xff]  ;;  %v521_v31 = vld [vmem:[%s5853_s15 + $0x5a8] sm:$0xff] }
 0x1a8   : > { %v833_v38 = vpack.c.bf16 %v495_v33, %v482_v6 }
 0x1a9   : > { %v4767_v55 = vpop.f32.mrb[88].mxu0  ;;  %v6607_v8 = vadd.f32 %v4878_v35, %v2204_v44 }
 0x1aa   : > { %v4768_v59 = vpop.f32.mrb[89].mxu0 }
 0x1ab   : > { %v4769_v60 = vadd.f32 %v4768_v59, %v4767_v55  ;;  %v4770_v61 = vpop.f32.mrb[90].mxu0  ;;  %v4879_v5 = vpop.f32.mrb[88].mxu1 }
 0x1ac   : > { %v4771_v13 = vpop.f32.mrb[91].mxu0  ;;  %v4880_v17 = vpop.f32.mrb[89].mxu1 }
 0x1ad   : > { %v2209_v10 = vadd.f32 %v4769_v60, %v6387_v4  ;;  %v4772_v11 = vadd.f32 %v4771_v13, %v4770_v61  ;;  %v4881_v0 = vadd.f32 %v4880_v17, %v4879_v5  ;;  %v4882_v49 = vpop.f32.mrb[90].mxu1  ;;  %v534_v60 = vld [vmem:[%s5853_s15 + $0x610] sm:$0xff]  ;;  %v547_v61 = vld [vmem:[%s5853_s15 + $0x678] sm:$0xff]  ;;  %v560_v13 = vld [vmem:[%s5853_s15 + $0x6e0] sm:$0xff] }
 0x1ae   : > { %5262 = vmatmul.mubr.msk.bf16.gmra.mrb[196].mxu0 %vm1755_vm0, %v807_v43  ;;  %v4883_v22 = vpop.f32.mrb[91].mxu1 }
 0x1af   : > { %v2212_v21 = vadd.f32 %v4772_v11, %v6391_v12  ;;  %5265 = vmatprep.mubr.msk.bf16.mxu0 %vm1755_vm0, %v820_v63  ;;  %v6615_v26 = vadd.f32 %v4881_v0, %v2209_v10  ;;  %v4884_v28 = vadd.f32 %v4883_v22, %v4882_v49  ;;  %v846_v12 = vpack.c.bf16 %v521_v31, %v508_v29  ;;  %v5543_v63 = vld [vmem:[%s7034_s3 + $0x18] sm:$0xff]   ;;  %v573_v10 = vld [vmem:[%s5853_s15 + $0x748] sm:$0xff] }
 0x1b0   : > { %5295 = vmatprep.subr.bf16.mxu1 %v5543_v63  ;;  %v872_v22 = vpack.c.bf16 %v573_v10, %v560_v13 }
 0x1b1   : > { %v4773_v39 = vpop.f32.mrb[92].mxu0  ;;  %v6619_v4 = vadd.f32 %v4884_v28, %v2212_v21  ;;  %5296 = vmatpush3.bf16.msra.mxu1 %v5543_v63 }
 0x1b2   : > { %v4774_v2 = vpop.f32.mrb[93].mxu0 }
 0x1b3   : > { %v4775_v44 = vadd.f32 %v4774_v2, %v4773_v39  ;;  %v4776_v45 = vpop.f32.mrb[94].mxu0  ;;  %v4885_v37 = vpop.f32.mrb[92].mxu1 }
 0x1b4   : > { %v4777_v48 = vpop.f32.mrb[95].mxu0  ;;  %v4886_v53 = vpop.f32.mrb[93].mxu1 }
 0x1b5   : > { %v2217_v7 = vadd.f32 %v4775_v44, %v6401_v41  ;;  %v4778_v35 = vadd.f32 %v4777_v48, %v4776_v45  ;;  %v4887_v54 = vadd.f32 %v4886_v53, %v4885_v37  ;;  %v4888_v55 = vpop.f32.mrb[94].mxu1  ;;  %v586_v45 = vld [vmem:[%s5853_s15 + $0x7b0] sm:$0xff] }
 0x1b6   : > { %5266 = vmatmul.mubr.msk.bf16.gmra.mrb[200].mxu0 %vm1755_vm0, %v833_v38  ;;  %v4889_v43 = vpop.f32.mrb[95].mxu1 }
 0x1b7   : > { %v2220_v59 = vadd.f32 %v4778_v35, %v6405_v47  ;;  %5269 = vmatprep.mubr.msk.bf16.mxu0 %vm1755_vm0, %v846_v12  ;;  %v6630_v5 = vadd.f32 %v4887_v54, %v2217_v7  ;;  %v4890_v41 = vadd.f32 %v4889_v43, %v4888_v55  ;;  %v859_v47 = vpack.c.bf16 %v547_v61, %v534_v60  ;;  %v599_v12 = vld [vmem:[%s5853_s15 + $0x818] sm:$0xff]  ;;  %v612_v7 = vld [vmem:[%s5853_s15 + $0x880] sm:$0xff]  ;;  %v625_v35 = vld [vmem:[%s5853_s15 + $0x8e8] sm:$0xff] }
 0x1b8   : > { %v885_v55 = vpack.c.bf16 %v599_v12, %v586_v45 }
 0x1b9   : > { %v4779_v11 = vpop.f32.mrb[96].mxu0  ;;  %v6634_v17 = vadd.f32 %v4890_v41, %v2220_v59 }
 0x1ba   : > { %v4780_v0 = vpop.f32.mrb[97].mxu0 }
 0x1bb   : > { %v4781_v49 = vadd.f32 %v4780_v0, %v4779_v11  ;;  %v4782_v21 = vpop.f32.mrb[98].mxu0  ;;  %v4891_v6 = vpop.f32.mrb[96].mxu1 }
 0x1bc   : > { %v4783_v33 = vpop.f32.mrb[99].mxu0  ;;  %v4892_v31 = vpop.f32.mrb[97].mxu1 }
 0x1bd   : > { %v2225_v28 = vadd.f32 %v4781_v49, %v6415_v15  ;;  %v4784_v29 = vadd.f32 %v4783_v33, %v4782_v21  ;;  %v4893_v39 = vadd.f32 %v4892_v31, %v4891_v6  ;;  %v4894_v2 = vpop.f32.mrb[98].mxu1  ;;  %v638_v49 = vld [vmem:[%s5853_s15 + $0x950] sm:$0xff]  ;;  %v651_v21 = vld [vmem:[%s5853_s15 + $0x9b8] sm:$0xff]  ;;  %v664_v33 = vld [vmem:[%s5853_s15 + $0xa20] sm:$0xff] }
 0x1be   : > { %5270 = vmatmul.mubr.msk.bf16.gmra.mrb[204].mxu0 %vm1755_vm0, %v859_v47  ;;  %v4895_v44 = vpop.f32.mrb[99].mxu1 }
 0x1bf   : > { %v2228_v38 = vadd.f32 %v4784_v29, %v6419_v20  ;;  %5273 = vmatprep.mubr.msk.bf16.mxu0 %vm1755_vm0, %v872_v22  ;;  %v6642_v37 = vadd.f32 %v4893_v39, %v2225_v28  ;;  %v4896_v48 = vadd.f32 %v4895_v44, %v4894_v2  ;;  %v898_v20 = vpack.c.bf16 %v625_v35, %v612_v7  ;;  %v5544_v22 = vld [vmem:[%s7034_s3 + $0x20] sm:$0xff]   ;;  %v677_v28 = vld [vmem:[%s5853_s15 + $0xa88] sm:$0xff] }
 0x1c0   : > { %5297 = vmatprep.subr.bf16.mxu1 %v5544_v22  ;;  %v924_v44 = vpack.c.bf16 %v677_v28, %v664_v33 }
 0x1c1   : > { %v4785_v53 = vpop.f32.mrb[100].mxu0  ;;  %v6646_v15 = vadd.f32 %v4896_v48, %v2228_v38  ;;  %5298 = vmatpush3.bf16.msra.mxu1 %v5544_v22 }
 0x1c2   : > { %v4786_v54 = vpop.f32.mrb[101].mxu0 }
 0x1c3   : > { %v4787_v59 = vadd.f32 %v4786_v54, %v4785_v53  ;;  %v4788_v43 = vpop.f32.mrb[102].mxu0  ;;  %v4897_v60 = vpop.f32.mrb[100].mxu1 }
 0x1c4   : > { %v4789_v61 = vpop.f32.mrb[103].mxu0  ;;  %v4898_v13 = vpop.f32.mrb[101].mxu1 }
 0x1c5   : > { %v2233_v63 = vadd.f32 %v4787_v59, %v6429_v52  ;;  %v4790_v41 = vadd.f32 %v4789_v61, %v4788_v43  ;;  %v4899_v10 = vadd.f32 %v4898_v13, %v4897_v60  ;;  %v4900_v11 = vpop.f32.mrb[102].mxu1  ;;  %v690_v43 = vld [vmem:[%s5853_s15 + $0xaf0] sm:$0xff] }
 0x1c6   : > { %5274 = vmatmul.mubr.msk.bf16.gmra.mrb[208].mxu0 %vm1755_vm0, %v885_v55  ;;  %v4901_v47 = vpop.f32.mrb[103].mxu1 }
 0x1c7   : > { %v2236_v0 = vadd.f32 %v4790_v41, %v6433_v57  ;;  %5277 = vmatprep.mubr.msk.bf16.mxu0 %vm1755_vm0, %v898_v20  ;;  %v6657_v6 = vadd.f32 %v4899_v10, %v2233_v63  ;;  %v4902_v52 = vadd.f32 %v4901_v47, %v4900_v11  ;;  %v911_v57 = vpack.c.bf16 %v651_v21, %v638_v49  ;;  %v703_v20 = vld [vmem:[%s5853_s15 + $0xb58] sm:$0xff]  ;;  %v716_v63 = vld [vmem:[%s5853_s15 + $0xbc0] sm:$0xff]  ;;  %v729_v41 = vld [vmem:[%s5853_s15 + $0xc28] sm:$0xff] }
 0x1c8   : > { %v937_v11 = vpack.c.bf16 %v703_v20, %v690_v43 }
 0x1c9   : > { %v4791_v29 = vpop.f32.mrb[104].mxu0  ;;  %v6661_v31 = vadd.f32 %v4902_v52, %v2236_v0 }
 0x1ca   : > { %v4792_v39 = vpop.f32.mrb[105].mxu0 }
 0x1cb   : > { %v4793_v2 = vadd.f32 %v4792_v39, %v4791_v29  ;;  %v4794_v38 = vpop.f32.mrb[106].mxu0  ;;  %v4903_v45 = vpop.f32.mrb[104].mxu1 }
 0x1cc   : > { %v4795_v12 = vpop.f32.mrb[107].mxu0  ;;  %v4904_v35 = vpop.f32.mrb[105].mxu1 }
 0x1cd   : > { %v2241_v48 = vadd.f32 %v4793_v2, %v6443_v27  ;;  %v4796_v7 = vadd.f32 %v4795_v12, %v4794_v38  ;;  %v4905_v53 = vadd.f32 %v4904_v35, %v4903_v45  ;;  %v4906_v54 = vpop.f32.mrb[106].mxu1  ;;  %v742_v2 = vld [vmem:[%s5853_s15 + $0xc90] sm:$0xff]  ;;  %v755_v38 = vld [vmem:[%s5853_s15 + $0xcf8] sm:$0xff] }
 0x1ce   : > { %5278 = vmatmul.mubr.msk.bf16.gmra.mrb[212].mxu0 %vm1755_vm0, %v911_v57  ;;  %v4907_v59 = vpop.f32.mrb[107].mxu1  ;;  %v963_v35 = vpack.c.bf16 %v755_v38, %v742_v2  ;;  %v5546_v2 = vld [vmem:[%s7034_s3 + $0x30] sm:$0xff]  }
 0x1cf   : > { %v2244_v55 = vadd.f32 %v4796_v7, %v6447_v32  ;;  %5281 = vmatprep.mubr.msk.bf16.mxu0 %vm1755_vm0, %v924_v44  ;;  %v6669_v60 = vadd.f32 %v4905_v53, %v2241_v48  ;;  %v4908_v61 = vadd.f32 %v4907_v59, %v4906_v54  ;;  %v950_v32 = vpack.c.bf16 %v729_v41, %v716_v63  ;;  %v5545_v44 = vld [vmem:[%s7034_s3 + $0x28] sm:$0xff]  }
 0x1d0   : > { %5299 = vmatprep.subr.bf16.mxu1 %v5545_v44 }
 0x1d1   : > { %v4797_v13 = vpop.f32.mrb[108].mxu0  ;;  %v6673_v27 = vadd.f32 %v4908_v61, %v2244_v55  ;;  %5300 = vmatpush3.bf16.msra.mxu1 %v5545_v44 }
 0x1d2   : > { %v4798_v10 = vpop.f32.mrb[109].mxu0  ;;  %5301 = vmatprep.subr.bf16.mxu1 %v5546_v2 }
 0x1d3   : > { %v4799_v0 = vadd.f32 %v4798_v10, %v4797_v13  ;;  %v4800_v47 = vpop.f32.mrb[110].mxu0  ;;  %v4909_v49 = vpop.f32.mrb[108].mxu1 }
 0x1d4   : > { %v4801_v21 = vpop.f32.mrb[111].mxu0  ;;  %v4910_v33 = vpop.f32.mrb[109].mxu1 }
 0x1d5   : > { %v2249_v22 = vadd.f32 %v4799_v0, %v6457_v3  ;;  %v4802_v52 = vadd.f32 %v4801_v21, %v4800_v47  ;;  %v4911_v28 = vadd.f32 %v4910_v33, %v4909_v49  ;;  %v4912_v29 = vpop.f32.mrb[110].mxu1  ;;  %5302 = vmatpush3.bf16.msra.mxu1 %v5546_v2 }
 0x1d6   : > { %5282 = vmatmul.mubr.msk.bf16.gmra.mrb[216].mxu0 %vm1755_vm0, %v937_v11  ;;  %v4913_v57 = vpop.f32.mrb[111].mxu1 }
 0x1d7   : > { %v2252_v39 = vadd.f32 %v4802_v52, %v6461_v14  ;;  %5285 = vmatprep.mubr.msk.bf16.mxu0 %vm1755_vm0, %v950_v32  ;;  %v6684_v45 = vadd.f32 %v4911_v28, %v2249_v22  ;;  %v4914_v3 = vadd.f32 %v4913_v57, %v4912_v29 }
 0x1d9   : > { %v4803_v12 = vpop.f32.mrb[112].mxu0  ;;  %v6686_v48 = vadd.f32 %v4914_v3, %v2252_v39 }
 0x1da   : > { %v4804_v7 = vpop.f32.mrb[113].mxu0 }
 0x1db   : > { %v4805_v14 = vadd.f32 %v4804_v7, %v4803_v12  ;;  %v4806_v53 = vpop.f32.mrb[114].mxu0  ;;  %v4915_v54 = vpop.f32.mrb[112].mxu1 }
 0x1dc   : > { %v4807_v55 = vpop.f32.mrb[115].mxu0  ;;  %v4916_v20 = vpop.f32.mrb[113].mxu1 }
 0x1dd   : > { %v2257_v59 = vadd.f32 %v4805_v14, %v6471_v50  ;;  %v4808_v43 = vadd.f32 %v4807_v55, %v4806_v53  ;;  %v4917_v61 = vadd.f32 %v4916_v20, %v4915_v54  ;;  %v4918_v63 = vpop.f32.mrb[114].mxu1 }
 0x1de   : > { %5286 = vmatmul.mubr.msk.bf16.gmra.mrb[220].mxu0 %vm1755_vm0, %v963_v35  ;;  %v4919_v13 = vpop.f32.mrb[115].mxu1 }
 0x1df   : > { %v2260_v41 = vadd.f32 %v4808_v43, %v6475_v56  ;;  %v6691_v10 = vadd.f32 %v4917_v61, %v2257_v59  ;;  %v4920_v11 = vadd.f32 %v4919_v13, %v4918_v63 }
 0x1e1   : > { %v4809_v0 = vpop.f32.mrb[116].mxu0  ;;  %v6693_v47 = vadd.f32 %v4920_v11, %v2260_v41 }
 0x1e2   : > { %v4810_v32 = vpop.f32.mrb[117].mxu0 }
 0x1e3   : > { %v4811_v49 = vadd.f32 %v4810_v32, %v4809_v0  ;;  %v4812_v21 = vpop.f32.mrb[118].mxu0  ;;  %v4921_v22 = vpop.f32.mrb[116].mxu1 }
 0x1e4   : > { %v4813_v50 = vpop.f32.mrb[119].mxu0  ;;  %v4922_v28 = vpop.f32.mrb[117].mxu1 }
 0x1e5   : > { %v2265_v52 = vadd.f32 %v4811_v49, %v6485_v30  ;;  %v4814_v33 = vadd.f32 %v4813_v50, %v4812_v21  ;;  %v4923_v29 = vadd.f32 %v4922_v28, %v4921_v22  ;;  %v4924_v39 = vpop.f32.mrb[118].mxu1 }
 0x1e6   : > { %v4925_v57 = vpop.f32.mrb[119].mxu1 }
 0x1e7   : > { %v2268_v56 = vadd.f32 %v4814_v33, %v6489_v40  ;;  %v6700_v38 = vadd.f32 %v4923_v29, %v2265_v52  ;;  %v4926_v44 = vadd.f32 %v4925_v57, %v4924_v39  ;;  %v5547_v39 = vld [vmem:[%s7034_s3 + $0x38] sm:$0xff]  }
 0x1e8   : > { %5303 = vmatprep.subr.bf16.mxu1 %v5547_v39 }
 0x1e9   : > { %v4815_v3 = vpop.f32.mrb[120].mxu0  ;;  %v6702_v12 = vadd.f32 %v4926_v44, %v2268_v56  ;;  %5304 = vmatpush3.bf16.msra.mxu1 %v5547_v39 }
 0x1ea   : > { %v4816_v7 = vpop.f32.mrb[121].mxu0 }
 0x1eb   : > { %v4817_v30 = vadd.f32 %v4816_v7, %v4815_v3  ;;  %v4818_v35 = vpop.f32.mrb[122].mxu0  ;;  %v4927_v14 = vpop.f32.mrb[120].mxu1 }
 0x1ec   : > { %v4819_v53 = vpop.f32.mrb[123].mxu0  ;;  %v4928_v55 = vpop.f32.mrb[121].mxu1 }
 0x1ed   : > { %v2273_v40 = vadd.f32 %v4817_v30, %v6499_v18  ;;  %v4820_v54 = vadd.f32 %v4819_v53, %v4818_v35  ;;  %v4929_v59 = vadd.f32 %v4928_v55, %v4927_v14  ;;  %v4930_v43 = vpop.f32.mrb[122].mxu1 }
 0x1ee   : > { %v4931_v61 = vpop.f32.mrb[123].mxu1 }
 0x1ef   : > { %v2276_v20 = vadd.f32 %v4820_v54, %v6503_v24  ;;  %v6706_v63 = vadd.f32 %v4929_v59, %v2273_v40  ;;  %v4932_v41 = vadd.f32 %v4931_v61, %v4930_v43 }
 0x1f1   : > { %v4821_v13 = vpop.f32.mrb[124].mxu0  ;;  %v6708_v11 = vadd.f32 %v4932_v41, %v2276_v20 }
 0x1f2   : > { %v4822_v0 = vpop.f32.mrb[125].mxu0 }
 0x1f3   : > { %v4823_v32 = vadd.f32 %v4822_v0, %v4821_v13  ;;  %v4824_v49 = vpop.f32.mrb[126].mxu0  ;;  %v4933_v21 = vpop.f32.mrb[124].mxu1 }
 0x1f4   : > { %v4825_v22 = vpop.f32.mrb[127].mxu0  ;;  %v4934_v52 = vpop.f32.mrb[125].mxu1 }
 0x1f5   : > { %v2281_v18 = vadd.f32 %v4823_v32, %v6513_v1  ;;  %v4826_v50 = vadd.f32 %v4825_v22, %v4824_v49  ;;  %v4935_v33 = vadd.f32 %v4934_v52, %v4933_v21  ;;  %v4936_v28 = vpop.f32.mrb[126].mxu1 }
 0x1f6   : > { %v4937_v29 = vpop.f32.mrb[127].mxu1 }
 0x1f7   : > { %v2284_v24 = vadd.f32 %v4826_v50, %v6517_v16  ;;  %v6715_v56 = vadd.f32 %v4935_v33, %v2281_v18  ;;  %v4938_v57 = vadd.f32 %v4937_v29, %v4936_v28 }
 0x1f9   : > { %v4955_v2 = vpop.f32.mrb[128].mxu0  ;;  %v6717_v44 = vadd.f32 %v4938_v57, %v2284_v24 }
 0x1fa   : > { %v4956_v3 = vpop.f32.mrb[129].mxu0 }
 0x1fb   : > { %v4957_v1 = vadd.f32 %v4956_v3, %v4955_v2  ;;  %v4958_v7 = vpop.f32.mrb[130].mxu0  ;;  %v5067_v30 = vpop.f32.mrb[128].mxu1 }
 0x1fc   : > { %v4959_v35 = vpop.f32.mrb[131].mxu0  ;;  %v5068_v53 = vpop.f32.mrb[129].mxu1 }
 0x1fd   : > { %v2483_v16 = vadd.f32 %v4957_v1, %v6527_v58  ;;  %v4960_v14 = vadd.f32 %v4959_v35, %v4958_v7  ;;  %v5069_v40 = vadd.f32 %v5068_v53, %v5067_v30  ;;  %v5070_v54 = vpop.f32.mrb[130].mxu1 }
 0x1fe   : > { %v5071_v59 = vpop.f32.mrb[131].mxu1 }
 0x1ff   : > { %v2486_v55 = vadd.f32 %v4960_v14, %v6531_v62  ;;  %v5072_v43 = vadd.f32 %v5071_v59, %v5070_v54  ;;  %v6721_v20 = vadd.f32 %v5069_v40, %v2483_v16 }
 0x201   : > { %v4961_v61 = vpop.f32.mrb[132].mxu0  ;;  %v6723_v13 = vadd.f32 %v5072_v43, %v2486_v55 }
 0x202   : > { %v4962_v41 = vpop.f32.mrb[133].mxu0 }
 0x203   : > { %v4963_v0 = vadd.f32 %v4962_v41, %v4961_v61  ;;  %v4964_v32 = vpop.f32.mrb[134].mxu0  ;;  %v5073_v49 = vpop.f32.mrb[132].mxu1 }
 0x204   : > { %v4965_v21 = vpop.f32.mrb[135].mxu0  ;;  %v5074_v18 = vpop.f32.mrb[133].mxu1 }
 0x205   : > { %v2491_v58 = vadd.f32 %v4963_v0, %v6544_v46  ;;  %v4966_v22 = vadd.f32 %v4965_v21, %v4964_v32  ;;  %v5075_v50 = vadd.f32 %v5074_v18, %v5073_v49  ;;  %v5076_v52 = vpop.f32.mrb[134].mxu1 }
 0x206   : > { %v5077_v33 = vpop.f32.mrb[135].mxu1 }
 0x207   : > { %v2494_v62 = vadd.f32 %v4966_v22, %v6548_v42  ;;  %v5078_v28 = vadd.f32 %v5077_v33, %v5076_v52  ;;  %v6727_v24 = vadd.f32 %v5075_v50, %v2491_v58 }
 0x209   : > { %v4967_v29 = vpop.f32.mrb[136].mxu0  ;;  %v6729_v57 = vadd.f32 %v5078_v28, %v2494_v62 }
 0x20a   : > { %v4968_v39 = vpop.f32.mrb[137].mxu0 }
 0x20b   : > { %v4969_v2 = vadd.f32 %v4968_v39, %v4967_v29  ;;  %v4970_v3 = vpop.f32.mrb[138].mxu0  ;;  %v5079_v1 = vpop.f32.mrb[136].mxu1 }
 0x20c   : > { %v4971_v7 = vpop.f32.mrb[139].mxu0  ;;  %v5080_v35 = vpop.f32.mrb[137].mxu1 }
 0x20d   : > { %v2499_v46 = vadd.f32 %v4969_v2, %v6558_v36  ;;  %v4972_v30 = vadd.f32 %v4971_v7, %v4970_v3  ;;  %v5081_v16 = vadd.f32 %v5080_v35, %v5079_v1  ;;  %v5082_v14 = vpop.f32.mrb[138].mxu1 }
 0x20e   : > { %v5083_v53 = vpop.f32.mrb[139].mxu1 }
 0x20f   : > { %v2502_v42 = vadd.f32 %v4972_v30, %v6562_v25  ;;  %v5084_v40 = vadd.f32 %v5083_v53, %v5082_v14  ;;  %v6733_v54 = vadd.f32 %v5081_v16, %v2499_v46 }
 0x211   : > { %v4973_v55 = vpop.f32.mrb[140].mxu0  ;;  %v6735_v43 = vadd.f32 %v5084_v40, %v2502_v42 }
 0x212   : > { %v4974_v59 = vpop.f32.mrb[141].mxu0 }
 0x213   : > { %v4975_v61 = vadd.f32 %v4974_v59, %v4973_v55  ;;  %v4976_v41 = vpop.f32.mrb[142].mxu0  ;;  %v5085_v0 = vpop.f32.mrb[140].mxu1 }
 0x214   : > { %v4977_v32 = vpop.f32.mrb[143].mxu0  ;;  %v5086_v21 = vpop.f32.mrb[141].mxu1 }
 0x215   : > { %v2507_v36 = vadd.f32 %v4975_v61, %v6575_v23  ;;  %v4978_v49 = vadd.f32 %v4977_v32, %v4976_v41  ;;  %v5087_v58 = vadd.f32 %v5086_v21, %v5085_v0  ;;  %v5088_v22 = vpop.f32.mrb[142].mxu1 }
 0x216   : > { %v5089_v18 = vpop.f32.mrb[143].mxu1 }
 0x217   : > { %v2510_v25 = vadd.f32 %v4978_v49, %v6579_v34  ;;  %v5090_v50 = vadd.f32 %v5089_v18, %v5088_v22  ;;  %v6739_v52 = vadd.f32 %v5087_v58, %v2507_v36 }
 0x219   : > { %v4979_v62 = vpop.f32.mrb[144].mxu0  ;;  %v6741_v28 = vadd.f32 %v5090_v50, %v2510_v25 }
 0x21a   : > { %v4980_v33 = vpop.f32.mrb[145].mxu0 }
 0x21b   : > { %v4981_v29 = vadd.f32 %v4980_v33, %v4979_v62  ;;  %v4982_v39 = vpop.f32.mrb[146].mxu0  ;;  %v5091_v2 = vpop.f32.mrb[144].mxu1 }
 0x21c   : > { %v4983_v3 = vpop.f32.mrb[147].mxu0  ;;  %v5092_v7 = vpop.f32.mrb[145].mxu1 }
 0x21d   : > { %v2515_v23 = vadd.f32 %v4981_v29, %v6588_v9  ;;  %v4984_v1 = vadd.f32 %v4983_v3, %v4982_v39  ;;  %v5093_v46 = vadd.f32 %v5092_v7, %v5091_v2  ;;  %v5094_v30 = vpop.f32.mrb[146].mxu1 }
 0x21e   : > { %v5095_v35 = vpop.f32.mrb[147].mxu1 }
 0x21f   : > { %v2518_v34 = vadd.f32 %v4984_v1, %v6592_v19  ;;  %v5096_v16 = vadd.f32 %v5095_v35, %v5094_v30  ;;  %v6745_v14 = vadd.f32 %v5093_v46, %v2515_v23 }
 0x221   : > { %v4985_v42 = vpop.f32.mrb[148].mxu0  ;;  %v6747_v40 = vadd.f32 %v5096_v16, %v2518_v34 }
 0x222   : > { %v4986_v53 = vpop.f32.mrb[149].mxu0 }
 0x223   : > { %v4987_v55 = vadd.f32 %v4986_v53, %v4985_v42  ;;  %v4988_v59 = vpop.f32.mrb[150].mxu0  ;;  %v5097_v61 = vpop.f32.mrb[148].mxu1 }
 0x224   : > { %v4989_v41 = vpop.f32.mrb[151].mxu0  ;;  %v5098_v32 = vpop.f32.mrb[149].mxu1 }
 0x225   : > { %v2523_v9 = vadd.f32 %v4987_v55, %v6603_v51  ;;  %v4990_v0 = vadd.f32 %v4989_v41, %v4988_v59  ;;  %v5099_v36 = vadd.f32 %v5098_v32, %v5097_v61  ;;  %v5100_v49 = vpop.f32.mrb[150].mxu1 }
 0x226   : > { %v5101_v21 = vpop.f32.mrb[151].mxu1 }
 0x227   : > { %v2526_v19 = vadd.f32 %v4990_v0, %v6607_v8  ;;  %v5102_v58 = vadd.f32 %v5101_v21, %v5100_v49  ;;  %v6751_v22 = vadd.f32 %v5099_v36, %v2523_v9 }
 0x229   : > { %v4991_v25 = vpop.f32.mrb[152].mxu0  ;;  %v6753_v50 = vadd.f32 %v5102_v58, %v2526_v19 }
 0x22a   : > { %v4992_v18 = vpop.f32.mrb[153].mxu0 }
 0x22b   : > { %v4993_v62 = vadd.f32 %v4992_v18, %v4991_v25  ;;  %v4994_v33 = vpop.f32.mrb[154].mxu0  ;;  %v5103_v29 = vpop.f32.mrb[152].mxu1 }
 0x22c   : > { %v4995_v39 = vpop.f32.mrb[155].mxu0  ;;  %v5104_v3 = vpop.f32.mrb[153].mxu1 }
 0x22d   : > { %v2531_v51 = vadd.f32 %v4993_v62, %v6615_v26  ;;  %v4996_v2 = vadd.f32 %v4995_v39, %v4994_v33  ;;  %v5105_v23 = vadd.f32 %v5104_v3, %v5103_v29  ;;  %v5106_v1 = vpop.f32.mrb[154].mxu1 }
 0x22e   : > { %v5107_v7 = vpop.f32.mrb[155].mxu1 }
 0x22f   : > { %v2534_v8 = vadd.f32 %v4996_v2, %v6619_v4  ;;  %v5108_v46 = vadd.f32 %v5107_v7, %v5106_v1  ;;  %v6757_v30 = vadd.f32 %v5105_v23, %v2531_v51 }
 0x231   : > { %v4997_v34 = vpop.f32.mrb[156].mxu0  ;;  %v6759_v16 = vadd.f32 %v5108_v46, %v2534_v8  ;;  %v5550_v46 = vld [vmem:[%s7036_s5 + $0x10] sm:$0xff]  }
 0x232   : > { %v4998_v35 = vpop.f32.mrb[157].mxu0 }
 0x233   : > { %v4999_v42 = vadd.f32 %v4998_v35, %v4997_v34  ;;  %v5000_v53 = vpop.f32.mrb[158].mxu0  ;;  %v5109_v55 = vpop.f32.mrb[156].mxu1 }
 0x234   : > { %v5001_v59 = vpop.f32.mrb[159].mxu0  ;;  %v5110_v41 = vpop.f32.mrb[157].mxu1 }
 0x235   : > { %v2539_v26 = vadd.f32 %v4999_v42, %v6630_v5  ;;  %v5002_v61 = vadd.f32 %v5001_v59, %v5000_v53  ;;  %v5111_v9 = vadd.f32 %v5110_v41, %v5109_v55  ;;  %v5112_v0 = vpop.f32.mrb[158].mxu1  ;;  %v5548_v5 = vld [vmem:[%s7036_s5] sm:$0xff]  }
 0x236   : > { %v5113_v32 = vpop.f32.mrb[159].mxu1  ;;  %5337 = vmatprep.subr.bf16.mxu0 %v5548_v5 }
 0x237   : > { %v2542_v4 = vadd.f32 %v5002_v61, %v6634_v17  ;;  %v5114_v36 = vadd.f32 %v5113_v32, %v5112_v0  ;;  %v6763_v49 = vadd.f32 %v5111_v9, %v2539_v26  ;;  %v5549_v17 = vld [vmem:[%s7036_s5 + $0x8] sm:$0xff]   ;;  %5338 = vmatpush3.bf16.msra.mxu0 %v5548_v5 }
 0x238   : > { %5339 = vmatprep.subr.bf16.mxu0 %v5549_v17 }
 0x239   : > { %v5003_v19 = vpop.f32.mrb[160].mxu0  ;;  %v6765_v58 = vadd.f32 %v5114_v36, %v2542_v4 }
 0x23a   : > { %v5004_v21 = vpop.f32.mrb[161].mxu0 }
 0x23b   : > { %v5005_v25 = vadd.f32 %v5004_v21, %v5003_v19  ;;  %v5006_v18 = vpop.f32.mrb[162].mxu0  ;;  %v5115_v62 = vpop.f32.mrb[160].mxu1  ;;  %5340 = vmatpush3.bf16.msra.mxu0 %v5549_v17  ;;  %v5552_v21 = vld [vmem:[%s7036_s5 + $0x20] sm:$0xff]  }
 0x23c   : > { %v5007_v33 = vpop.f32.mrb[163].mxu0  ;;  %v5116_v51 = vpop.f32.mrb[161].mxu1  ;;  %5341 = vmatprep.subr.bf16.mxu0 %v5550_v46 }
 0x23d   : > { %v2547_v29 = vadd.f32 %v5005_v25, %v6642_v37  ;;  %v5008_v39 = vadd.f32 %v5007_v33, %v5006_v18  ;;  %v5117_v2 = vadd.f32 %v5116_v51, %v5115_v62  ;;  %v5118_v3 = vpop.f32.mrb[162].mxu1 }
 0x23e   : > { %v5119_v1 = vpop.f32.mrb[163].mxu1 }
 0x23f   : > { %v2550_v23 = vadd.f32 %v5008_v39, %v6646_v15  ;;  %v5120_v8 = vadd.f32 %v5119_v1, %v5118_v3  ;;  %v6775_v7 = vadd.f32 %v5117_v2, %v2547_v29  ;;  %v5551_v15 = vld [vmem:[%s7036_s5 + $0x18] sm:$0xff]   ;;  %5342 = vmatpush3.bf16.msra.mxu0 %v5550_v46 }
 0x240   : > { %5343 = vmatprep.subr.bf16.mxu0 %v5551_v15 }
 0x241   : > { %v5009_v34 = vpop.f32.mrb[164].mxu0  ;;  %v6780_v37 = vadd.f32 %v5120_v8, %v2550_v23 }
 0x242   : > { %v5010_v35 = vpop.f32.mrb[165].mxu0 }
 0x243   : > { %v5011_v42 = vadd.f32 %v5010_v35, %v5009_v34  ;;  %v5012_v53 = vpop.f32.mrb[166].mxu0  ;;  %v5121_v55 = vpop.f32.mrb[164].mxu1  ;;  %5344 = vmatpush3.bf16.msra.mxu0 %v5551_v15  ;;  %v5554_v34 = vld [vmem:[%s7036_s5 + $0x30] sm:$0xff]  }
 0x244   : > { %v5013_v59 = vpop.f32.mrb[167].mxu0  ;;  %v5122_v41 = vpop.f32.mrb[165].mxu1  ;;  %5345 = vmatprep.subr.bf16.mxu0 %v5552_v21 }
 0x245   : > { %v2555_v26 = vadd.f32 %v5011_v42, %v6657_v6  ;;  %v5014_v61 = vadd.f32 %v5013_v59, %v5012_v53  ;;  %v5123_v9 = vadd.f32 %v5122_v41, %v5121_v55  ;;  %v5124_v0 = vpop.f32.mrb[166].mxu1 }
 0x246   : > { %v5125_v32 = vpop.f32.mrb[167].mxu1 }
 0x247   : > { %v2558_v4 = vadd.f32 %v5014_v61, %v6661_v31  ;;  %v5126_v36 = vadd.f32 %v5125_v32, %v5124_v0  ;;  %v6787_v19 = vadd.f32 %v5123_v9, %v2555_v26  ;;  %v5553_v31 = vld [vmem:[%s7036_s5 + $0x28] sm:$0xff]   ;;  %5346 = vmatpush3.bf16.msra.mxu0 %v5552_v21 }
 0x248   : > { %5347 = vmatprep.subr.bf16.mxu0 %v5553_v31 }
 0x249   : > { %v5015_v25 = vpop.f32.mrb[168].mxu0  ;;  %v6792_v62 = vadd.f32 %v5126_v36, %v2558_v4 }
 0x24a   : > { %v5016_v18 = vpop.f32.mrb[169].mxu0 }
 0x24b   : > { %v5017_v6 = vadd.f32 %v5016_v18, %v5015_v25  ;;  %v5018_v33 = vpop.f32.mrb[170].mxu0  ;;  %v5127_v5 = vpop.f32.mrb[168].mxu1  ;;  %5348 = vmatpush3.bf16.msra.mxu0 %v5553_v31 }
 0x24c   : > { %v5019_v17 = vpop.f32.mrb[171].mxu0  ;;  %v5128_v51 = vpop.f32.mrb[169].mxu1  ;;  %5349 = vmatprep.subr.bf16.mxu0 %v5554_v34 }
 0x24d   : > { %v2563_v29 = vadd.f32 %v5017_v6, %v6669_v60  ;;  %v5020_v39 = vadd.f32 %v5019_v17, %v5018_v33  ;;  %v5129_v2 = vadd.f32 %v5128_v51, %v5127_v5  ;;  %v5130_v3 = vpop.f32.mrb[170].mxu1 }
 0x24e   : > { %v5131_v1 = vpop.f32.mrb[171].mxu1 }
 0x24f   : > { %v2566_v23 = vadd.f32 %v5020_v39, %v6673_v27  ;;  %v5132_v8 = vadd.f32 %v5131_v1, %v5130_v3  ;;  %v6799_v46 = vadd.f32 %v5129_v2, %v2563_v29  ;;  %5350 = vmatpush3.bf16.msra.mxu0 %v5554_v34 }
 0x251   : > { %v5021_v35 = vpop.f32.mrb[172].mxu0  ;;  %v6804_v53 = vadd.f32 %v5132_v8, %v2566_v23 }
 0x252   : > { %v5022_v42 = vpop.f32.mrb[173].mxu0 }
 0x253   : > { %v5023_v60 = vadd.f32 %v5022_v42, %v5021_v35  ;;  %v5024_v55 = vpop.f32.mrb[174].mxu0  ;;  %v5133_v59 = vpop.f32.mrb[172].mxu1 }
 0x254   : > { %v5025_v15 = vpop.f32.mrb[175].mxu0  ;;  %v5134_v61 = vpop.f32.mrb[173].mxu1 }
 0x255   : > { %v2571_v27 = vadd.f32 %v5023_v60, %v6684_v45  ;;  %v5026_v26 = vadd.f32 %v5025_v15, %v5024_v55  ;;  %v5135_v41 = vadd.f32 %v5134_v61, %v5133_v59  ;;  %v5136_v9 = vpop.f32.mrb[174].mxu1 }
 0x256   : > { %v5137_v4 = vpop.f32.mrb[175].mxu1 }
 0x257   : > { %v2574_v0 = vadd.f32 %v5026_v26, %v6686_v48  ;;  %v5138_v32 = vadd.f32 %v5137_v4, %v5136_v9  ;;  %v6808_v36 = vadd.f32 %v5135_v41, %v2571_v27 }
 0x259   : > { %v5027_v21 = vpop.f32.mrb[176].mxu0  ;;  %v6810_v18 = vadd.f32 %v5138_v32, %v2574_v0 }
 0x25a   : > { %v5028_v25 = vpop.f32.mrb[177].mxu0 }
 0x25b   : > { %v5029_v6 = vadd.f32 %v5028_v25, %v5027_v21  ;;  %v5030_v33 = vpop.f32.mrb[178].mxu0  ;;  %v5139_v5 = vpop.f32.mrb[176].mxu1 }
 0x25c   : > { %v5031_v17 = vpop.f32.mrb[179].mxu0  ;;  %v5140_v29 = vpop.f32.mrb[177].mxu1 }
 0x25d   : > { %v2579_v45 = vadd.f32 %v5029_v6, %v6691_v10  ;;  %v5032_v31 = vadd.f32 %v5031_v17, %v5030_v33  ;;  %v5141_v39 = vadd.f32 %v5140_v29, %v5139_v5  ;;  %v5142_v51 = vpop.f32.mrb[178].mxu1 }
 0x25e   : > { %v5143_v2 = vpop.f32.mrb[179].mxu1 }
 0x25f   : > { %v2582_v48 = vadd.f32 %v5032_v31, %v6693_v47  ;;  %v5144_v3 = vadd.f32 %v5143_v2, %v5142_v51  ;;  %v6814_v23 = vadd.f32 %v5141_v39, %v2579_v45 }
 0x261   : > { %v5033_v1 = vpop.f32.mrb[180].mxu0  ;;  %v6816_v34 = vadd.f32 %v5144_v3, %v2582_v48 }
 0x262   : > { %v5034_v8 = vpop.f32.mrb[181].mxu0 }
 0x263   : > { %v5035_v35 = vadd.f32 %v5034_v8, %v5033_v1  ;;  %v5036_v42 = vpop.f32.mrb[182].mxu0  ;;  %v5145_v60 = vpop.f32.mrb[180].mxu1 }
 0x264   : > { %v5037_v55 = vpop.f32.mrb[183].mxu0  ;;  %v5146_v15 = vpop.f32.mrb[181].mxu1 }
 0x265   : > { %v2587_v10 = vadd.f32 %v5035_v35, %v6700_v38  ;;  %v5038_v59 = vadd.f32 %v5037_v55, %v5036_v42  ;;  %v5147_v27 = vadd.f32 %v5146_v15, %v5145_v60  ;;  %v5148_v26 = vpop.f32.mrb[182].mxu1 }
 0x266   : > { %v5149_v61 = vpop.f32.mrb[183].mxu1 }
 0x267   : > { %v2590_v47 = vadd.f32 %v5038_v59, %v6702_v12  ;;  %v5150_v41 = vadd.f32 %v5149_v61, %v5148_v26  ;;  %v6820_v9 = vadd.f32 %v5147_v27, %v2587_v10 }
 0x269   : > { %v5039_v0 = vpop.f32.mrb[184].mxu0  ;;  %v6822_v32 = vadd.f32 %v5150_v41, %v2590_v47 }
 0x26a   : > { %v5040_v4 = vpop.f32.mrb[185].mxu0 }
 0x26b   : > { %v5041_v21 = vadd.f32 %v5040_v4, %v5039_v0  ;;  %v5042_v25 = vpop.f32.mrb[186].mxu0  ;;  %v5151_v6 = vpop.f32.mrb[184].mxu1 }
 0x26c   : > { %v5043_v33 = vpop.f32.mrb[187].mxu0  ;;  %v5152_v17 = vpop.f32.mrb[185].mxu1 }
 0x26d   : > { %v2595_v38 = vadd.f32 %v5041_v21, %v6706_v63  ;;  %v5044_v5 = vadd.f32 %v5043_v33, %v5042_v25  ;;  %v5153_v45 = vadd.f32 %v5152_v17, %v5151_v6  ;;  %v5154_v31 = vpop.f32.mrb[186].mxu1 }
 0x26e   : > { %v5155_v29 = vpop.f32.mrb[187].mxu1 }
 0x26f   : > { %v2598_v12 = vadd.f32 %v5044_v5, %v6708_v11  ;;  %v5156_v39 = vadd.f32 %v5155_v29, %v5154_v31  ;;  %v6826_v51 = vadd.f32 %v5153_v45, %v2595_v38 }
 0x271   : > { %v5045_v48 = vpop.f32.mrb[188].mxu0  ;;  %v6828_v3 = vadd.f32 %v5156_v39, %v2598_v12 }
 0x272   : > { %v5046_v2 = vpop.f32.mrb[189].mxu0 }
 0x273   : > { %v5047_v1 = vadd.f32 %v5046_v2, %v5045_v48  ;;  %v5048_v8 = vpop.f32.mrb[190].mxu0  ;;  %v5157_v35 = vpop.f32.mrb[188].mxu1 }
 0x274   : > { %v5049_v42 = vpop.f32.mrb[191].mxu0  ;;  %v5158_v55 = vpop.f32.mrb[189].mxu1 }
 0x275   : > { %v2603_v63 = vadd.f32 %v5047_v1, %v6715_v56  ;;  %v5050_v60 = vadd.f32 %v5049_v42, %v5048_v8  ;;  %v5159_v10 = vadd.f32 %v5158_v55, %v5157_v35  ;;  %v5160_v59 = vpop.f32.mrb[190].mxu1 }
 0x276   : > { %v5161_v15 = vpop.f32.mrb[191].mxu1 }
 0x277   : > { %v2606_v11 = vadd.f32 %v5050_v60, %v6717_v44  ;;  %v5162_v27 = vadd.f32 %v5161_v15, %v5160_v59  ;;  %v6832_v26 = vadd.f32 %v5159_v10, %v2603_v63 }
 0x279   : > { %v5259_v47 = vpop.f32.mrb[192].mxu0  ;;  %v6835_v0 = vadd.f32 %v5162_v27, %v2606_v11 }
 0x27a   : > { %v2813_v61 = vadd.f32 %v5259_v47, %v6727_v24  ;;  %v2804_v41 = vpop.f32.mrb[193].mxu0 }
 0x27b   : > { %v2805_v4 = vadd.f32 %v2804_v41, %v6721_v20  ;;  %v5260_v21 = vpop.f32.mrb[194].mxu0 }
 0x27c   : > { %v2816_v56 = vadd.f32 %v5260_v21, %v6729_v57  ;;  %v2807_v25 = vpop.f32.mrb[195].mxu0  ;;  %v2933_v33 = vmax.f32 %v2813_v61, 0.0 }
 0x27d   : > { %v2808_v6 = vadd.f32 %v2807_v25, %v6723_v13  ;;  %v2931_v38 = vmax.f32 %v2805_v4, 0.0 }
 0x27e   : > { %v2934_v44 = vmax.f32 %v2816_v56, 0.0 }
 0x27f   : > { %v2932_v5 = vmax.f32 %v2808_v6, 0.0 }
 0x280   : > { %v2964_v17 = vpack.c.bf16 %v2934_v44, %v2933_v33 }
 0x281   : > { %v2963_v45 = vpack.c.bf16 %v2932_v5, %v2931_v38  ;;  %v5263_v31 = vpop.f32.mrb[196].mxu0 }
 0x282   : > { %v2829_v24 = vadd.f32 %v5263_v31, %v6739_v52  ;;  %v2820_v12 = vpop.f32.mrb[197].mxu0 }
 0x283   : > { %v2821_v29 = vadd.f32 %v2820_v12, %v6733_v54  ;;  %v5264_v39 = vpop.f32.mrb[198].mxu0  ;;  %5305 = vmatprep.mubr.bf16.mxu1 %v2963_v45 }
 0x284   : > { %v2832_v20 = vadd.f32 %v5264_v39, %v6741_v28  ;;  %v2823_v57 = vpop.f32.mrb[199].mxu0  ;;  %5306 = vmatmul.mubr.bf16.vlgmr.msra.gmra.mrb[192].mxu1 %v2964_v17  ;;  %v2937_v48 = vmax.f32 %v2829_v24, 0.0 }
 0x285   : > { %v2824_v13 = vadd.f32 %v2823_v57, %v6735_v43  ;;  %v2935_v1 = vmax.f32 %v2821_v29, 0.0 }
 0x286   : > { %v2938_v2 = vmax.f32 %v2832_v20, 0.0 }
 0x287   : > { %v2936_v8 = vmax.f32 %v2824_v13, 0.0 }
 0x288   : > { %v2966_v35 = vpack.c.bf16 %v2938_v2, %v2937_v48 }
 0x289   : > { %v2965_v42 = vpack.c.bf16 %v2936_v8, %v2935_v1  ;;  %v5267_v63 = vpop.f32.mrb[200].mxu0 }
 0x28a   : > { %v2845_v52 = vadd.f32 %v5267_v63, %v6751_v22  ;;  %v2836_v60 = vpop.f32.mrb[201].mxu0 }
 0x28b   : > { %v2837_v54 = vadd.f32 %v2836_v60, %v6745_v14  ;;  %v5268_v55 = vpop.f32.mrb[202].mxu0  ;;  %5309 = vmatprep.mubr.bf16.mxu1 %v2965_v42 }
 0x28c   : > { %v2848_v28 = vadd.f32 %v5268_v55, %v6753_v50  ;;  %v2839_v10 = vpop.f32.mrb[203].mxu0  ;;  %5310 = vmatmul.mubr.bf16.gmra.mrb[196].mxu1 %v2966_v35  ;;  %v2941_v59 = vmax.f32 %v2845_v52, 0.0 }
 0x28d   : > { %v2840_v43 = vadd.f32 %v2839_v10, %v6747_v40  ;;  %v2939_v15 = vmax.f32 %v2837_v54, 0.0 }
 0x28e   : > { %v2942_v11 = vmax.f32 %v2848_v28, 0.0 }
 0x28f   : > { %v2940_v27 = vmax.f32 %v2840_v43, 0.0 }
 0x290   : > { %v2968_v47 = vpack.c.bf16 %v2942_v11, %v2941_v59 }
 0x291   : > { %v2967_v61 = vpack.c.bf16 %v2940_v27, %v2939_v15  ;;  %v5271_v41 = vpop.f32.mrb[204].mxu0 }
 0x292   : > { %v2861_v22 = vadd.f32 %v5271_v41, %v6763_v49  ;;  %v2852_v4 = vpop.f32.mrb[205].mxu0 }
 0x293   : > { %v2853_v14 = vadd.f32 %v2852_v4, %v6757_v30  ;;  %v5272_v21 = vpop.f32.mrb[206].mxu0  ;;  %5313 = vmatprep.mubr.bf16.mxu1 %v2967_v61 }
 0x294   : > { %v2864_v50 = vadd.f32 %v5272_v21, %v6765_v58  ;;  %v2855_v56 = vpop.f32.mrb[207].mxu0  ;;  %5314 = vmatmul.mubr.bf16.gmra.mrb[200].mxu1 %v2968_v47  ;;  %v2945_v25 = vmax.f32 %v2861_v22, 0.0 }
 0x295   : > { %v2856_v40 = vadd.f32 %v2855_v56, %v6759_v16  ;;  %v2943_v33 = vmax.f32 %v2853_v14, 0.0 }
 0x296   : > { %v2946_v6 = vmax.f32 %v2864_v50, 0.0 }
 0x297   : > { %v2944_v44 = vmax.f32 %v2856_v40, 0.0 }
 0x298   : > { %v2970_v38 = vpack.c.bf16 %v2946_v6, %v2945_v25 }
 0x299   : > { %v2969_v5 = vpack.c.bf16 %v2944_v44, %v2943_v33  ;;  %v5275_v17 = vpop.f32.mrb[208].mxu0  ;;  %v5559_v33 = vld [vmem:[%s7038_s7 + $0x18] sm:$0xff]   ;;  %v5560_v44 = vld [vmem:[%s7038_s7 + $0x20] sm:$0xff]  }
 0x29a   : > { %v2877_v49 = vadd.f32 %v5275_v17, %v6787_v19  ;;  %v2868_v45 = vpop.f32.mrb[209].mxu0  ;;  %v6895_v17 = vld [vmem:[%s7035_s4] ss:$0 sm:$0xff] }
 0x29b   : > { %v2869_v30 = vadd.f32 %v2868_v45, %v6775_v7  ;;  %v5276_v31 = vpop.f32.mrb[210].mxu0  ;;  %5317 = vmatprep.mubr.bf16.mxu1 %v2969_v5  ;;  %v5562_v5 = vld [vmem:[%s7038_s7 + $0x30] sm:$0xff]  }
 0x29c   : > { %v2880_v58 = vadd.f32 %v5276_v31, %v6792_v62  ;;  %v2871_v24 = vpop.f32.mrb[211].mxu0  ;;  %5318 = vmatmul.mubr.bf16.gmra.mrb[204].mxu1 %v2970_v38  ;;  %v2949_v12 = vmax.f32 %v2877_v49, 0.0  ;;  %v5561_v38 = vld [vmem:[%s7038_s7 + $0x28] sm:$0xff]  }
 0x29d   : > { %v2872_v16 = vadd.f32 %v2871_v24, %v6780_v37  ;;  %v2947_v39 = vmax.f32 %v2869_v30, 0.0 }
 0x29e   : > { %v2950_v29 = vmax.f32 %v2880_v58, 0.0 }
 0x29f   : > { %v2948_v20 = vmax.f32 %v2872_v16, 0.0 }
 0x2a0   : > { %v2972_v57 = vpack.c.bf16 %v2950_v29, %v2949_v12 }
 0x2a1   : > { %v2971_v13 = vpack.c.bf16 %v2948_v20, %v2947_v39  ;;  %v5279_v48 = vpop.f32.mrb[212].mxu0 }
 0x2a2   : > { %v2893_v19 = vadd.f32 %v5279_v48, %v6808_v36  ;;  %v2884_v2 = vpop.f32.mrb[213].mxu0 }
 0x2a3   : > { %v2885_v7 = vadd.f32 %v2884_v2, %v6799_v46  ;;  %v5280_v1 = vpop.f32.mrb[214].mxu0  ;;  %5321 = vmatprep.mubr.bf16.mxu1 %v2971_v13 }
 0x2a4   : > { %v2896_v62 = vadd.f32 %v5280_v1, %v6810_v18  ;;  %v2887_v8 = vpop.f32.mrb[215].mxu0  ;;  %5322 = vmatmul.mubr.bf16.gmra.mrb[208].mxu1 %v2972_v57  ;;  %v2953_v35 = vmax.f32 %v2893_v19, 0.0 }
 0x2a5   : > { %v2888_v37 = vadd.f32 %v2887_v8, %v6804_v53  ;;  %v2951_v63 = vmax.f32 %v2885_v7, 0.0 }
 0x2a6   : > { %v2954_v42 = vmax.f32 %v2896_v62, 0.0 }
 0x2a7   : > { %v2952_v52 = vmax.f32 %v2888_v37, 0.0 }
 0x2a8   : > { %v2974_v60 = vpack.c.bf16 %v2954_v42, %v2953_v35 }
 0x2a9   : > { %v2973_v54 = vpack.c.bf16 %v2952_v52, %v2951_v63  ;;  %v5283_v55 = vpop.f32.mrb[216].mxu0 }
 0x2aa   : > { %v2909_v36 = vadd.f32 %v5283_v55, %v6820_v9  ;;  %v2900_v28 = vpop.f32.mrb[217].mxu0 }
 0x2ab   : > { %v2901_v46 = vadd.f32 %v2900_v28, %v6814_v23  ;;  %v5284_v10 = vpop.f32.mrb[218].mxu0  ;;  %5325 = vmatprep.mubr.bf16.mxu1 %v2973_v54 }
 0x2ac   : > { %v2912_v18 = vadd.f32 %v5284_v10, %v6822_v32  ;;  %v2903_v43 = vpop.f32.mrb[219].mxu0  ;;  %5326 = vmatmul.mubr.bf16.gmra.mrb[212].mxu1 %v2974_v60  ;;  %v2957_v59 = vmax.f32 %v2909_v36, 0.0 }
 0x2ad   : > { %v2904_v53 = vadd.f32 %v2903_v43, %v6816_v34  ;;  %v2955_v15 = vmax.f32 %v2901_v46, 0.0 }
 0x2ae   : > { %v2958_v11 = vmax.f32 %v2912_v18, 0.0 }
 0x2af   : > { %v2956_v27 = vmax.f32 %v2904_v53, 0.0 }
 0x2b0   : > { %v2976_v47 = vpack.c.bf16 %v2958_v11, %v2957_v59 }
 0x2b1   : > { %v2975_v61 = vpack.c.bf16 %v2956_v27, %v2955_v15  ;;  %v5287_v41 = vpop.f32.mrb[220].mxu0 }
 0x2b2   : > { %v2925_v9 = vadd.f32 %v5287_v41, %v6832_v26  ;;  %v2916_v22 = vpop.f32.mrb[221].mxu0  ;;  %v5556_v26 = vld [vmem:[%s7038_s7] sm:$0xff]  }
 0x2b3   : > { %v2917_v23 = vadd.f32 %v2916_v22, %v6826_v51  ;;  %v5288_v4 = vpop.f32.mrb[222].mxu0  ;;  %5329 = vmatprep.mubr.bf16.mxu1 %v2975_v61  ;;  %v5555_v51 = vld [vmem:[%s7036_s5 + $0x38] sm:$0xff]   ;;  %5385 = vmatprep.subr.bf16.mxu1 %v5556_v26 }
 0x2b4   : > { %v2928_v32 = vadd.f32 %v5288_v4, %v6835_v0  ;;  %v2919_v14 = vpop.f32.mrb[223].mxu0  ;;  %5330 = vmatmul.mubr.bf16.gmra.mrb[216].mxu1 %v2976_v47  ;;  %v2961_v21 = vmax.f32 %v2925_v9, 0.0  ;;  %5351 = vmatprep.subr.bf16.mxu0 %v5555_v51  ;;  %v5558_v0 = vld [vmem:[%s7038_s7 + $0x10] sm:$0xff]  }
 0x2b5   : > { %v2920_v34 = vadd.f32 %v2919_v14, %v6828_v3  ;;  %v2959_v56 = vmax.f32 %v2917_v23, 0.0  ;;  %5352 = vmatpush3.bf16.msra.mxu0 %v5555_v51  ;;  %v5557_v3 = vld [vmem:[%s7038_s7 + $0x8] sm:$0xff]   ;;  %5386 = vmatpush3.bf16.msra.mxu1 %v5556_v26 }
 0x2b6   : > { %v2962_v50 = vmax.f32 %v2928_v32, 0.0  ;;  %5387 = vmatprep.subr.bf16.mxu1 %v5557_v3 }
 0x2b7   : > { %v2960_v40 = vmax.f32 %v2920_v34, 0.0 }
 0x2b8   : > { %v2978_v25 = vpack.c.bf16 %v2962_v50, %v2961_v21 }
 0x2b9   : > { %v2977_v6 = vpack.c.bf16 %v2960_v40, %v2959_v56  ;;  %5388 = vmatpush3.bf16.msra.mxu1 %v5557_v3 }
 0x2ba   : > { %5389 = vmatprep.subr.bf16.mxu1 %v5558_v0 }
 0x2bb   : > { %5333 = vmatprep.mubr.bf16.mxu1 %v2977_v6 }
 0x2bc   : > { %5334 = vmatmul.mubr.bf16.gmra.mrb[220].mxu1 %v2978_v25 }
 0x2bd   : > { %5390 = vmatpush3.bf16.msra.mxu1 %v5558_v0 }
 0x2be   : > { %5391 = vmatprep.subr.bf16.mxu1 %v5559_v33 }
 0x2c1   : > { %5392 = vmatpush3.bf16.msra.mxu1 %v5559_v33 }
 0x2c2   : > { %5393 = vmatprep.subr.bf16.mxu1 %v5560_v44 }
 0x2c5   : > { %5394 = vmatpush3.bf16.msra.mxu1 %v5560_v44 }
 0x2c6   : > { %5395 = vmatprep.subr.bf16.mxu1 %v5561_v38 }
 0x2c9   : > { %5396 = vmatpush3.bf16.msra.mxu1 %v5561_v38 }
 0x2ca   : > { %5397 = vmatprep.subr.bf16.mxu1 %v5562_v5 }
 0x2cd   : > { %5398 = vmatpush3.bf16.msra.mxu1 %v5562_v5 }
 0x357   : > { %v5307_v49 = vpop.f32.mrb[192].mxu1 }
 0x358   : > { %v3093_v45 = vadd.f32 %v5307_v49, %v6895_v17  ;;  %v3084_v30 = vpop.f32.mrb[193].mxu1 }
 0x359   : > { %v3085_v31 = vadd.f32 %v6895_v17, %v3084_v30  ;;  %v5308_v58 = vpop.f32.mrb[194].mxu1 }
 0x35a   : > { %v3096_v24 = vadd.f32 %v5308_v58, %v6895_v17  ;;  %v3087_v16 = vpop.f32.mrb[195].mxu1  ;;  %v3213_v29 = vmax.f32 %v3093_v45, 0.0 }
 0x35b   : > { %v3088_v12 = vadd.f32 %v6895_v17, %v3087_v16  ;;  %v3211_v20 = vmax.f32 %v3085_v31, 0.0 }
 0x35c   : > { %v3214_v39 = vmax.f32 %v3096_v24, 0.0 }
 0x35d   : > { %v3212_v57 = vmax.f32 %v3088_v12, 0.0 }
 0x35e   : > { %v3244_v13 = vpack.c.bf16 %v3214_v39, %v3213_v29 }
 0x35f   : > { %v3243_v48 = vpack.c.bf16 %v3212_v57, %v3211_v20  ;;  %v5311_v19 = vpop.f32.mrb[196].mxu1 }
 0x360   : > { %v3109_v2 = vadd.f32 %v5311_v19, %v6895_v17  ;;  %v3100_v7 = vpop.f32.mrb[197].mxu1 }
 0x361   : > { %v3101_v1 = vadd.f32 %v6895_v17, %v3100_v7  ;;  %v5312_v62 = vpop.f32.mrb[198].mxu1  ;;  %5353 = vmatprep.mubr.bf16.mxu0 %v3243_v48 }
 0x362   : > { %v3112_v8 = vadd.f32 %v5312_v62, %v6895_v17  ;;  %v3103_v37 = vpop.f32.mrb[199].mxu1  ;;  %5354 = vmatmul.mubr.bf16.vlgmr.msra.gmra.mrb[224].mxu0 %v3244_v13  ;;  %v3217_v42 = vmax.f32 %v3109_v2, 0.0 }
 0x363   : > { %v3104_v35 = vadd.f32 %v6895_v17, %v3103_v37  ;;  %v3215_v52 = vmax.f32 %v3101_v1, 0.0 }
 0x364   : > { %v3218_v63 = vmax.f32 %v3112_v8, 0.0 }
 0x365   : > { %v3216_v60 = vmax.f32 %v3104_v35, 0.0 }
 0x366   : > { %v3246_v54 = vpack.c.bf16 %v3218_v63, %v3217_v42 }
 0x367   : > { %v3245_v55 = vpack.c.bf16 %v3216_v60, %v3215_v52  ;;  %v5315_v36 = vpop.f32.mrb[200].mxu1 }
 0x368   : > { %v3125_v28 = vadd.f32 %v5315_v36, %v6895_v17  ;;  %v3116_v46 = vpop.f32.mrb[201].mxu1 }
 0x369   : > { %v3117_v10 = vadd.f32 %v6895_v17, %v3116_v46  ;;  %v5316_v18 = vpop.f32.mrb[202].mxu1  ;;  %5357 = vmatprep.mubr.bf16.mxu0 %v3245_v55 }
 0x36a   : > { %v3128_v43 = vadd.f32 %v5316_v18, %v6895_v17  ;;  %v3119_v53 = vpop.f32.mrb[203].mxu1  ;;  %5358 = vmatmul.mubr.bf16.gmra.mrb[228].mxu0 %v3246_v54  ;;  %v3221_v11 = vmax.f32 %v3125_v28, 0.0 }
 0x36b   : > { %v3120_v59 = vadd.f32 %v6895_v17, %v3119_v53  ;;  %v3219_v27 = vmax.f32 %v3117_v10, 0.0 }
 0x36c   : > { %v3222_v15 = vmax.f32 %v3128_v43, 0.0 }
 0x36d   : > { %v3220_v47 = vmax.f32 %v3120_v59, 0.0 }
 0x36e   : > { %v3248_v61 = vpack.c.bf16 %v3222_v15, %v3221_v11 }
 0x36f   : > { %v3247_v41 = vpack.c.bf16 %v3220_v47, %v3219_v27  ;;  %v5319_v9 = vpop.f32.mrb[204].mxu1 }
 0x370   : > { %v3141_v22 = vadd.f32 %v5319_v9, %v6895_v17  ;;  %v3132_v23 = vpop.f32.mrb[205].mxu1 }
 0x371   : > { %v3133_v4 = vadd.f32 %v6895_v17, %v3132_v23  ;;  %v5320_v32 = vpop.f32.mrb[206].mxu1  ;;  %5361 = vmatprep.mubr.bf16.mxu0 %v3247_v41 }
 0x372   : > { %v3144_v14 = vadd.f32 %v5320_v32, %v6895_v17  ;;  %v3135_v34 = vpop.f32.mrb[207].mxu1  ;;  %5362 = vmatmul.mubr.bf16.gmra.mrb[232].mxu0 %v3248_v61  ;;  %v3225_v50 = vmax.f32 %v3141_v22, 0.0 }
 0x373   : > { %v3136_v21 = vadd.f32 %v6895_v17, %v3135_v34  ;;  %v3223_v40 = vmax.f32 %v3133_v4, 0.0 }
 0x374   : > { %v3226_v56 = vmax.f32 %v3144_v14, 0.0 }
 0x375   : > { %v3224_v25 = vmax.f32 %v3136_v21, 0.0  ;;  %v5563_v21 = vld [vmem:[%s7038_s7 + $0x38] sm:$0xff]  }
 0x376   : > { %v3250_v6 = vpack.c.bf16 %v3226_v56, %v3225_v50  ;;  %5399 = vmatprep.subr.bf16.mxu1 %v5563_v21  ;;  %v6935_v50 = vld [vmem:[%s7037_s6] ss:$0 sm:$0xff] }
 0x377   : > { %v3249_v51 = vpack.c.bf16 %v3224_v25, %v3223_v40  ;;  %v5323_v26 = vpop.f32.mrb[208].mxu1  ;;  %5400 = vmatpush3.bf16.msra.mxu1 %v5563_v21 }
 0x378   : > { %v3157_v3 = vadd.f32 %v5323_v26, %v6895_v17  ;;  %v3148_v0 = vpop.f32.mrb[209].mxu1 }
 0x379   : > { %v3149_v33 = vadd.f32 %v6895_v17, %v3148_v0  ;;  %v5324_v44 = vpop.f32.mrb[210].mxu1  ;;  %5365 = vmatprep.mubr.bf16.mxu0 %v3249_v51 }
 0x37a   : > { %v3160_v38 = vadd.f32 %v5324_v44, %v6895_v17  ;;  %v3151_v5 = vpop.f32.mrb[211].mxu1  ;;  %5366 = vmatmul.mubr.bf16.gmra.mrb[236].mxu0 %v3250_v6  ;;  %v3229_v45 = vmax.f32 %v3157_v3, 0.0 }
 0x37b   : > { %v3152_v49 = vadd.f32 %v6895_v17, %v3151_v5  ;;  %v3227_v31 = vmax.f32 %v3149_v33, 0.0 }
 0x37c   : > { %v3230_v30 = vmax.f32 %v3160_v38, 0.0 }
 0x37d   : > { %v3228_v58 = vmax.f32 %v3152_v49, 0.0 }
 0x37e   : > { %v3252_v24 = vpack.c.bf16 %v3230_v30, %v3229_v45 }
 0x37f   : > { %v3251_v16 = vpack.c.bf16 %v3228_v58, %v3227_v31  ;;  %v5327_v12 = vpop.f32.mrb[212].mxu1 }
 0x380   : > { %v3173_v29 = vadd.f32 %v5327_v12, %v6895_v17  ;;  %v3164_v39 = vpop.f32.mrb[213].mxu1 }
 0x381   : > { %v3165_v20 = vadd.f32 %v6895_v17, %v3164_v39  ;;  %v5328_v57 = vpop.f32.mrb[214].mxu1  ;;  %5369 = vmatprep.mubr.bf16.mxu0 %v3251_v16 }
 0x382   : > { %v3176_v13 = vadd.f32 %v5328_v57, %v6895_v17  ;;  %v3167_v48 = vpop.f32.mrb[215].mxu1  ;;  %5370 = vmatmul.mubr.bf16.gmra.mrb[240].mxu0 %v3252_v24  ;;  %v3233_v2 = vmax.f32 %v3173_v29, 0.0 }
 0x383   : > { %v3168_v19 = vadd.f32 %v6895_v17, %v3167_v48  ;;  %v3231_v1 = vmax.f32 %v3165_v20, 0.0 }
 0x384   : > { %v3234_v7 = vmax.f32 %v3176_v13, 0.0 }
 0x385   : > { %v3232_v62 = vmax.f32 %v3168_v19, 0.0 }
 0x386   : > { %v3254_v8 = vpack.c.bf16 %v3234_v7, %v3233_v2 }
 0x387   : > { %v3253_v37 = vpack.c.bf16 %v3232_v62, %v3231_v1  ;;  %v5331_v35 = vpop.f32.mrb[216].mxu1 }
 0x388   : > { %v3189_v42 = vadd.f32 %v5331_v35, %v6895_v17  ;;  %v3180_v63 = vpop.f32.mrb[217].mxu1 }
 0x389   : > { %v3181_v52 = vadd.f32 %v6895_v17, %v3180_v63  ;;  %v5332_v60 = vpop.f32.mrb[218].mxu1  ;;  %5373 = vmatprep.mubr.bf16.mxu0 %v3253_v37 }
 0x38a   : > { %v3192_v54 = vadd.f32 %v5332_v60, %v6895_v17  ;;  %v3183_v55 = vpop.f32.mrb[219].mxu1  ;;  %5374 = vmatmul.mubr.bf16.gmra.mrb[244].mxu0 %v3254_v8  ;;  %v3237_v28 = vmax.f32 %v3189_v42, 0.0 }
 0x38b   : > { %v3184_v36 = vadd.f32 %v6895_v17, %v3183_v55  ;;  %v3235_v10 = vmax.f32 %v3181_v52, 0.0 }
 0x38c   : > { %v3238_v46 = vmax.f32 %v3192_v54, 0.0 }
 0x38d   : > { %v3236_v18 = vmax.f32 %v3184_v36, 0.0 }
 0x38e   : > { %v3256_v43 = vpack.c.bf16 %v3238_v46, %v3237_v28 }
 0x38f   : > { %v3255_v53 = vpack.c.bf16 %v3236_v18, %v3235_v10  ;;  %v5335_v59 = vpop.f32.mrb[220].mxu1 }
 0x390   : > { %v3205_v11 = vadd.f32 %v5335_v59, %v6895_v17  ;;  %v3196_v15 = vpop.f32.mrb[221].mxu1 }
 0x391   : > { %v3197_v27 = vadd.f32 %v6895_v17, %v3196_v15  ;;  %v5336_v47 = vpop.f32.mrb[222].mxu1  ;;  %5377 = vmatprep.mubr.bf16.mxu0 %v3255_v53 }
 0x392   : > { %v3208_v61 = vadd.f32 %v5336_v47, %v6895_v17  ;;  %v3199_v41 = vpop.f32.mrb[223].mxu1  ;;  %5378 = vmatmul.mubr.bf16.gmra.mrb[248].mxu0 %v3256_v43  ;;  %v3241_v22 = vmax.f32 %v3205_v11, 0.0 }
 0x393   : > { %v3200_v9 = vadd.f32 %v6895_v17, %v3199_v41  ;;  %v3239_v4 = vmax.f32 %v3197_v27, 0.0 }
 0x394   : > { %v3242_v23 = vmax.f32 %v3208_v61, 0.0 }
 0x395   : > { %v3240_v32 = vmax.f32 %v3200_v9, 0.0 }
 0x396   : > { %v3258_v14 = vpack.c.bf16 %v3242_v23, %v3241_v22 }
 0x397   : > { %v3257_v34 = vpack.c.bf16 %v3240_v32, %v3239_v4 }
 0x399   : > { %5381 = vmatprep.mubr.bf16.mxu0 %v3257_v34 }
 0x39a   : > { %5382 = vmatmul.mubr.bf16.gmra.mrb[252].mxu0 %v3258_v14 }
 0x435   : > { %v5355_v17 = vpop.f32.mrb[224].mxu0 }
 0x436   : > { %v3373_v56 = vadd.f32 %v5355_v17, %v6935_v50  ;;  %v3364_v40 = vpop.f32.mrb[225].mxu0 }
 0x437   : > { %v3365_v25 = vadd.f32 %v6935_v50, %v3364_v40  ;;  %v5356_v6 = vpop.f32.mrb[226].mxu0 }
 0x438   : > { %v3376_v51 = vadd.f32 %v5356_v6, %v6935_v50  ;;  %v3367_v26 = vpop.f32.mrb[227].mxu0  ;;  %v3493_v0 = vmax.f32 %v3373_v56, 0.0 }
 0x439   : > { %v3368_v3 = vadd.f32 %v6935_v50, %v3367_v26  ;;  %v3491_v44 = vmax.f32 %v3365_v25, 0.0 }
 0x43a   : > { %v3494_v33 = vmax.f32 %v3376_v51, 0.0 }
 0x43b   : > { %v3492_v38 = vmax.f32 %v3368_v3, 0.0 }
 0x43c   : > { %v3524_v5 = vpack.c.bf16 %v3494_v33, %v3493_v0 }
 0x43d   : > { %v3523_v49 = vpack.c.bf16 %v3492_v38, %v3491_v44  ;;  %v5359_v45 = vpop.f32.mrb[228].mxu0 }
 0x43e   : > { %v3389_v30 = vadd.f32 %v5359_v45, %v6935_v50  ;;  %v3380_v31 = vpop.f32.mrb[229].mxu0 }
 0x43f   : > { %v3381_v58 = vadd.f32 %v6935_v50, %v3380_v31  ;;  %v5360_v24 = vpop.f32.mrb[230].mxu0  ;;  %5401 = vmatprep.mubr.bf16.mxu1 %v3523_v49 }
 0x440   : > { %v3392_v16 = vadd.f32 %v5360_v24, %v6935_v50  ;;  %v3383_v12 = vpop.f32.mrb[231].mxu0  ;;  %5402 = vmatmul.mubr.bf16.vlgmr.msra.gmra.mrb[224].mxu1 %v3524_v5  ;;  %v3497_v39 = vmax.f32 %v3389_v30, 0.0 }
 0x441   : > { %v3384_v29 = vadd.f32 %v6935_v50, %v3383_v12  ;;  %v3495_v57 = vmax.f32 %v3381_v58, 0.0 }
 0x442   : > { %v3498_v20 = vmax.f32 %v3392_v16, 0.0 }
 0x443   : > { %v3496_v13 = vmax.f32 %v3384_v29, 0.0 }
 0x444   : > { %v3526_v48 = vpack.c.bf16 %v3498_v20, %v3497_v39 }
 0x445   : > { %v3525_v19 = vpack.c.bf16 %v3496_v13, %v3495_v57  ;;  %v5363_v2 = vpop.f32.mrb[232].mxu0 }
 0x446   : > { %v3405_v7 = vadd.f32 %v5363_v2, %v6935_v50  ;;  %v3396_v1 = vpop.f32.mrb[233].mxu0 }
 0x447   : > { %v3397_v62 = vadd.f32 %v6935_v50, %v3396_v1  ;;  %v5364_v8 = vpop.f32.mrb[234].mxu0  ;;  %5405 = vmatprep.mubr.bf16.mxu1 %v3525_v19 }
 0x448   : > { %v3408_v37 = vadd.f32 %v5364_v8, %v6935_v50  ;;  %v3399_v35 = vpop.f32.mrb[235].mxu0  ;;  %5406 = vmatmul.mubr.bf16.gmra.mrb[228].mxu1 %v3526_v48  ;;  %v3501_v63 = vmax.f32 %v3405_v7, 0.0 }
 0x449   : > { %v3400_v42 = vadd.f32 %v6935_v50, %v3399_v35  ;;  %v3499_v60 = vmax.f32 %v3397_v62, 0.0 }
 0x44a   : > { %v3502_v52 = vmax.f32 %v3408_v37, 0.0 }
 0x44b   : > { %v3500_v54 = vmax.f32 %v3400_v42, 0.0 }
 0x44c   : > { %v3528_v55 = vpack.c.bf16 %v3502_v52, %v3501_v63 }
 0x44d   : > { %v3527_v36 = vpack.c.bf16 %v3500_v54, %v3499_v60  ;;  %v5367_v28 = vpop.f32.mrb[236].mxu0 }
 0x44e   : > { %v3421_v46 = vadd.f32 %v5367_v28, %v6935_v50  ;;  %v3412_v10 = vpop.f32.mrb[237].mxu0 }
 0x44f   : > { %v3413_v18 = vadd.f32 %v6935_v50, %v3412_v10  ;;  %v5368_v43 = vpop.f32.mrb[238].mxu0  ;;  %5409 = vmatprep.mubr.bf16.mxu1 %v3527_v36 }
 0x450   : > { %v3424_v53 = vadd.f32 %v5368_v43, %v6935_v50  ;;  %v3415_v59 = vpop.f32.mrb[239].mxu0  ;;  %5410 = vmatmul.mubr.bf16.gmra.mrb[232].mxu1 %v3528_v55  ;;  %v3505_v15 = vmax.f32 %v3421_v46, 0.0 }
 0x451   : > { %v3416_v11 = vadd.f32 %v6935_v50, %v3415_v59  ;;  %v3503_v47 = vmax.f32 %v3413_v18, 0.0 }
 0x452   : > { %v3506_v27 = vmax.f32 %v3424_v53, 0.0 }
 0x453   : > { %v3504_v61 = vmax.f32 %v3416_v11, 0.0  ;;  %v6972_v11 = vld [vmem:[%s7039_s8] ss:$0 sm:$0xff] }
 0x454   : > { %v3530_v41 = vpack.c.bf16 %v3506_v27, %v3505_v15 }
 0x455   : > { %v3529_v9 = vpack.c.bf16 %v3504_v61, %v3503_v47  ;;  %v5371_v22 = vpop.f32.mrb[240].mxu0 }
 0x456   : > { %v3437_v23 = vadd.f32 %v5371_v22, %v6935_v50  ;;  %v3428_v4 = vpop.f32.mrb[241].mxu0 }
 0x457   : > { %v3429_v32 = vadd.f32 %v6935_v50, %v3428_v4  ;;  %v5372_v14 = vpop.f32.mrb[242].mxu0  ;;  %5413 = vmatprep.mubr.bf16.mxu1 %v3529_v9 }
 0x458   : > { %v3440_v34 = vadd.f32 %v5372_v14, %v6935_v50  ;;  %v3431_v21 = vpop.f32.mrb[243].mxu0  ;;  %5414 = vmatmul.mubr.bf16.gmra.mrb[236].mxu1 %v3530_v41  ;;  %v3509_v56 = vmax.f32 %v3437_v23, 0.0 }
 0x459   : > { %v3432_v17 = vadd.f32 %v6935_v50, %v3431_v21  ;;  %v3507_v25 = vmax.f32 %v3429_v32, 0.0 }
 0x45a   : > { %v3510_v40 = vmax.f32 %v3440_v34, 0.0 }
 0x45b   : > { %v3508_v6 = vmax.f32 %v3432_v17, 0.0 }
 0x45c   : > { %v3532_v51 = vpack.c.bf16 %v3510_v40, %v3509_v56 }
 0x45d   : > { %v3531_v26 = vpack.c.bf16 %v3508_v6, %v3507_v25  ;;  %v5375_v3 = vpop.f32.mrb[244].mxu0 }
 0x45e   : > { %v3453_v0 = vadd.f32 %v5375_v3, %v6935_v50  ;;  %v3444_v33 = vpop.f32.mrb[245].mxu0 }
 0x45f   : > { %v3445_v44 = vadd.f32 %v6935_v50, %v3444_v33  ;;  %v5376_v38 = vpop.f32.mrb[246].mxu0  ;;  %5417 = vmatprep.mubr.bf16.mxu1 %v3531_v26 }
 0x460   : > { %v3456_v5 = vadd.f32 %v5376_v38, %v6935_v50  ;;  %v3447_v49 = vpop.f32.mrb[247].mxu0  ;;  %5418 = vmatmul.mubr.bf16.gmra.mrb[240].mxu1 %v3532_v51  ;;  %v3513_v30 = vmax.f32 %v3453_v0, 0.0 }
 0x461   : > { %v3448_v45 = vadd.f32 %v6935_v50, %v3447_v49  ;;  %v3511_v58 = vmax.f32 %v3445_v44, 0.0 }
 0x462   : > { %v3514_v31 = vmax.f32 %v3456_v5, 0.0 }
 0x463   : > { %v3512_v24 = vmax.f32 %v3448_v45, 0.0 }
 0x464   : > { %v3534_v16 = vpack.c.bf16 %v3514_v31, %v3513_v30 }
 0x465   : > { %v3533_v12 = vpack.c.bf16 %v3512_v24, %v3511_v58  ;;  %v5379_v29 = vpop.f32.mrb[248].mxu0 }
 0x466   : > { %v3469_v39 = vadd.f32 %v5379_v29, %v6935_v50  ;;  %v3460_v20 = vpop.f32.mrb[249].mxu0 }
 0x467   : > { %v3461_v57 = vadd.f32 %v6935_v50, %v3460_v20  ;;  %v5380_v13 = vpop.f32.mrb[250].mxu0  ;;  %5421 = vmatprep.mubr.bf16.mxu1 %v3533_v12 }
 0x468   : > { %v3472_v48 = vadd.f32 %v5380_v13, %v6935_v50  ;;  %v3463_v19 = vpop.f32.mrb[251].mxu0  ;;  %5422 = vmatmul.mubr.bf16.gmra.mrb[244].mxu1 %v3534_v16  ;;  %v3517_v7 = vmax.f32 %v3469_v39, 0.0 }
 0x469   : > { %v3464_v2 = vadd.f32 %v6935_v50, %v3463_v19  ;;  %v3515_v62 = vmax.f32 %v3461_v57, 0.0 }
 0x46a   : > { %v3518_v1 = vmax.f32 %v3472_v48, 0.0 }
 0x46b   : > { %v3516_v8 = vmax.f32 %v3464_v2, 0.0 }
 0x46c   : > { %v3536_v37 = vpack.c.bf16 %v3518_v1, %v3517_v7 }
 0x46d   : > { %v3535_v35 = vpack.c.bf16 %v3516_v8, %v3515_v62  ;;  %v5383_v42 = vpop.f32.mrb[252].mxu0 }
 0x46e   : > { %v3485_v63 = vadd.f32 %v5383_v42, %v6935_v50  ;;  %v3476_v52 = vpop.f32.mrb[253].mxu0 }
 0x46f   : > { %v3477_v60 = vadd.f32 %v6935_v50, %v3476_v52  ;;  %v5384_v54 = vpop.f32.mrb[254].mxu0  ;;  %5425 = vmatprep.mubr.bf16.mxu1 %v3535_v35 }
 0x470   : > { %v3488_v55 = vadd.f32 %v5384_v54, %v6935_v50  ;;  %v3479_v36 = vpop.f32.mrb[255].mxu0  ;;  %5426 = vmatmul.mubr.bf16.gmra.mrb[248].mxu1 %v3536_v37  ;;  %v3521_v46 = vmax.f32 %v3485_v63, 0.0 }
 0x471   : > { %v3480_v28 = vadd.f32 %v6935_v50, %v3479_v36  ;;  %v3519_v18 = vmax.f32 %v3477_v60, 0.0 }
 0x472   : > { %v3522_v10 = vmax.f32 %v3488_v55, 0.0 }
 0x473   : > { %v3520_v43 = vmax.f32 %v3480_v28, 0.0 }
 0x474   : > { %v3538_v53 = vpack.c.bf16 %v3522_v10, %v3521_v46 }
 0x475   : > { %v3537_v59 = vpack.c.bf16 %v3520_v43, %v3519_v18 }
 0x477   : > { %5429 = vmatprep.mubr.bf16.mxu1 %v3537_v59 }
 0x478   : > { %5430 = vmatmul.mubr.bf16.gmra.mrb[252].mxu1 %v3538_v53 }
 0x513   : > { %v5403_v15 = vpop.f32.mrb[224].mxu1 }
 0x514   : > { %v3653_v27 = vadd.f32 %v5403_v15, %v6972_v11  ;;  %v3644_v47 = vpop.f32.mrb[225].mxu1 }
 0x515   : > { %v3645_v61 = vadd.f32 %v6972_v11, %v3644_v47  ;;  %v5404_v50 = vpop.f32.mrb[226].mxu1 }
 0x516   : > { %v3773_v41 = vsub.f32 0.0, %v3653_v27  ;;  %v3656_v9 = vadd.f32 %v5404_v50, %v6972_v11  ;;  %v3647_v22 = vpop.f32.mrb[227].mxu1 }
 0x517   : > { %v3771_v23 = vsub.f32 0.0, %v3645_v61  ;;  %v3648_v4 = vadd.f32 %v6972_v11, %v3647_v22 }
 0x518   : > { %v3807_v32 = vmul.f32 1.442695, %v3773_v41  ;;  %v3774_v14 = vsub.f32 0.0, %v3656_v9 }
 0x519   : > { %v3803_v34 = vmul.f32 1.442695, %v3771_v23  ;;  %v3772_v21 = vsub.f32 0.0, %v3648_v4 }
 0x51a   : > { %5564 = vpow2.f32 %v3807_v32  ;;  %v3809_v17 = vmul.f32 1.442695, %v3774_v14 }
 0x51b   : > { %5566 = vpow2.f32 %v3803_v34  ;;  %v3805_v56 = vmul.f32 1.442695, %v3772_v21  ;;  %v5407_v40 = vpop.f32.mrb[228].mxu1 }
 0x51c   : > { %5568 = vpow2.f32 %v3809_v17  ;;  %v3669_v25 = vadd.f32 %v5407_v40, %v6972_v11  ;;  %v3660_v6 = vpop.f32.mrb[229].mxu1 }
 0x51d   : > { %5570 = vpow2.f32 %v3805_v56  ;;  %v3661_v51 = vadd.f32 %v6972_v11, %v3660_v6  ;;  %v5408_v26 = vpop.f32.mrb[230].mxu1 }
 0x51e   : > { %v3777_v3 = vsub.f32 0.0, %v3669_v25  ;;  %v3672_v0 = vadd.f32 %v5408_v26, %v6972_v11  ;;  %v3663_v33 = vpop.f32.mrb[231].mxu1 }
 0x51f   : > { %v3775_v44 = vsub.f32 0.0, %v3661_v51  ;;  %v3664_v38 = vadd.f32 %v6972_v11, %v3663_v33 }
 0x520   : > { %v3815_v5 = vmul.f32 1.442695, %v3777_v3  ;;  %v3778_v49 = vsub.f32 0.0, %v3672_v0 }
 0x521   : > { %v3811_v45 = vmul.f32 1.442695, %v3775_v44  ;;  %v3776_v30 = vsub.f32 0.0, %v3664_v38 }
 0x522   : > { %5572 = vpow2.f32 %v3815_v5  ;;  %v3817_v31 = vmul.f32 1.442695, %v3778_v49 }
 0x523   : > { %5574 = vpow2.f32 %v3811_v45  ;;  %v3813_v58 = vmul.f32 1.442695, %v3776_v30  ;;  %v5411_v24 = vpop.f32.mrb[232].mxu1 }
 0x524   : > { %v5565_v16 = vpop.eup %5564  ;;  %5576 = vpow2.f32 %v3817_v31  ;;  %v3685_v12 = vadd.f32 %v5411_v24, %v6972_v11  ;;  %v3676_v29 = vpop.f32.mrb[233].mxu1 }
 0x525   : > { %v5567_v39 = vpop.eup %5566  ;;  %v3869_v20 = vadd.f32 1.0, %v5565_v16  ;;  %5578 = vpow2.f32 %v3813_v58  ;;  %v3677_v57 = vadd.f32 %v6972_v11, %v3676_v29  ;;  %v5412_v13 = vpop.f32.mrb[234].mxu1 }
 0x526   : > { %v5569_v48 = vpop.eup %5568  ;;  %v3867_v19 = vadd.f32 1.0, %v5567_v39  ;;  %v3781_v2 = vsub.f32 0.0, %v3685_v12  ;;  %v3688_v7 = vadd.f32 %v5412_v13, %v6972_v11  ;;  %v3679_v1 = vpop.f32.mrb[235].mxu1 }
 0x527   : > { %v5571_v62 = vpop.eup %5570  ;;  %5580 = vrcp.f32 %v3869_v20  ;;  %v3870_v8 = vadd.f32 1.0, %v5569_v48  ;;  %v3779_v37 = vsub.f32 0.0, %v3677_v57  ;;  %v3680_v35 = vadd.f32 %v6972_v11, %v3679_v1 }
 0x528   : > { %5582 = vrcp.f32 %v3867_v19  ;;  %v3868_v42 = vadd.f32 1.0, %v5571_v62  ;;  %v3823_v63 = vmul.f32 1.442695, %v3781_v2  ;;  %v3782_v52 = vsub.f32 0.0, %v3688_v7 }
 0x529   : > { %5584 = vrcp.f32 %v3870_v8  ;;  %v3819_v60 = vmul.f32 1.442695, %v3779_v37  ;;  %v3780_v54 = vsub.f32 0.0, %v3680_v35 }
 0x52a   : > { %5586 = vrcp.f32 %v3868_v42  ;;  %v3825_v55 = vmul.f32 1.442695, %v3782_v52 }
 0x52b   : > { %5588 = vpow2.f32 %v3823_v63  ;;  %v3821_v36 = vmul.f32 1.442695, %v3780_v54  ;;  %v5415_v28 = vpop.f32.mrb[236].mxu1 }
 0x52c   : > { %v5573_v46 = vpop.eup %5572  ;;  %5590 = vpow2.f32 %v3819_v60  ;;  %v3701_v10 = vadd.f32 %v5415_v28, %v6972_v11  ;;  %v3692_v18 = vpop.f32.mrb[237].mxu1 }
 0x52d   : > { %v5575_v43 = vpop.eup %5574  ;;  %v3873_v53 = vadd.f32 1.0, %v5573_v46  ;;  %5592 = vpow2.f32 %v3825_v55  ;;  %v3693_v59 = vadd.f32 %v6972_v11, %v3692_v18  ;;  %v5416_v15 = vpop.f32.mrb[238].mxu1 }
 0x52e   : > { %v5577_v27 = vpop.eup %5576  ;;  %v3871_v47 = vadd.f32 1.0, %v5575_v43  ;;  %5594 = vpow2.f32 %v3821_v36  ;;  %v3785_v61 = vsub.f32 0.0, %v3701_v10  ;;  %v3704_v50 = vadd.f32 %v5416_v15, %v6972_v11  ;;  %v3695_v41 = vpop.f32.mrb[239].mxu1 }
 0x52f   : > { %v5579_v9 = vpop.eup %5578  ;;  %5596 = vrcp.f32 %v3873_v53  ;;  %v3874_v22 = vadd.f32 1.0, %v5577_v27  ;;  %v3783_v23 = vsub.f32 0.0, %v3693_v59  ;;  %v3696_v4 = vadd.f32 %v6972_v11, %v3695_v41 }
 0x530   : > { %5598 = vrcp.f32 %v3871_v47  ;;  %v3872_v32 = vadd.f32 1.0, %v5579_v9  ;;  %v3831_v14 = vmul.f32 1.442695, %v3785_v61  ;;  %v3786_v34 = vsub.f32 0.0, %v3704_v50 }
 0x531   : > { %v5581_v21 = vpop.eup %5580  ;;  %5600 = vrcp.f32 %v3874_v22  ;;  %v3827_v17 = vmul.f32 1.442695, %v3783_v23  ;;  %v3784_v56 = vsub.f32 0.0, %v3696_v4 }
 0x532   : > { %v5583_v40 = vpop.eup %5582  ;;  %5602 = vrcp.f32 %v3872_v32  ;;  %v3833_v25 = vmul.f32 1.442695, %v3786_v34 }
 0x533   : > { %v5585_v6 = vpop.eup %5584  ;;  %5604 = vpow2.f32 %v3831_v14  ;;  %v3829_v51 = vmul.f32 1.442695, %v3784_v56  ;;  %v5419_v26 = vpop.f32.mrb[240].mxu1 }
 0x534   : > { %v5587_v3 = vpop.eup %5586  ;;  %v4404_v0 = vpack.c.bf16 %v5585_v6, %v5581_v21  ;;  %5606 = vpow2.f32 %v3827_v17  ;;  %v3717_v33 = vadd.f32 %v5419_v26, %v6972_v11  ;;  %v3708_v44 = vpop.f32.mrb[241].mxu1 }
 0x535   : > { %v5589_v38 = vpop.eup %5588  ;;  %v4399_v5 = vpack.c.bf16 %v5587_v3, %v5583_v40  ;;  %5608 = vpow2.f32 %v3833_v25  ;;  %v3709_v49 = vadd.f32 %v6972_v11, %v3708_v44  ;;  %v5420_v45 = vpop.f32.mrb[242].mxu1 }
 0x536   : > { %v5591_v30 = vpop.eup %5590  ;;  %4476 = vst [vmem:[%s6994_s11 + $0x8] sm:$0xff] %v4404_v0   ;;  %v3877_v31 = vadd.f32 1.0, %v5589_v38  ;;  %5610 = vpow2.f32 %v3829_v51  ;;  %v3789_v58 = vsub.f32 0.0, %v3717_v33  ;;  %v3720_v24 = vadd.f32 %v5420_v45, %v6972_v11  ;;  %v3711_v16 = vpop.f32.mrb[243].mxu1 }
 0x537   : > { %v5593_v12 = vpop.eup %5592  ;;  %4400 = vst [vmem:[%s6994_s11] sm:$0xff] %v4399_v5   ;;  %v3875_v29 = vadd.f32 1.0, %v5591_v30  ;;  %v3787_v39 = vsub.f32 0.0, %v3709_v49  ;;  %v3712_v20 = vadd.f32 %v6972_v11, %v3711_v16 }
 0x538   : > { %v5595_v57 = vpop.eup %5594  ;;  %5612 = vrcp.f32 %v3877_v31  ;;  %v3878_v13 = vadd.f32 1.0, %v5593_v12  ;;  %v3839_v48 = vmul.f32 1.442695, %v3789_v58  ;;  %v3790_v19 = vsub.f32 0.0, %v3720_v24 }
 0x539   : > { %v5597_v2 = vpop.eup %5596  ;;  %5614 = vrcp.f32 %v3875_v29  ;;  %v3876_v7 = vadd.f32 1.0, %v5595_v57  ;;  %v3835_v1 = vmul.f32 1.442695, %v3787_v39  ;;  %v3788_v62 = vsub.f32 0.0, %v3712_v20 }
 0x53a   : > { %v5599_v8 = vpop.eup %5598  ;;  %5616 = vrcp.f32 %v3878_v13  ;;  %v3841_v37 = vmul.f32 1.442695, %v3790_v19 }
 0x53b   : > { %v5601_v35 = vpop.eup %5600  ;;  %5618 = vrcp.f32 %v3876_v7  ;;  %v3837_v42 = vmul.f32 1.442695, %v3788_v62  ;;  %v5423_v63 = vpop.f32.mrb[244].mxu1 }
 0x53c   : > { %v5603_v52 = vpop.eup %5602  ;;  %v4414_v60 = vpack.c.bf16 %v5601_v35, %v5597_v2  ;;  %5620 = vpow2.f32 %v3839_v48  ;;  %v3733_v54 = vadd.f32 %v5423_v63, %v6972_v11  ;;  %v3724_v55 = vpop.f32.mrb[245].mxu1 }
 0x53d   : > { %v5605_v36 = vpop.eup %5604  ;;  %v4409_v28 = vpack.c.bf16 %v5603_v52, %v5599_v8  ;;  %5622 = vpow2.f32 %v3835_v1  ;;  %v3725_v46 = vadd.f32 %v6972_v11, %v3724_v55  ;;  %v5424_v10 = vpop.f32.mrb[246].mxu1 }
 0x53e   : > { %v5607_v18 = vpop.eup %5606  ;;  %4478 = vst [vmem:[%s6994_s11 + $0x18] sm:$0xff] %v4414_v60   ;;  %v3881_v43 = vadd.f32 1.0, %v5605_v36  ;;  %5624 = vpow2.f32 %v3841_v37  ;;  %v3793_v53 = vsub.f32 0.0, %v3733_v54  ;;  %v3736_v59 = vadd.f32 %v5424_v10, %v6972_v11  ;;  %v3727_v15 = vpop.f32.mrb[247].mxu1 }
 0x53f   : > { %v5609_v27 = vpop.eup %5608  ;;  %4477 = vst [vmem:[%s6994_s11 + $0x10] sm:$0xff] %v4409_v28   ;;  %v3879_v47 = vadd.f32 1.0, %v5607_v18  ;;  %5626 = vpow2.f32 %v3837_v42  ;;  %v3791_v61 = vsub.f32 0.0, %v3725_v46  ;;  %v3728_v50 = vadd.f32 %v6972_v11, %v3727_v15 }
 0x540   : > { %v5611_v41 = vpop.eup %5610  ;;  %5628 = vrcp.f32 %v3881_v43  ;;  %v3882_v9 = vadd.f32 1.0, %v5609_v27  ;;  %v3847_v22 = vmul.f32 1.442695, %v3793_v53  ;;  %v3794_v23 = vsub.f32 0.0, %v3736_v59 }
 0x541   : > { %5630 = vrcp.f32 %v3879_v47  ;;  %v3880_v4 = vadd.f32 1.0, %v5611_v41  ;;  %v3843_v32 = vmul.f32 1.442695, %v3791_v61  ;;  %v3792_v14 = vsub.f32 0.0, %v3728_v50 }
 0x542   : > { %v5613_v34 = vpop.eup %5612  ;;  %5632 = vrcp.f32 %v3882_v9  ;;  %v3849_v21 = vmul.f32 1.442695, %v3794_v23 }
 0x543   : > { %v5615_v17 = vpop.eup %5614  ;;  %5634 = vrcp.f32 %v3880_v4  ;;  %v3845_v56 = vmul.f32 1.442695, %v3792_v14  ;;  %v5427_v40 = vpop.f32.mrb[248].mxu1 }
 0x544   : > { %v5617_v25 = vpop.eup %5616  ;;  %5636 = vpow2.f32 %v3847_v22  ;;  %v3749_v6 = vadd.f32 %v5427_v40, %v6972_v11  ;;  %v3740_v51 = vpop.f32.mrb[249].mxu1 }
 0x545   : > { %v5619_v26 = vpop.eup %5618  ;;  %v4424_v3 = vpack.c.bf16 %v5617_v25, %v5613_v34  ;;  %5638 = vpow2.f32 %v3843_v32  ;;  %v3741_v0 = vadd.f32 %v6972_v11, %v3740_v51  ;;  %v5428_v33 = vpop.f32.mrb[250].mxu1 }
 0x546   : > { %v5621_v44 = vpop.eup %5620  ;;  %v4419_v38 = vpack.c.bf16 %v5619_v26, %v5615_v17  ;;  %5640 = vpow2.f32 %v3849_v21  ;;  %v3797_v5 = vsub.f32 0.0, %v3749_v6  ;;  %v3752_v49 = vadd.f32 %v5428_v33, %v6972_v11  ;;  %v3743_v45 = vpop.f32.mrb[251].mxu1 }
 0x547   : > { %v5623_v30 = vpop.eup %5622  ;;  %4480 = vst [vmem:[%s6994_s11 + $0x28] sm:$0xff] %v4424_v3   ;;  %v3885_v31 = vadd.f32 1.0, %v5621_v44  ;;  %5642 = vpow2.f32 %v3845_v56  ;;  %v3795_v58 = vsub.f32 0.0, %v3741_v0  ;;  %v3744_v24 = vadd.f32 %v6972_v11, %v3743_v45 }
 0x548   : > { %v5625_v16 = vpop.eup %5624  ;;  %4479 = vst [vmem:[%s6994_s11 + $0x20] sm:$0xff] %v4419_v38   ;;  %v3883_v12 = vadd.f32 1.0, %v5623_v30  ;;  %v3798_v29 = vsub.f32 0.0, %v3752_v49  ;;  %v3855_v57 = vmul.f32 1.442695, %v3797_v5 }
 0x549   : > { %v5627_v39 = vpop.eup %5626  ;;  %5644 = vrcp.f32 %v3885_v31  ;;  %v3886_v20 = vadd.f32 1.0, %v5625_v16  ;;  %v3796_v13 = vsub.f32 0.0, %v3744_v24  ;;  %v3851_v2 = vmul.f32 1.442695, %v3795_v58 }
 0x54a   : > { %v5629_v48 = vpop.eup %5628  ;;  %5646 = vrcp.f32 %v3883_v12  ;;  %v3884_v19 = vadd.f32 1.0, %v5627_v39  ;;  %v3857_v1 = vmul.f32 1.442695, %v3798_v29 }
 0x54b   : > { %v5631_v7 = vpop.eup %5630  ;;  %5648 = vrcp.f32 %v3886_v20  ;;  %v5431_v62 = vpop.f32.mrb[252].mxu1  ;;  %v3853_v37 = vmul.f32 1.442695, %v3796_v13 }
 0x54c   : > { %v5633_v8 = vpop.eup %5632  ;;  %5650 = vrcp.f32 %v3884_v19  ;;  %v3765_v35 = vadd.f32 %v5431_v62, %v6972_v11  ;;  %v3756_v42 = vpop.f32.mrb[253].mxu1 }
 0x54d   : > { %v5635_v63 = vpop.eup %5634  ;;  %v4434_v52 = vpack.c.bf16 %v5633_v8, %v5629_v48  ;;  %5652 = vpow2.f32 %v3855_v57  ;;  %v3757_v60 = vadd.f32 %v6972_v11, %v3756_v42  ;;  %v5432_v54 = vpop.f32.mrb[254].mxu1 }
 0x54e   : > { %v5637_v55 = vpop.eup %5636  ;;  %v4429_v36 = vpack.c.bf16 %v5635_v63, %v5631_v7  ;;  %5654 = vpow2.f32 %v3851_v2  ;;  %v3801_v28 = vsub.f32 0.0, %v3765_v35  ;;  %v3768_v46 = vadd.f32 %v5432_v54, %v6972_v11  ;;  %v3759_v10 = vpop.f32.mrb[255].mxu1 }
 0x54f   : > { %v5639_v18 = vpop.eup %5638  ;;  %4482 = vst [vmem:[%s6994_s11 + $0x38] sm:$0xff] %v4434_v52   ;;  %v3889_v43 = vadd.f32 1.0, %v5637_v55  ;;  %5656 = vpow2.f32 %v3857_v1  ;;  %v3799_v53 = vsub.f32 0.0, %v3757_v60  ;;  %v3760_v59 = vadd.f32 %v6972_v11, %v3759_v10 }
 0x550   : > { %v5641_v15 = vpop.eup %5640  ;;  %4481 = vst [vmem:[%s6994_s11 + $0x30] sm:$0xff] %v4429_v36   ;;  %v3887_v27 = vadd.f32 1.0, %v5639_v18  ;;  %5658 = vpow2.f32 %v3853_v37  ;;  %v3802_v47 = vsub.f32 0.0, %v3768_v46  ;;  %v3863_v41 = vmul.f32 1.442695, %v3801_v28 }
 0x551   : > { %v5643_v61 = vpop.eup %5642  ;;  %5660 = vrcp.f32 %v3889_v43  ;;  %v3890_v50 = vadd.f32 1.0, %v5641_v15  ;;  %v3800_v9 = vsub.f32 0.0, %v3760_v59  ;;  %v3859_v23 = vmul.f32 1.442695, %v3799_v53 }
 0x552   : > { %5662 = vrcp.f32 %v3887_v27  ;;  %v3888_v22 = vadd.f32 1.0, %v5643_v61  ;;  %v3865_v32 = vmul.f32 1.442695, %v3802_v47 }
 0x553   : > { %v5645_v4 = vpop.eup %5644  ;;  %5664 = vrcp.f32 %v3890_v50  ;;  %v3861_v11 = vmul.f32 1.442695, %v3800_v9 }
 0x554   : > { %v5647_v14 = vpop.eup %5646  ;;  %5666 = vrcp.f32 %v3888_v22 }
 0x555   : > { %v5649_v34 = vpop.eup %5648  ;;  %5668 = vpow2.f32 %v3863_v41 }
 0x556   : > { %v5651_v21 = vpop.eup %5650  ;;  %v4444_v17 = vpack.c.bf16 %v5649_v34, %v5645_v4  ;;  %5670 = vpow2.f32 %v3859_v23 }
 0x557   : > { %v5653_v56 = vpop.eup %5652  ;;  %v4439_v40 = vpack.c.bf16 %v5651_v21, %v5647_v14  ;;  %5672 = vpow2.f32 %v3865_v32 }
 0x558   : > { %v5655_v25 = vpop.eup %5654  ;;  %4484 = vst [vmem:[%s6994_s11 + $0x48] sm:$0xff] %v4444_v17   ;;  %v3893_v6 = vadd.f32 1.0, %v5653_v56  ;;  %5674 = vpow2.f32 %v3861_v11 }
 0x559   : > { %v5657_v51 = vpop.eup %5656  ;;  %4483 = vst [vmem:[%s6994_s11 + $0x40] sm:$0xff] %v4439_v40   ;;  %v3891_v26 = vadd.f32 1.0, %v5655_v25 }
 0x55a   : > { %v5659_v3 = vpop.eup %5658  ;;  %5676 = vrcp.f32 %v3893_v6  ;;  %v3894_v0 = vadd.f32 1.0, %v5657_v51 }
 0x55b   : > { %v5661_v33 = vpop.eup %5660  ;;  %5678 = vrcp.f32 %v3891_v26  ;;  %v3892_v44 = vadd.f32 1.0, %v5659_v3 }
 0x55c   : > { %v5663_v38 = vpop.eup %5662  ;;  %5680 = vrcp.f32 %v3894_v0 }
 0x55d   : > { %v5665_v5 = vpop.eup %5664  ;;  %5682 = vrcp.f32 %v3892_v44 }
 0x55e   : > { %v5667_v49 = vpop.eup %5666  ;;  %v4454_v45 = vpack.c.bf16 %v5665_v5, %v5661_v33 }
 0x55f   : > { %v5669_v30 = vpop.eup %5668  ;;  %v4449_v31 = vpack.c.bf16 %v5667_v49, %v5663_v38 }
 0x560   : > { %v5671_v58 = vpop.eup %5670  ;;  %4486 = vst [vmem:[%s6994_s11 + $0x58] sm:$0xff] %v4454_v45   ;;  %v3897_v24 = vadd.f32 1.0, %v5669_v30 }
 0x561   : > { %v5673_v16 = vpop.eup %5672  ;;  %4485 = vst [vmem:[%s6994_s11 + $0x50] sm:$0xff] %v4449_v31   ;;  %v3895_v12 = vadd.f32 1.0, %v5671_v58 }
 0x562   : > { %v5675_v29 = vpop.eup %5674  ;;  %5684 = vrcp.f32 %v3897_v24  ;;  %v3898_v39 = vadd.f32 1.0, %v5673_v16 }
 0x563   : > { %5686 = vrcp.f32 %v3895_v12  ;;  %v3896_v20 = vadd.f32 1.0, %v5675_v29 }
 0x564   : > { %v5677_v57 = vpop.eup %5676  ;;  %5688 = vrcp.f32 %v3898_v39 }
 0x565   : > { %v5679_v13 = vpop.eup %5678  ;;  %5690 = vrcp.f32 %v3896_v20 }
 0x566   : > { %v5681_v48 = vpop.eup %5680 }
 0x567   : > { %v5683_v19 = vpop.eup %5682  ;;  %v4464_v2 = vpack.c.bf16 %v5681_v48, %v5677_v57 }
 0x568   : > { %v4459_v7 = vpack.c.bf16 %v5683_v19, %v5679_v13 }
 0x569   : > { %4488 = vst [vmem:[%s6994_s11 + $0x68] sm:$0xff] %v4464_v2  }
 0x56a   : > { %4487 = vst [vmem:[%s6994_s11 + $0x60] sm:$0xff] %v4459_v7  }
 0x56c   : > { %v5685_v1 = vpop.eup %5684 }
 0x56d   : > { %v5687_v62 = vpop.eup %5686 }
 0x56e   : > { %v5689_v8 = vpop.eup %5688 }
 0x56f   : > { %v5691_v37 = vpop.eup %5690  ;;  %v4474_v35 = vpack.c.bf16 %v5689_v8, %v5685_v1 }
 0x570   : > { %v4469_v42 = vpack.c.bf16 %v5691_v37, %v5687_v62 }
 0x571   : > { %4490 = vst [vmem:[%s6994_s11 + $0x78] sm:$0xff] %v4474_v35  }
 0x572   : > { %4489 = vst [vmem:[%s6994_s11 + $0x70] sm:$0xff] %v4469_v42  }
 0x573 PF: > { %s19_s30 = sadd.s32 1, %s5698_s30  }
 0x574   : > { %p16_p4 = scmp.ge.s32.totalorder %s19_s30, 4  }
 0x576   :  { %18 = sbr.rel (!%p16_p4) target bundleno = 1 (0x1), region = 86 }

</bundles_post_ra>
